<compile_context>
chip_gen: v5e
topology: v5e:2x2
jax: 0.10.0
libtpu: 0.0.40
codegen_flags: <defaults>
</compile_context>

<pallas_src>
import jax
import jax.numpy as jnp
from jax.experimental import pallas as pl
from jax.experimental.pallas import tpu as pltpu

IN_C, OUT_C, KH, KW = 3, 6, 3, 3

# Max packed lane width (f32 lanes) per grid step.  Keeps the live vreg set
# (6 accumulators + source plane + one rolled plane + one window copy) around
# ~40 of the 64 vregs so nothing spills (spill vst/vld would land on the
# single store slot on v5e).
_MAX_LANES = 256


def _conv2d_kernel(w_ref, b_ref, x_ref, o_ref):
    """VPU shifted-window 3x3 valid conv on a lane-packed batch chunk.

    w_ref : SMEM (OUT_C*IN_C*KH*KW,) -- flattened OIHW weights (scalar reads)
    b_ref : SMEM (OUT_C,)
    x_ref : VMEM (IN_C, H, L) -- images packed side by side along lanes:
            lane n*W + j holds column j of image n; L is a multiple of 128.
    o_ref : VMEM (OUT_C, OH, L) -- lane-dense stores.
    """
    _, H, L = x_ref.shape
    _, OH, _ = o_ref.shape

    # One f32 accumulator per output channel, initialized with the broadcast
    # bias (drops the epilogue add).
    accs = [jnp.full((OH, L), b_ref[oc], dtype=jnp.float32)
            for oc in range(OUT_C)]

    for ic in range(IN_C):
        plane = x_ref[ic]                                   # (H, L), loaded once
        for kj in range(KW):
            # Lane shift on the XLU: shifted[:, p] == plane[:, (p + kj) % L].
            # Wrapped lanes only land in per-image columns [OW, W), which the
            # wrapper discards, so semantics are unchanged (stride=1, pad=0).
            shifted = plane if kj == 0 else pltpu.roll(plane, shift=L - kj, axis=1)
            for ki in range(KH):
                win = shifted[ki:ki + OH, :]                # (OH, L), reused by all oc
                for oc in range(OUT_C):
                    w = w_ref[((oc * IN_C + ic) * KH + ki) * KW + kj]
                    accs[oc] = accs[oc] + w * win

    for oc in range(OUT_C):
        o_ref[oc, :, :] = accs[oc].astype(o_ref.dtype)


def _tpu_caps():
    """Best-effort (vmem_capacity_bytes, tensorcores_per_chip)."""
    vmem_cap = 128 << 20
    kind = ""
    try:
        kind = jax.devices()[0].device_kind.lower()
    except Exception:
        pass
    try:
        info = pltpu.get_tpu_info()
        vmem_cap = int(getattr(info, "vmem_capacity_bytes", vmem_cap))
    except Exception:
        pass
    # v7x: 2 TensorCores / 64 MiB VMEM per core; v5e/v6e: 1 TC / 128 MiB.
    two_cores = ("v7" in kind) or ("7x" in kind) or (vmem_cap <= (64 << 20))
    return vmem_cap, (2 if two_cores else 1)


def _choose_images_per_step(n, w, num_tc):
    """How many images to pack into the lane dim per grid step.

    Single-TC chips (v5e/v6e): the grid is a serial loop, so minimize the
    number of steps (largest nb under the lane cap) -- per-step overhead
    (~600 cycles) dominates the tiny VALU body at these sizes.
    Two-TC chips (v7x): keep >= 2 steps when the batch allows, preferring an
    EVEN step count so both TensorCores get the same number of steps.
    """
    divisors = [d for d in range(1, n + 1) if n % d == 0]
    capped = [d for d in divisors if d * w <= _MAX_LANES] or [1]
    if num_tc >= 2:
        even = [d for d in capped if (n // d) >= 2 and (n // d) % 2 == 0]
        multi = [d for d in capped if (n // d) >= 2]
        pool = even or multi or capped
    else:
        pool = capped
    return max(pool, key=lambda d: d * w)


def conv2d_pallas(x, weight, bias, *, images_per_step=None):
    """x: (N, 3, H, W); weight: (6, 3, 3, 3); bias: (6,). Returns (N, 6, H-2, W-2)."""
    N, C, H, W = x.shape
    assert C == IN_C, f"expected {IN_C} input channels, got {C}"
    assert H >= KH and W >= KW
    OH, OW = H - KH + 1, W - KW + 1

    vmem_cap, num_tc = _tpu_caps()
    if images_per_step is None:
        images_per_step = _choose_images_per_step(N, W, num_tc)
    nb = images_per_step
    assert N % nb == 0, "images_per_step must divide the batch size"
    G = N // nb                      # grid steps
    L0 = nb * W                      # packed (valid) lane width of one chunk
    L = ((L0 + 127) // 128) * 128    # round up to a lane multiple: dense stores + safe roll

    x = x.astype(jnp.float32)
    w_flat = weight.reshape(-1).astype(jnp.float32)
    b = bias.astype(jnp.float32)

    # Pack nb images side by side along the lane (last) dim (no KW-1 pad --
    # the in-kernel roll supplies the kj shifts):
    #   xp[g, c, h, n*W + j] = x[g*nb + n, c, h, j]
    # NOTE: this pack and the unpack below are pure layout plumbing; if this
    # conv feeds another packed-layout kernel, keep the (G, OUT_C, OH, L)
    # layout between kernels instead of round-tripping through NCHW.
    xp = x.reshape(G, nb, C, H, W).transpose(0, 2, 3, 1, 4).reshape(G, C, H, L0)
    if L != L0:  # only for narrow fallback chunks (< one full vreg of lanes)
        xp = jnp.pad(xp, ((0, 0), (0, 0), (0, 0), (0, L - L0)))

    # TODO(synk): for large H, add an OH row-tiling grid axis with a KH-1 halo
    # so the (C, H, L) input block stays a few MiB within v7x's 64 MiB VMEM.
    x_block_bytes = C * H * L * 4
    o_block_bytes = OUT_C * OH * L * 4
    vmem_limit = int(min(vmem_cap // 2,
                         max(8 << 20, 4 * (x_block_bytes + o_block_bytes))))

    cost = pl.CostEstimate(
        flops=2 * N * OUT_C * OH * OW * IN_C * KH * KW,
        transcendentals=0,
        bytes_accessed=4 * (x.size + N * OUT_C * OH * OW + w_flat.size + b.size))

    out_packed = pl.pallas_call(
        _conv2d_kernel,
        out_shape=jax.ShapeDtypeStruct((G, OUT_C, OH, L), jnp.float32),
        grid=(G,),
        in_specs=[
            # Tiny weights / bias live whole in SMEM for scalar indexing.
            pl.BlockSpec(memory_space=pltpu.MemorySpace.SMEM),
            pl.BlockSpec(memory_space=pltpu.MemorySpace.SMEM),
            # One packed batch chunk per grid step; chunk dim squeezed out.
            pl.BlockSpec((None, C, H, L), lambda g: (g, 0, 0, 0)),
        ],
        out_specs=pl.BlockSpec((None, OUT_C, OH, L), lambda g: (g, 0, 0, 0)),
        compiler_params=pltpu.CompilerParams(
            dimension_semantics=("parallel",),
            vmem_limit_bytes=vmem_limit),
        cost_estimate=cost,
    )(w_flat, b, xp)

    # Unpack: (G, OUT_C, OH, L) -> (N, OUT_C, OH, OW); per-image columns
    # j in [OW, W) (and the lane round-up pad) are the discarded shift slack.
    out = out_packed[..., :L0].reshape(G, OUT_C, OH, nb, W)
    out = out.transpose(0, 3, 1, 2, 4).reshape(N, OUT_C, OH, W)
    return out[..., :OW]


if __name__ == "__main__":
    key = jax.random.PRNGKey(0)
    kx, kw, kb = jax.random.split(key, 3)

    # Small shapes consistent with the module (conv expects 3 input channels).
    N, C, H, W = 16, 3, 16, 16
    x = jax.random.normal(kx, (N, C, H, W), dtype=jnp.float32)

    # Deterministic PyTorch-style kaiming-uniform init.
    fan_in = IN_C * KH * KW
    bound = 1.0 / (fan_in ** 0.5)
    weight = jax.random.uniform(kw, (OUT_C, IN_C, KH, KW), jnp.float32,
                                minval=-bound, maxval=bound)
    bias = jax.random.uniform(kb, (OUT_C,), jnp.float32,
                              minval=-bound, maxval=bound)

    out = jax.block_until_ready(conv2d_pallas(x, weight, bias))

    # Reference: XLA conv (same semantics as torch.nn.Conv2d, padding=0).
    ref = jax.lax.conv_general_dilated(
        x, weight, window_strides=(1, 1), padding="VALID",
        dimension_numbers=("NCHW", "OIHW", "NCHW")) + bias[None, :, None, None]
    assert out.shape == (N, OUT_C, H - KH + 1, W - KW + 1)
    assert jnp.allclose(out, ref, atol=1e-4, rtol=1e-4)

    # Narrow-lane / small-batch fallback path (nb=2, lanes rounded up to 128).
    out2 = jax.block_until_ready(conv2d_pallas(x[:2], weight, bias))
    assert jnp.allclose(out2, ref[:2], atol=1e-4, rtol=1e-4)

    # Multi-step (G=2) path, as chosen on two-TensorCore (v7x) chips.
    out3 = jax.block_until_ready(conv2d_pallas(x, weight, bias, images_per_step=8))
    assert jnp.allclose(out3, ref, atol=1e-4, rtol=1e-4)

    print("KERNEL_OK")
</pallas_src>

<mosaic_0001>
module attributes {stable_mosaic.version = 11 : i64} {
  func.func @_conv2d_kernel(%arg0: i32, %arg1: memref<162xf32, #tpu.memory_space<smem>>, %arg2: memref<6xf32, #tpu.memory_space<smem>>, %arg3: memref<1x3x16x256xf32, #tpu.memory_space<vmem>>, %arg4: memref<1x6x14x256xf32, #tpu.memory_space<vmem>>) attributes {dimension_semantics = [#tpu.dimension_semantics<parallel>], iteration_bounds = array<i64: 1>, scalar_prefetch = 0 : i64, scratch_operands = 0 : i64, tpu.core_type = #tpu.core_type<tc>, window_params = [{transform_indices = @transform_0, window_bounds = array<i64: 162>}, {transform_indices = @transform_1, window_bounds = array<i64: 6>}, {transform_indices = @transform_2, window_bounds = array<i64: 1, 3, 16, 256>}, {transform_indices = @transform_3, window_bounds = array<i64: 1, 6, 14, 256>}]} {
    %c0 = arith.constant 0 : index
    %0 = memref.load %arg2[%c0] : memref<6xf32, #tpu.memory_space<smem>>
    %1 = vector.broadcast %0 : f32 to vector<14x256xf32>
    %c1 = arith.constant 1 : index
    %2 = memref.load %arg2[%c1] : memref<6xf32, #tpu.memory_space<smem>>
    %3 = vector.broadcast %2 : f32 to vector<14x256xf32>
    %c2 = arith.constant 2 : index
    %4 = memref.load %arg2[%c2] : memref<6xf32, #tpu.memory_space<smem>>
    %5 = vector.broadcast %4 : f32 to vector<14x256xf32>
    %c3 = arith.constant 3 : index
    %6 = memref.load %arg2[%c3] : memref<6xf32, #tpu.memory_space<smem>>
    %7 = vector.broadcast %6 : f32 to vector<14x256xf32>
    %c4 = arith.constant 4 : index
    %8 = memref.load %arg2[%c4] : memref<6xf32, #tpu.memory_space<smem>>
    %9 = vector.broadcast %8 : f32 to vector<14x256xf32>
    %c5 = arith.constant 5 : index
    %10 = memref.load %arg2[%c5] : memref<6xf32, #tpu.memory_space<smem>>
    %11 = vector.broadcast %10 : f32 to vector<14x256xf32>
    %c0_0 = arith.constant 0 : index
    %c0_1 = arith.constant 0 : index
    %c0_2 = arith.constant 0 : index
    %c0_3 = arith.constant 0 : index
    %12 = vector.load %arg3[%c0_0, %c0_1, %c0_2, %c0_3] : memref<1x3x16x256xf32, #tpu.memory_space<vmem>>, vector<1x1x16x256xf32>
    %13 = vector.shape_cast %12 : vector<1x1x16x256xf32> to vector<16x256xf32>
    %14 = vector.extract_strided_slice %13 {offsets = [0, 0], sizes = [14, 256], strides = [1, 1]} : vector<16x256xf32> to vector<14x256xf32>
    %c0_4 = arith.constant 0 : index
    %15 = memref.load %arg1[%c0_4] : memref<162xf32, #tpu.memory_space<smem>>
    %16 = vector.broadcast %15 : f32 to vector<14x256xf32>
    %17 = arith.mulf %16, %14 : vector<14x256xf32>
    %18 = arith.addf %1, %17 : vector<14x256xf32>
    %c27 = arith.constant 27 : index
    %19 = memref.load %arg1[%c27] : memref<162xf32, #tpu.memory_space<smem>>
    %20 = vector.broadcast %19 : f32 to vector<14x256xf32>
    %21 = arith.mulf %20, %14 : vector<14x256xf32>
    %22 = arith.addf %3, %21 : vector<14x256xf32>
    %c54 = arith.constant 54 : index
    %23 = memref.load %arg1[%c54] : memref<162xf32, #tpu.memory_space<smem>>
    %24 = vector.broadcast %23 : f32 to vector<14x256xf32>
    %25 = arith.mulf %24, %14 : vector<14x256xf32>
    %26 = arith.addf %5, %25 : vector<14x256xf32>
    %c81 = arith.constant 81 : index
    %27 = memref.load %arg1[%c81] : memref<162xf32, #tpu.memory_space<smem>>
    %28 = vector.broadcast %27 : f32 to vector<14x256xf32>
    %29 = arith.mulf %28, %14 : vector<14x256xf32>
    %30 = arith.addf %7, %29 : vector<14x256xf32>
    %c108 = arith.constant 108 : index
    %31 = memref.load %arg1[%c108] : memref<162xf32, #tpu.memory_space<smem>>
    %32 = vector.broadcast %31 : f32 to vector<14x256xf32>
    %33 = arith.mulf %32, %14 : vector<14x256xf32>
    %34 = arith.addf %9, %33 : vector<14x256xf32>
    %c135 = arith.constant 135 : index
    %35 = memref.load %arg1[%c135] : memref<162xf32, #tpu.memory_space<smem>>
    %36 = vector.broadcast %35 : f32 to vector<14x256xf32>
    %37 = arith.mulf %36, %14 : vector<14x256xf32>
    %38 = arith.addf %11, %37 : vector<14x256xf32>
    %39 = vector.extract_strided_slice %13 {offsets = [1, 0], sizes = [14, 256], strides = [1, 1]} : vector<16x256xf32> to vector<14x256xf32>
    %c3_5 = arith.constant 3 : index
    %40 = memref.load %arg1[%c3_5] : memref<162xf32, #tpu.memory_space<smem>>
    %41 = vector.broadcast %40 : f32 to vector<14x256xf32>
    %42 = arith.mulf %41, %39 : vector<14x256xf32>
    %43 = arith.addf %18, %42 : vector<14x256xf32>
    %c30 = arith.constant 30 : index
    %44 = memref.load %arg1[%c30] : memref<162xf32, #tpu.memory_space<smem>>
    %45 = vector.broadcast %44 : f32 to vector<14x256xf32>
    %46 = arith.mulf %45, %39 : vector<14x256xf32>
    %47 = arith.addf %22, %46 : vector<14x256xf32>
    %c57 = arith.constant 57 : index
    %48 = memref.load %arg1[%c57] : memref<162xf32, #tpu.memory_space<smem>>
    %49 = vector.broadcast %48 : f32 to vector<14x256xf32>
    %50 = arith.mulf %49, %39 : vector<14x256xf32>
    %51 = arith.addf %26, %50 : vector<14x256xf32>
    %c84 = arith.constant 84 : index
    %52 = memref.load %arg1[%c84] : memref<162xf32, #tpu.memory_space<smem>>
    %53 = vector.broadcast %52 : f32 to vector<14x256xf32>
    %54 = arith.mulf %53, %39 : vector<14x256xf32>
    %55 = arith.addf %30, %54 : vector<14x256xf32>
    %c111 = arith.constant 111 : index
    %56 = memref.load %arg1[%c111] : memref<162xf32, #tpu.memory_space<smem>>
    %57 = vector.broadcast %56 : f32 to vector<14x256xf32>
    %58 = arith.mulf %57, %39 : vector<14x256xf32>
    %59 = arith.addf %34, %58 : vector<14x256xf32>
    %c138 = arith.constant 138 : index
    %60 = memref.load %arg1[%c138] : memref<162xf32, #tpu.memory_space<smem>>
    %61 = vector.broadcast %60 : f32 to vector<14x256xf32>
    %62 = arith.mulf %61, %39 : vector<14x256xf32>
    %63 = arith.addf %38, %62 : vector<14x256xf32>
    %64 = vector.extract_strided_slice %13 {offsets = [2, 0], sizes = [14, 256], strides = [1, 1]} : vector<16x256xf32> to vector<14x256xf32>
    %c6 = arith.constant 6 : index
    %65 = memref.load %arg1[%c6] : memref<162xf32, #tpu.memory_space<smem>>
    %66 = vector.broadcast %65 : f32 to vector<14x256xf32>
    %67 = arith.mulf %66, %64 : vector<14x256xf32>
    %68 = arith.addf %43, %67 : vector<14x256xf32>
    %c33 = arith.constant 33 : index
    %69 = memref.load %arg1[%c33] : memref<162xf32, #tpu.memory_space<smem>>
    %70 = vector.broadcast %69 : f32 to vector<14x256xf32>
    %71 = arith.mulf %70, %64 : vector<14x256xf32>
    %72 = arith.addf %47, %71 : vector<14x256xf32>
    %c60 = arith.constant 60 : index
    %73 = memref.load %arg1[%c60] : memref<162xf32, #tpu.memory_space<smem>>
    %74 = vector.broadcast %73 : f32 to vector<14x256xf32>
    %75 = arith.mulf %74, %64 : vector<14x256xf32>
    %76 = arith.addf %51, %75 : vector<14x256xf32>
    %c87 = arith.constant 87 : index
    %77 = memref.load %arg1[%c87] : memref<162xf32, #tpu.memory_space<smem>>
    %78 = vector.broadcast %77 : f32 to vector<14x256xf32>
    %79 = arith.mulf %78, %64 : vector<14x256xf32>
    %80 = arith.addf %55, %79 : vector<14x256xf32>
    %c114 = arith.constant 114 : index
    %81 = memref.load %arg1[%c114] : memref<162xf32, #tpu.memory_space<smem>>
    %82 = vector.broadcast %81 : f32 to vector<14x256xf32>
    %83 = arith.mulf %82, %64 : vector<14x256xf32>
    %84 = arith.addf %59, %83 : vector<14x256xf32>
    %c141 = arith.constant 141 : index
    %85 = memref.load %arg1[%c141] : memref<162xf32, #tpu.memory_space<smem>>
    %86 = vector.broadcast %85 : f32 to vector<14x256xf32>
    %87 = arith.mulf %86, %64 : vector<14x256xf32>
    %88 = arith.addf %63, %87 : vector<14x256xf32>
    %c255_i32 = arith.constant 255 : i32
    %89 = tpu.dynamic_rotate %13 by %c255_i32 dim 1 : vector<16x256xf32>, i32 -> vector<16x256xf32>
    %90 = vector.extract_strided_slice %89 {offsets = [0, 0], sizes = [14, 256], strides = [1, 1]} : vector<16x256xf32> to vector<14x256xf32>
    %c1_6 = arith.constant 1 : index
    %91 = memref.load %arg1[%c1_6] : memref<162xf32, #tpu.memory_space<smem>>
    %92 = vector.broadcast %91 : f32 to vector<14x256xf32>
    %93 = arith.mulf %92, %90 : vector<14x256xf32>
    %94 = arith.addf %68, %93 : vector<14x256xf32>
    %c28 = arith.constant 28 : index
    %95 = memref.load %arg1[%c28] : memref<162xf32, #tpu.memory_space<smem>>
    %96 = vector.broadcast %95 : f32 to vector<14x256xf32>
    %97 = arith.mulf %96, %90 : vector<14x256xf32>
    %98 = arith.addf %72, %97 : vector<14x256xf32>
    %c55 = arith.constant 55 : index
    %99 = memref.load %arg1[%c55] : memref<162xf32, #tpu.memory_space<smem>>
    %100 = vector.broadcast %99 : f32 to vector<14x256xf32>
    %101 = arith.mulf %100, %90 : vector<14x256xf32>
    %102 = arith.addf %76, %101 : vector<14x256xf32>
    %c82 = arith.constant 82 : index
    %103 = memref.load %arg1[%c82] : memref<162xf32, #tpu.memory_space<smem>>
    %104 = vector.broadcast %103 : f32 to vector<14x256xf32>
    %105 = arith.mulf %104, %90 : vector<14x256xf32>
    %106 = arith.addf %80, %105 : vector<14x256xf32>
    %c109 = arith.constant 109 : index
    %107 = memref.load %arg1[%c109] : memref<162xf32, #tpu.memory_space<smem>>
    %108 = vector.broadcast %107 : f32 to vector<14x256xf32>
    %109 = arith.mulf %108, %90 : vector<14x256xf32>
    %110 = arith.addf %84, %109 : vector<14x256xf32>
    %c136 = arith.constant 136 : index
    %111 = memref.load %arg1[%c136] : memref<162xf32, #tpu.memory_space<smem>>
    %112 = vector.broadcast %111 : f32 to vector<14x256xf32>
    %113 = arith.mulf %112, %90 : vector<14x256xf32>
    %114 = arith.addf %88, %113 : vector<14x256xf32>
    %115 = vector.extract_strided_slice %89 {offsets = [1, 0], sizes = [14, 256], strides = [1, 1]} : vector<16x256xf32> to vector<14x256xf32>
    %c4_7 = arith.constant 4 : index
    %116 = memref.load %arg1[%c4_7] : memref<162xf32, #tpu.memory_space<smem>>
    %117 = vector.broadcast %116 : f32 to vector<14x256xf32>
    %118 = arith.mulf %117, %115 : vector<14x256xf32>
    %119 = arith.addf %94, %118 : vector<14x256xf32>
    %c31 = arith.constant 31 : index
    %120 = memref.load %arg1[%c31] : memref<162xf32, #tpu.memory_space<smem>>
    %121 = vector.broadcast %120 : f32 to vector<14x256xf32>
    %122 = arith.mulf %121, %115 : vector<14x256xf32>
    %123 = arith.addf %98, %122 : vector<14x256xf32>
    %c58 = arith.constant 58 : index
    %124 = memref.load %arg1[%c58] : memref<162xf32, #tpu.memory_space<smem>>
    %125 = vector.broadcast %124 : f32 to vector<14x256xf32>
    %126 = arith.mulf %125, %115 : vector<14x256xf32>
    %127 = arith.addf %102, %126 : vector<14x256xf32>
    %c85 = arith.constant 85 : index
    %128 = memref.load %arg1[%c85] : memref<162xf32, #tpu.memory_space<smem>>
    %129 = vector.broadcast %128 : f32 to vector<14x256xf32>
    %130 = arith.mulf %129, %115 : vector<14x256xf32>
    %131 = arith.addf %106, %130 : vector<14x256xf32>
    %c112 = arith.constant 112 : index
    %132 = memref.load %arg1[%c112] : memref<162xf32, #tpu.memory_space<smem>>
    %133 = vector.broadcast %132 : f32 to vector<14x256xf32>
    %134 = arith.mulf %133, %115 : vector<14x256xf32>
    %135 = arith.addf %110, %134 : vector<14x256xf32>
    %c139 = arith.constant 139 : index
    %136 = memref.load %arg1[%c139] : memref<162xf32, #tpu.memory_space<smem>>
    %137 = vector.broadcast %136 : f32 to vector<14x256xf32>
    %138 = arith.mulf %137, %115 : vector<14x256xf32>
    %139 = arith.addf %114, %138 : vector<14x256xf32>
    %140 = vector.extract_strided_slice %89 {offsets = [2, 0], sizes = [14, 256], strides = [1, 1]} : vector<16x256xf32> to vector<14x256xf32>
    %c7 = arith.constant 7 : index
    %141 = memref.load %arg1[%c7] : memref<162xf32, #tpu.memory_space<smem>>
    %142 = vector.broadcast %141 : f32 to vector<14x256xf32>
    %143 = arith.mulf %142, %140 : vector<14x256xf32>
    %144 = arith.addf %119, %143 : vector<14x256xf32>
    %c34 = arith.constant 34 : index
    %145 = memref.load %arg1[%c34] : memref<162xf32, #tpu.memory_space<smem>>
    %146 = vector.broadcast %145 : f32 to vector<14x256xf32>
    %147 = arith.mulf %146, %140 : vector<14x256xf32>
    %148 = arith.addf %123, %147 : vector<14x256xf32>
    %c61 = arith.constant 61 : index
    %149 = memref.load %arg1[%c61] : memref<162xf32, #tpu.memory_space<smem>>
    %150 = vector.broadcast %149 : f32 to vector<14x256xf32>
    %151 = arith.mulf %150, %140 : vector<14x256xf32>
    %152 = arith.addf %127, %151 : vector<14x256xf32>
    %c88 = arith.constant 88 : index
    %153 = memref.load %arg1[%c88] : memref<162xf32, #tpu.memory_space<smem>>
    %154 = vector.broadcast %153 : f32 to vector<14x256xf32>
    %155 = arith.mulf %154, %140 : vector<14x256xf32>
    %156 = arith.addf %131, %155 : vector<14x256xf32>
    %c115 = arith.constant 115 : index
    %157 = memref.load %arg1[%c115] : memref<162xf32, #tpu.memory_space<smem>>
    %158 = vector.broadcast %157 : f32 to vector<14x256xf32>
    %159 = arith.mulf %158, %140 : vector<14x256xf32>
    %160 = arith.addf %135, %159 : vector<14x256xf32>
    %c142 = arith.constant 142 : index
    %161 = memref.load %arg1[%c142] : memref<162xf32, #tpu.memory_space<smem>>
    %162 = vector.broadcast %161 : f32 to vector<14x256xf32>
    %163 = arith.mulf %162, %140 : vector<14x256xf32>
    %164 = arith.addf %139, %163 : vector<14x256xf32>
    %c254_i32 = arith.constant 254 : i32
    %165 = tpu.dynamic_rotate %13 by %c254_i32 dim 1 : vector<16x256xf32>, i32 -> vector<16x256xf32>
    %166 = vector.extract_strided_slice %165 {offsets = [0, 0], sizes = [14, 256], strides = [1, 1]} : vector<16x256xf32> to vector<14x256xf32>
    %c2_8 = arith.constant 2 : index
    %167 = memref.load %arg1[%c2_8] : memref<162xf32, #tpu.memory_space<smem>>
    %168 = vector.broadcast %167 : f32 to vector<14x256xf32>
    %169 = arith.mulf %168, %166 : vector<14x256xf32>
    %170 = arith.addf %144, %169 : vector<14x256xf32>
    %c29 = arith.constant 29 : index
    %171 = memref.load %arg1[%c29] : memref<162xf32, #tpu.memory_space<smem>>
    %172 = vector.broadcast %171 : f32 to vector<14x256xf32>
    %173 = arith.mulf %172, %166 : vector<14x256xf32>
    %174 = arith.addf %148, %173 : vector<14x256xf32>
    %c56 = arith.constant 56 : index
    %175 = memref.load %arg1[%c56] : memref<162xf32, #tpu.memory_space<smem>>
    %176 = vector.broadcast %175 : f32 to vector<14x256xf32>
    %177 = arith.mulf %176, %166 : vector<14x256xf32>
    %178 = arith.addf %152, %177 : vector<14x256xf32>
    %c83 = arith.constant 83 : index
    %179 = memref.load %arg1[%c83] : memref<162xf32, #tpu.memory_space<smem>>
    %180 = vector.broadcast %179 : f32 to vector<14x256xf32>
    %181 = arith.mulf %180, %166 : vector<14x256xf32>
    %182 = arith.addf %156, %181 : vector<14x256xf32>
    %c110 = arith.constant 110 : index
    %183 = memref.load %arg1[%c110] : memref<162xf32, #tpu.memory_space<smem>>
    %184 = vector.broadcast %183 : f32 to vector<14x256xf32>
    %185 = arith.mulf %184, %166 : vector<14x256xf32>
    %186 = arith.addf %160, %185 : vector<14x256xf32>
    %c137 = arith.constant 137 : index
    %187 = memref.load %arg1[%c137] : memref<162xf32, #tpu.memory_space<smem>>
    %188 = vector.broadcast %187 : f32 to vector<14x256xf32>
    %189 = arith.mulf %188, %166 : vector<14x256xf32>
    %190 = arith.addf %164, %189 : vector<14x256xf32>
    %191 = vector.extract_strided_slice %165 {offsets = [1, 0], sizes = [14, 256], strides = [1, 1]} : vector<16x256xf32> to vector<14x256xf32>
    %c5_9 = arith.constant 5 : index
    %192 = memref.load %arg1[%c5_9] : memref<162xf32, #tpu.memory_space<smem>>
    %193 = vector.broadcast %192 : f32 to vector<14x256xf32>
    %194 = arith.mulf %193, %191 : vector<14x256xf32>
    %195 = arith.addf %170, %194 : vector<14x256xf32>
    %c32 = arith.constant 32 : index
    %196 = memref.load %arg1[%c32] : memref<162xf32, #tpu.memory_space<smem>>
    %197 = vector.broadcast %196 : f32 to vector<14x256xf32>
    %198 = arith.mulf %197, %191 : vector<14x256xf32>
    %199 = arith.addf %174, %198 : vector<14x256xf32>
    %c59 = arith.constant 59 : index
    %200 = memref.load %arg1[%c59] : memref<162xf32, #tpu.memory_space<smem>>
    %201 = vector.broadcast %200 : f32 to vector<14x256xf32>
    %202 = arith.mulf %201, %191 : vector<14x256xf32>
    %203 = arith.addf %178, %202 : vector<14x256xf32>
    %c86 = arith.constant 86 : index
    %204 = memref.load %arg1[%c86] : memref<162xf32, #tpu.memory_space<smem>>
    %205 = vector.broadcast %204 : f32 to vector<14x256xf32>
    %206 = arith.mulf %205, %191 : vector<14x256xf32>
    %207 = arith.addf %182, %206 : vector<14x256xf32>
    %c113 = arith.constant 113 : index
    %208 = memref.load %arg1[%c113] : memref<162xf32, #tpu.memory_space<smem>>
    %209 = vector.broadcast %208 : f32 to vector<14x256xf32>
    %210 = arith.mulf %209, %191 : vector<14x256xf32>
    %211 = arith.addf %186, %210 : vector<14x256xf32>
    %c140 = arith.constant 140 : index
    %212 = memref.load %arg1[%c140] : memref<162xf32, #tpu.memory_space<smem>>
    %213 = vector.broadcast %212 : f32 to vector<14x256xf32>
    %214 = arith.mulf %213, %191 : vector<14x256xf32>
    %215 = arith.addf %190, %214 : vector<14x256xf32>
    %216 = vector.extract_strided_slice %165 {offsets = [2, 0], sizes = [14, 256], strides = [1, 1]} : vector<16x256xf32> to vector<14x256xf32>
    %c8 = arith.constant 8 : index
    %217 = memref.load %arg1[%c8] : memref<162xf32, #tpu.memory_space<smem>>
    %218 = vector.broadcast %217 : f32 to vector<14x256xf32>
    %219 = arith.mulf %218, %216 : vector<14x256xf32>
    %220 = arith.addf %195, %219 : vector<14x256xf32>
    %c35 = arith.constant 35 : index
    %221 = memref.load %arg1[%c35] : memref<162xf32, #tpu.memory_space<smem>>
    %222 = vector.broadcast %221 : f32 to vector<14x256xf32>
    %223 = arith.mulf %222, %216 : vector<14x256xf32>
    %224 = arith.addf %199, %223 : vector<14x256xf32>
    %c62 = arith.constant 62 : index
    %225 = memref.load %arg1[%c62] : memref<162xf32, #tpu.memory_space<smem>>
    %226 = vector.broadcast %225 : f32 to vector<14x256xf32>
    %227 = arith.mulf %226, %216 : vector<14x256xf32>
    %228 = arith.addf %203, %227 : vector<14x256xf32>
    %c89 = arith.constant 89 : index
    %229 = memref.load %arg1[%c89] : memref<162xf32, #tpu.memory_space<smem>>
    %230 = vector.broadcast %229 : f32 to vector<14x256xf32>
    %231 = arith.mulf %230, %216 : vector<14x256xf32>
    %232 = arith.addf %207, %231 : vector<14x256xf32>
    %c116 = arith.constant 116 : index
    %233 = memref.load %arg1[%c116] : memref<162xf32, #tpu.memory_space<smem>>
    %234 = vector.broadcast %233 : f32 to vector<14x256xf32>
    %235 = arith.mulf %234, %216 : vector<14x256xf32>
    %236 = arith.addf %211, %235 : vector<14x256xf32>
    %c143 = arith.constant 143 : index
    %237 = memref.load %arg1[%c143] : memref<162xf32, #tpu.memory_space<smem>>
    %238 = vector.broadcast %237 : f32 to vector<14x256xf32>
    %239 = arith.mulf %238, %216 : vector<14x256xf32>
    %240 = arith.addf %215, %239 : vector<14x256xf32>
    %c0_10 = arith.constant 0 : index
    %c1_11 = arith.constant 1 : index
    %c0_12 = arith.constant 0 : index
    %c0_13 = arith.constant 0 : index
    %241 = vector.load %arg3[%c0_10, %c1_11, %c0_12, %c0_13] : memref<1x3x16x256xf32, #tpu.memory_space<vmem>>, vector<1x1x16x256xf32>
    %242 = vector.shape_cast %241 : vector<1x1x16x256xf32> to vector<16x256xf32>
    %243 = vector.extract_strided_slice %242 {offsets = [0, 0], sizes = [14, 256], strides = [1, 1]} : vector<16x256xf32> to vector<14x256xf32>
    %c9 = arith.constant 9 : index
    %244 = memref.load %arg1[%c9] : memref<162xf32, #tpu.memory_space<smem>>
    %245 = vector.broadcast %244 : f32 to vector<14x256xf32>
    %246 = arith.mulf %245, %243 : vector<14x256xf32>
    %247 = arith.addf %220, %246 : vector<14x256xf32>
    %c36 = arith.constant 36 : index
    %248 = memref.load %arg1[%c36] : memref<162xf32, #tpu.memory_space<smem>>
    %249 = vector.broadcast %248 : f32 to vector<14x256xf32>
    %250 = arith.mulf %249, %243 : vector<14x256xf32>
    %251 = arith.addf %224, %250 : vector<14x256xf32>
    %c63 = arith.constant 63 : index
    %252 = memref.load %arg1[%c63] : memref<162xf32, #tpu.memory_space<smem>>
    %253 = vector.broadcast %252 : f32 to vector<14x256xf32>
    %254 = arith.mulf %253, %243 : vector<14x256xf32>
    %255 = arith.addf %228, %254 : vector<14x256xf32>
    %c90 = arith.constant 90 : index
    %256 = memref.load %arg1[%c90] : memref<162xf32, #tpu.memory_space<smem>>
    %257 = vector.broadcast %256 : f32 to vector<14x256xf32>
    %258 = arith.mulf %257, %243 : vector<14x256xf32>
    %259 = arith.addf %232, %258 : vector<14x256xf32>
    %c117 = arith.constant 117 : index
    %260 = memref.load %arg1[%c117] : memref<162xf32, #tpu.memory_space<smem>>
    %261 = vector.broadcast %260 : f32 to vector<14x256xf32>
    %262 = arith.mulf %261, %243 : vector<14x256xf32>
    %263 = arith.addf %236, %262 : vector<14x256xf32>
    %c144 = arith.constant 144 : index
    %264 = memref.load %arg1[%c144] : memref<162xf32, #tpu.memory_space<smem>>
    %265 = vector.broadcast %264 : f32 to vector<14x256xf32>
    %266 = arith.mulf %265, %243 : vector<14x256xf32>
    %267 = arith.addf %240, %266 : vector<14x256xf32>
    %268 = vector.extract_strided_slice %242 {offsets = [1, 0], sizes = [14, 256], strides = [1, 1]} : vector<16x256xf32> to vector<14x256xf32>
    %c12 = arith.constant 12 : index
    %269 = memref.load %arg1[%c12] : memref<162xf32, #tpu.memory_space<smem>>
    %270 = vector.broadcast %269 : f32 to vector<14x256xf32>
    %271 = arith.mulf %270, %268 : vector<14x256xf32>
    %272 = arith.addf %247, %271 : vector<14x256xf32>
    %c39 = arith.constant 39 : index
    %273 = memref.load %arg1[%c39] : memref<162xf32, #tpu.memory_space<smem>>
    %274 = vector.broadcast %273 : f32 to vector<14x256xf32>
    %275 = arith.mulf %274, %268 : vector<14x256xf32>
    %276 = arith.addf %251, %275 : vector<14x256xf32>
    %c66 = arith.constant 66 : index
    %277 = memref.load %arg1[%c66] : memref<162xf32, #tpu.memory_space<smem>>
    %278 = vector.broadcast %277 : f32 to vector<14x256xf32>
    %279 = arith.mulf %278, %268 : vector<14x256xf32>
    %280 = arith.addf %255, %279 : vector<14x256xf32>
    %c93 = arith.constant 93 : index
    %281 = memref.load %arg1[%c93] : memref<162xf32, #tpu.memory_space<smem>>
    %282 = vector.broadcast %281 : f32 to vector<14x256xf32>
    %283 = arith.mulf %282, %268 : vector<14x256xf32>
    %284 = arith.addf %259, %283 : vector<14x256xf32>
    %c120 = arith.constant 120 : index
    %285 = memref.load %arg1[%c120] : memref<162xf32, #tpu.memory_space<smem>>
    %286 = vector.broadcast %285 : f32 to vector<14x256xf32>
    %287 = arith.mulf %286, %268 : vector<14x256xf32>
    %288 = arith.addf %263, %287 : vector<14x256xf32>
    %c147 = arith.constant 147 : index
    %289 = memref.load %arg1[%c147] : memref<162xf32, #tpu.memory_space<smem>>
    %290 = vector.broadcast %289 : f32 to vector<14x256xf32>
    %291 = arith.mulf %290, %268 : vector<14x256xf32>
    %292 = arith.addf %267, %291 : vector<14x256xf32>
    %293 = vector.extract_strided_slice %242 {offsets = [2, 0], sizes = [14, 256], strides = [1, 1]} : vector<16x256xf32> to vector<14x256xf32>
    %c15 = arith.constant 15 : index
    %294 = memref.load %arg1[%c15] : memref<162xf32, #tpu.memory_space<smem>>
    %295 = vector.broadcast %294 : f32 to vector<14x256xf32>
    %296 = arith.mulf %295, %293 : vector<14x256xf32>
    %297 = arith.addf %272, %296 : vector<14x256xf32>
    %c42 = arith.constant 42 : index
    %298 = memref.load %arg1[%c42] : memref<162xf32, #tpu.memory_space<smem>>
    %299 = vector.broadcast %298 : f32 to vector<14x256xf32>
    %300 = arith.mulf %299, %293 : vector<14x256xf32>
    %301 = arith.addf %276, %300 : vector<14x256xf32>
    %c69 = arith.constant 69 : index
    %302 = memref.load %arg1[%c69] : memref<162xf32, #tpu.memory_space<smem>>
    %303 = vector.broadcast %302 : f32 to vector<14x256xf32>
    %304 = arith.mulf %303, %293 : vector<14x256xf32>
    %305 = arith.addf %280, %304 : vector<14x256xf32>
    %c96 = arith.constant 96 : index
    %306 = memref.load %arg1[%c96] : memref<162xf32, #tpu.memory_space<smem>>
    %307 = vector.broadcast %306 : f32 to vector<14x256xf32>
    %308 = arith.mulf %307, %293 : vector<14x256xf32>
    %309 = arith.addf %284, %308 : vector<14x256xf32>
    %c123 = arith.constant 123 : index
    %310 = memref.load %arg1[%c123] : memref<162xf32, #tpu.memory_space<smem>>
    %311 = vector.broadcast %310 : f32 to vector<14x256xf32>
    %312 = arith.mulf %311, %293 : vector<14x256xf32>
    %313 = arith.addf %288, %312 : vector<14x256xf32>
    %c150 = arith.constant 150 : index
    %314 = memref.load %arg1[%c150] : memref<162xf32, #tpu.memory_space<smem>>
    %315 = vector.broadcast %314 : f32 to vector<14x256xf32>
    %316 = arith.mulf %315, %293 : vector<14x256xf32>
    %317 = arith.addf %292, %316 : vector<14x256xf32>
    %c255_i32_14 = arith.constant 255 : i32
    %318 = tpu.dynamic_rotate %242 by %c255_i32_14 dim 1 : vector<16x256xf32>, i32 -> vector<16x256xf32>
    %319 = vector.extract_strided_slice %318 {offsets = [0, 0], sizes = [14, 256], strides = [1, 1]} : vector<16x256xf32> to vector<14x256xf32>
    %c10 = arith.constant 10 : index
    %320 = memref.load %arg1[%c10] : memref<162xf32, #tpu.memory_space<smem>>
    %321 = vector.broadcast %320 : f32 to vector<14x256xf32>
    %322 = arith.mulf %321, %319 : vector<14x256xf32>
    %323 = arith.addf %297, %322 : vector<14x256xf32>
    %c37 = arith.constant 37 : index
    %324 = memref.load %arg1[%c37] : memref<162xf32, #tpu.memory_space<smem>>
    %325 = vector.broadcast %324 : f32 to vector<14x256xf32>
    %326 = arith.mulf %325, %319 : vector<14x256xf32>
    %327 = arith.addf %301, %326 : vector<14x256xf32>
    %c64 = arith.constant 64 : index
    %328 = memref.load %arg1[%c64] : memref<162xf32, #tpu.memory_space<smem>>
    %329 = vector.broadcast %328 : f32 to vector<14x256xf32>
    %330 = arith.mulf %329, %319 : vector<14x256xf32>
    %331 = arith.addf %305, %330 : vector<14x256xf32>
    %c91 = arith.constant 91 : index
    %332 = memref.load %arg1[%c91] : memref<162xf32, #tpu.memory_space<smem>>
    %333 = vector.broadcast %332 : f32 to vector<14x256xf32>
    %334 = arith.mulf %333, %319 : vector<14x256xf32>
    %335 = arith.addf %309, %334 : vector<14x256xf32>
    %c118 = arith.constant 118 : index
    %336 = memref.load %arg1[%c118] : memref<162xf32, #tpu.memory_space<smem>>
    %337 = vector.broadcast %336 : f32 to vector<14x256xf32>
    %338 = arith.mulf %337, %319 : vector<14x256xf32>
    %339 = arith.addf %313, %338 : vector<14x256xf32>
    %c145 = arith.constant 145 : index
    %340 = memref.load %arg1[%c145] : memref<162xf32, #tpu.memory_space<smem>>
    %341 = vector.broadcast %340 : f32 to vector<14x256xf32>
    %342 = arith.mulf %341, %319 : vector<14x256xf32>
    %343 = arith.addf %317, %342 : vector<14x256xf32>
    %344 = vector.extract_strided_slice %318 {offsets = [1, 0], sizes = [14, 256], strides = [1, 1]} : vector<16x256xf32> to vector<14x256xf32>
    %c13 = arith.constant 13 : index
    %345 = memref.load %arg1[%c13] : memref<162xf32, #tpu.memory_space<smem>>
    %346 = vector.broadcast %345 : f32 to vector<14x256xf32>
    %347 = arith.mulf %346, %344 : vector<14x256xf32>
    %348 = arith.addf %323, %347 : vector<14x256xf32>
    %c40 = arith.constant 40 : index
    %349 = memref.load %arg1[%c40] : memref<162xf32, #tpu.memory_space<smem>>
    %350 = vector.broadcast %349 : f32 to vector<14x256xf32>
    %351 = arith.mulf %350, %344 : vector<14x256xf32>
    %352 = arith.addf %327, %351 : vector<14x256xf32>
    %c67 = arith.constant 67 : index
    %353 = memref.load %arg1[%c67] : memref<162xf32, #tpu.memory_space<smem>>
    %354 = vector.broadcast %353 : f32 to vector<14x256xf32>
    %355 = arith.mulf %354, %344 : vector<14x256xf32>
    %356 = arith.addf %331, %355 : vector<14x256xf32>
    %c94 = arith.constant 94 : index
    %357 = memref.load %arg1[%c94] : memref<162xf32, #tpu.memory_space<smem>>
    %358 = vector.broadcast %357 : f32 to vector<14x256xf32>
    %359 = arith.mulf %358, %344 : vector<14x256xf32>
    %360 = arith.addf %335, %359 : vector<14x256xf32>
    %c121 = arith.constant 121 : index
    %361 = memref.load %arg1[%c121] : memref<162xf32, #tpu.memory_space<smem>>
    %362 = vector.broadcast %361 : f32 to vector<14x256xf32>
    %363 = arith.mulf %362, %344 : vector<14x256xf32>
    %364 = arith.addf %339, %363 : vector<14x256xf32>
    %c148 = arith.constant 148 : index
    %365 = memref.load %arg1[%c148] : memref<162xf32, #tpu.memory_space<smem>>
    %366 = vector.broadcast %365 : f32 to vector<14x256xf32>
    %367 = arith.mulf %366, %344 : vector<14x256xf32>
    %368 = arith.addf %343, %367 : vector<14x256xf32>
    %369 = vector.extract_strided_slice %318 {offsets = [2, 0], sizes = [14, 256], strides = [1, 1]} : vector<16x256xf32> to vector<14x256xf32>
    %c16 = arith.constant 16 : index
    %370 = memref.load %arg1[%c16] : memref<162xf32, #tpu.memory_space<smem>>
    %371 = vector.broadcast %370 : f32 to vector<14x256xf32>
    %372 = arith.mulf %371, %369 : vector<14x256xf32>
    %373 = arith.addf %348, %372 : vector<14x256xf32>
    %c43 = arith.constant 43 : index
    %374 = memref.load %arg1[%c43] : memref<162xf32, #tpu.memory_space<smem>>
    %375 = vector.broadcast %374 : f32 to vector<14x256xf32>
    %376 = arith.mulf %375, %369 : vector<14x256xf32>
    %377 = arith.addf %352, %376 : vector<14x256xf32>
    %c70 = arith.constant 70 : index
    %378 = memref.load %arg1[%c70] : memref<162xf32, #tpu.memory_space<smem>>
    %379 = vector.broadcast %378 : f32 to vector<14x256xf32>
    %380 = arith.mulf %379, %369 : vector<14x256xf32>
    %381 = arith.addf %356, %380 : vector<14x256xf32>
    %c97 = arith.constant 97 : index
    %382 = memref.load %arg1[%c97] : memref<162xf32, #tpu.memory_space<smem>>
    %383 = vector.broadcast %382 : f32 to vector<14x256xf32>
    %384 = arith.mulf %383, %369 : vector<14x256xf32>
    %385 = arith.addf %360, %384 : vector<14x256xf32>
    %c124 = arith.constant 124 : index
    %386 = memref.load %arg1[%c124] : memref<162xf32, #tpu.memory_space<smem>>
    %387 = vector.broadcast %386 : f32 to vector<14x256xf32>
    %388 = arith.mulf %387, %369 : vector<14x256xf32>
    %389 = arith.addf %364, %388 : vector<14x256xf32>
    %c151 = arith.constant 151 : index
    %390 = memref.load %arg1[%c151] : memref<162xf32, #tpu.memory_space<smem>>
    %391 = vector.broadcast %390 : f32 to vector<14x256xf32>
    %392 = arith.mulf %391, %369 : vector<14x256xf32>
    %393 = arith.addf %368, %392 : vector<14x256xf32>
    %c254_i32_15 = arith.constant 254 : i32
    %394 = tpu.dynamic_rotate %242 by %c254_i32_15 dim 1 : vector<16x256xf32>, i32 -> vector<16x256xf32>
    %395 = vector.extract_strided_slice %394 {offsets = [0, 0], sizes = [14, 256], strides = [1, 1]} : vector<16x256xf32> to vector<14x256xf32>
    %c11 = arith.constant 11 : index
    %396 = memref.load %arg1[%c11] : memref<162xf32, #tpu.memory_space<smem>>
    %397 = vector.broadcast %396 : f32 to vector<14x256xf32>
    %398 = arith.mulf %397, %395 : vector<14x256xf32>
    %399 = arith.addf %373, %398 : vector<14x256xf32>
    %c38 = arith.constant 38 : index
    %400 = memref.load %arg1[%c38] : memref<162xf32, #tpu.memory_space<smem>>
    %401 = vector.broadcast %400 : f32 to vector<14x256xf32>
    %402 = arith.mulf %401, %395 : vector<14x256xf32>
    %403 = arith.addf %377, %402 : vector<14x256xf32>
    %c65 = arith.constant 65 : index
    %404 = memref.load %arg1[%c65] : memref<162xf32, #tpu.memory_space<smem>>
    %405 = vector.broadcast %404 : f32 to vector<14x256xf32>
    %406 = arith.mulf %405, %395 : vector<14x256xf32>
    %407 = arith.addf %381, %406 : vector<14x256xf32>
    %c92 = arith.constant 92 : index
    %408 = memref.load %arg1[%c92] : memref<162xf32, #tpu.memory_space<smem>>
    %409 = vector.broadcast %408 : f32 to vector<14x256xf32>
    %410 = arith.mulf %409, %395 : vector<14x256xf32>
    %411 = arith.addf %385, %410 : vector<14x256xf32>
    %c119 = arith.constant 119 : index
    %412 = memref.load %arg1[%c119] : memref<162xf32, #tpu.memory_space<smem>>
    %413 = vector.broadcast %412 : f32 to vector<14x256xf32>
    %414 = arith.mulf %413, %395 : vector<14x256xf32>
    %415 = arith.addf %389, %414 : vector<14x256xf32>
    %c146 = arith.constant 146 : index
    %416 = memref.load %arg1[%c146] : memref<162xf32, #tpu.memory_space<smem>>
    %417 = vector.broadcast %416 : f32 to vector<14x256xf32>
    %418 = arith.mulf %417, %395 : vector<14x256xf32>
    %419 = arith.addf %393, %418 : vector<14x256xf32>
    %420 = vector.extract_strided_slice %394 {offsets = [1, 0], sizes = [14, 256], strides = [1, 1]} : vector<16x256xf32> to vector<14x256xf32>
    %c14 = arith.constant 14 : index
    %421 = memref.load %arg1[%c14] : memref<162xf32, #tpu.memory_space<smem>>
    %422 = vector.broadcast %421 : f32 to vector<14x256xf32>
    %423 = arith.mulf %422, %420 : vector<14x256xf32>
    %424 = arith.addf %399, %423 : vector<14x256xf32>
    %c41 = arith.constant 41 : index
    %425 = memref.load %arg1[%c41] : memref<162xf32, #tpu.memory_space<smem>>
    %426 = vector.broadcast %425 : f32 to vector<14x256xf32>
    %427 = arith.mulf %426, %420 : vector<14x256xf32>
    %428 = arith.addf %403, %427 : vector<14x256xf32>
    %c68 = arith.constant 68 : index
    %429 = memref.load %arg1[%c68] : memref<162xf32, #tpu.memory_space<smem>>
    %430 = vector.broadcast %429 : f32 to vector<14x256xf32>
    %431 = arith.mulf %430, %420 : vector<14x256xf32>
    %432 = arith.addf %407, %431 : vector<14x256xf32>
    %c95 = arith.constant 95 : index
    %433 = memref.load %arg1[%c95] : memref<162xf32, #tpu.memory_space<smem>>
    %434 = vector.broadcast %433 : f32 to vector<14x256xf32>
    %435 = arith.mulf %434, %420 : vector<14x256xf32>
    %436 = arith.addf %411, %435 : vector<14x256xf32>
    %c122 = arith.constant 122 : index
    %437 = memref.load %arg1[%c122] : memref<162xf32, #tpu.memory_space<smem>>
    %438 = vector.broadcast %437 : f32 to vector<14x256xf32>
    %439 = arith.mulf %438, %420 : vector<14x256xf32>
    %440 = arith.addf %415, %439 : vector<14x256xf32>
    %c149 = arith.constant 149 : index
    %441 = memref.load %arg1[%c149] : memref<162xf32, #tpu.memory_space<smem>>
    %442 = vector.broadcast %441 : f32 to vector<14x256xf32>
    %443 = arith.mulf %442, %420 : vector<14x256xf32>
    %444 = arith.addf %419, %443 : vector<14x256xf32>
    %445 = vector.extract_strided_slice %394 {offsets = [2, 0], sizes = [14, 256], strides = [1, 1]} : vector<16x256xf32> to vector<14x256xf32>
    %c17 = arith.constant 17 : index
    %446 = memref.load %arg1[%c17] : memref<162xf32, #tpu.memory_space<smem>>
    %447 = vector.broadcast %446 : f32 to vector<14x256xf32>
    %448 = arith.mulf %447, %445 : vector<14x256xf32>
    %449 = arith.addf %424, %448 : vector<14x256xf32>
    %c44 = arith.constant 44 : index
    %450 = memref.load %arg1[%c44] : memref<162xf32, #tpu.memory_space<smem>>
    %451 = vector.broadcast %450 : f32 to vector<14x256xf32>
    %452 = arith.mulf %451, %445 : vector<14x256xf32>
    %453 = arith.addf %428, %452 : vector<14x256xf32>
    %c71 = arith.constant 71 : index
    %454 = memref.load %arg1[%c71] : memref<162xf32, #tpu.memory_space<smem>>
    %455 = vector.broadcast %454 : f32 to vector<14x256xf32>
    %456 = arith.mulf %455, %445 : vector<14x256xf32>
    %457 = arith.addf %432, %456 : vector<14x256xf32>
    %c98 = arith.constant 98 : index
    %458 = memref.load %arg1[%c98] : memref<162xf32, #tpu.memory_space<smem>>
    %459 = vector.broadcast %458 : f32 to vector<14x256xf32>
    %460 = arith.mulf %459, %445 : vector<14x256xf32>
    %461 = arith.addf %436, %460 : vector<14x256xf32>
    %c125 = arith.constant 125 : index
    %462 = memref.load %arg1[%c125] : memref<162xf32, #tpu.memory_space<smem>>
    %463 = vector.broadcast %462 : f32 to vector<14x256xf32>
    %464 = arith.mulf %463, %445 : vector<14x256xf32>
    %465 = arith.addf %440, %464 : vector<14x256xf32>
    %c152 = arith.constant 152 : index
    %466 = memref.load %arg1[%c152] : memref<162xf32, #tpu.memory_space<smem>>
    %467 = vector.broadcast %466 : f32 to vector<14x256xf32>
    %468 = arith.mulf %467, %445 : vector<14x256xf32>
    %469 = arith.addf %444, %468 : vector<14x256xf32>
    %c0_16 = arith.constant 0 : index
    %c2_17 = arith.constant 2 : index
    %c0_18 = arith.constant 0 : index
    %c0_19 = arith.constant 0 : index
    %470 = vector.load %arg3[%c0_16, %c2_17, %c0_18, %c0_19] : memref<1x3x16x256xf32, #tpu.memory_space<vmem>>, vector<1x1x16x256xf32>
    %471 = vector.shape_cast %470 : vector<1x1x16x256xf32> to vector<16x256xf32>
    %472 = vector.extract_strided_slice %471 {offsets = [0, 0], sizes = [14, 256], strides = [1, 1]} : vector<16x256xf32> to vector<14x256xf32>
    %c18 = arith.constant 18 : index
    %473 = memref.load %arg1[%c18] : memref<162xf32, #tpu.memory_space<smem>>
    %474 = vector.broadcast %473 : f32 to vector<14x256xf32>
    %475 = arith.mulf %474, %472 : vector<14x256xf32>
    %476 = arith.addf %449, %475 : vector<14x256xf32>
    %c45 = arith.constant 45 : index
    %477 = memref.load %arg1[%c45] : memref<162xf32, #tpu.memory_space<smem>>
    %478 = vector.broadcast %477 : f32 to vector<14x256xf32>
    %479 = arith.mulf %478, %472 : vector<14x256xf32>
    %480 = arith.addf %453, %479 : vector<14x256xf32>
    %c72 = arith.constant 72 : index
    %481 = memref.load %arg1[%c72] : memref<162xf32, #tpu.memory_space<smem>>
    %482 = vector.broadcast %481 : f32 to vector<14x256xf32>
    %483 = arith.mulf %482, %472 : vector<14x256xf32>
    %484 = arith.addf %457, %483 : vector<14x256xf32>
    %c99 = arith.constant 99 : index
    %485 = memref.load %arg1[%c99] : memref<162xf32, #tpu.memory_space<smem>>
    %486 = vector.broadcast %485 : f32 to vector<14x256xf32>
    %487 = arith.mulf %486, %472 : vector<14x256xf32>
    %488 = arith.addf %461, %487 : vector<14x256xf32>
    %c126 = arith.constant 126 : index
    %489 = memref.load %arg1[%c126] : memref<162xf32, #tpu.memory_space<smem>>
    %490 = vector.broadcast %489 : f32 to vector<14x256xf32>
    %491 = arith.mulf %490, %472 : vector<14x256xf32>
    %492 = arith.addf %465, %491 : vector<14x256xf32>
    %c153 = arith.constant 153 : index
    %493 = memref.load %arg1[%c153] : memref<162xf32, #tpu.memory_space<smem>>
    %494 = vector.broadcast %493 : f32 to vector<14x256xf32>
    %495 = arith.mulf %494, %472 : vector<14x256xf32>
    %496 = arith.addf %469, %495 : vector<14x256xf32>
    %497 = vector.extract_strided_slice %471 {offsets = [1, 0], sizes = [14, 256], strides = [1, 1]} : vector<16x256xf32> to vector<14x256xf32>
    %c21 = arith.constant 21 : index
    %498 = memref.load %arg1[%c21] : memref<162xf32, #tpu.memory_space<smem>>
    %499 = vector.broadcast %498 : f32 to vector<14x256xf32>
    %500 = arith.mulf %499, %497 : vector<14x256xf32>
    %501 = arith.addf %476, %500 : vector<14x256xf32>
    %c48 = arith.constant 48 : index
    %502 = memref.load %arg1[%c48] : memref<162xf32, #tpu.memory_space<smem>>
    %503 = vector.broadcast %502 : f32 to vector<14x256xf32>
    %504 = arith.mulf %503, %497 : vector<14x256xf32>
    %505 = arith.addf %480, %504 : vector<14x256xf32>
    %c75 = arith.constant 75 : index
    %506 = memref.load %arg1[%c75] : memref<162xf32, #tpu.memory_space<smem>>
    %507 = vector.broadcast %506 : f32 to vector<14x256xf32>
    %508 = arith.mulf %507, %497 : vector<14x256xf32>
    %509 = arith.addf %484, %508 : vector<14x256xf32>
    %c102 = arith.constant 102 : index
    %510 = memref.load %arg1[%c102] : memref<162xf32, #tpu.memory_space<smem>>
    %511 = vector.broadcast %510 : f32 to vector<14x256xf32>
    %512 = arith.mulf %511, %497 : vector<14x256xf32>
    %513 = arith.addf %488, %512 : vector<14x256xf32>
    %c129 = arith.constant 129 : index
    %514 = memref.load %arg1[%c129] : memref<162xf32, #tpu.memory_space<smem>>
    %515 = vector.broadcast %514 : f32 to vector<14x256xf32>
    %516 = arith.mulf %515, %497 : vector<14x256xf32>
    %517 = arith.addf %492, %516 : vector<14x256xf32>
    %c156 = arith.constant 156 : index
    %518 = memref.load %arg1[%c156] : memref<162xf32, #tpu.memory_space<smem>>
    %519 = vector.broadcast %518 : f32 to vector<14x256xf32>
    %520 = arith.mulf %519, %497 : vector<14x256xf32>
    %521 = arith.addf %496, %520 : vector<14x256xf32>
    %522 = vector.extract_strided_slice %471 {offsets = [2, 0], sizes = [14, 256], strides = [1, 1]} : vector<16x256xf32> to vector<14x256xf32>
    %c24 = arith.constant 24 : index
    %523 = memref.load %arg1[%c24] : memref<162xf32, #tpu.memory_space<smem>>
    %524 = vector.broadcast %523 : f32 to vector<14x256xf32>
    %525 = arith.mulf %524, %522 : vector<14x256xf32>
    %526 = arith.addf %501, %525 : vector<14x256xf32>
    %c51 = arith.constant 51 : index
    %527 = memref.load %arg1[%c51] : memref<162xf32, #tpu.memory_space<smem>>
    %528 = vector.broadcast %527 : f32 to vector<14x256xf32>
    %529 = arith.mulf %528, %522 : vector<14x256xf32>
    %530 = arith.addf %505, %529 : vector<14x256xf32>
    %c78 = arith.constant 78 : index
    %531 = memref.load %arg1[%c78] : memref<162xf32, #tpu.memory_space<smem>>
    %532 = vector.broadcast %531 : f32 to vector<14x256xf32>
    %533 = arith.mulf %532, %522 : vector<14x256xf32>
    %534 = arith.addf %509, %533 : vector<14x256xf32>
    %c105 = arith.constant 105 : index
    %535 = memref.load %arg1[%c105] : memref<162xf32, #tpu.memory_space<smem>>
    %536 = vector.broadcast %535 : f32 to vector<14x256xf32>
    %537 = arith.mulf %536, %522 : vector<14x256xf32>
    %538 = arith.addf %513, %537 : vector<14x256xf32>
    %c132 = arith.constant 132 : index
    %539 = memref.load %arg1[%c132] : memref<162xf32, #tpu.memory_space<smem>>
    %540 = vector.broadcast %539 : f32 to vector<14x256xf32>
    %541 = arith.mulf %540, %522 : vector<14x256xf32>
    %542 = arith.addf %517, %541 : vector<14x256xf32>
    %c159 = arith.constant 159 : index
    %543 = memref.load %arg1[%c159] : memref<162xf32, #tpu.memory_space<smem>>
    %544 = vector.broadcast %543 : f32 to vector<14x256xf32>
    %545 = arith.mulf %544, %522 : vector<14x256xf32>
    %546 = arith.addf %521, %545 : vector<14x256xf32>
    %c255_i32_20 = arith.constant 255 : i32
    %547 = tpu.dynamic_rotate %471 by %c255_i32_20 dim 1 : vector<16x256xf32>, i32 -> vector<16x256xf32>
    %548 = vector.extract_strided_slice %547 {offsets = [0, 0], sizes = [14, 256], strides = [1, 1]} : vector<16x256xf32> to vector<14x256xf32>
    %c19 = arith.constant 19 : index
    %549 = memref.load %arg1[%c19] : memref<162xf32, #tpu.memory_space<smem>>
    %550 = vector.broadcast %549 : f32 to vector<14x256xf32>
    %551 = arith.mulf %550, %548 : vector<14x256xf32>
    %552 = arith.addf %526, %551 : vector<14x256xf32>
    %c46 = arith.constant 46 : index
    %553 = memref.load %arg1[%c46] : memref<162xf32, #tpu.memory_space<smem>>
    %554 = vector.broadcast %553 : f32 to vector<14x256xf32>
    %555 = arith.mulf %554, %548 : vector<14x256xf32>
    %556 = arith.addf %530, %555 : vector<14x256xf32>
    %c73 = arith.constant 73 : index
    %557 = memref.load %arg1[%c73] : memref<162xf32, #tpu.memory_space<smem>>
    %558 = vector.broadcast %557 : f32 to vector<14x256xf32>
    %559 = arith.mulf %558, %548 : vector<14x256xf32>
    %560 = arith.addf %534, %559 : vector<14x256xf32>
    %c100 = arith.constant 100 : index
    %561 = memref.load %arg1[%c100] : memref<162xf32, #tpu.memory_space<smem>>
    %562 = vector.broadcast %561 : f32 to vector<14x256xf32>
    %563 = arith.mulf %562, %548 : vector<14x256xf32>
    %564 = arith.addf %538, %563 : vector<14x256xf32>
    %c127 = arith.constant 127 : index
    %565 = memref.load %arg1[%c127] : memref<162xf32, #tpu.memory_space<smem>>
    %566 = vector.broadcast %565 : f32 to vector<14x256xf32>
    %567 = arith.mulf %566, %548 : vector<14x256xf32>
    %568 = arith.addf %542, %567 : vector<14x256xf32>
    %c154 = arith.constant 154 : index
    %569 = memref.load %arg1[%c154] : memref<162xf32, #tpu.memory_space<smem>>
    %570 = vector.broadcast %569 : f32 to vector<14x256xf32>
    %571 = arith.mulf %570, %548 : vector<14x256xf32>
    %572 = arith.addf %546, %571 : vector<14x256xf32>
    %573 = vector.extract_strided_slice %547 {offsets = [1, 0], sizes = [14, 256], strides = [1, 1]} : vector<16x256xf32> to vector<14x256xf32>
    %c22 = arith.constant 22 : index
    %574 = memref.load %arg1[%c22] : memref<162xf32, #tpu.memory_space<smem>>
    %575 = vector.broadcast %574 : f32 to vector<14x256xf32>
    %576 = arith.mulf %575, %573 : vector<14x256xf32>
    %577 = arith.addf %552, %576 : vector<14x256xf32>
    %c49 = arith.constant 49 : index
    %578 = memref.load %arg1[%c49] : memref<162xf32, #tpu.memory_space<smem>>
    %579 = vector.broadcast %578 : f32 to vector<14x256xf32>
    %580 = arith.mulf %579, %573 : vector<14x256xf32>
    %581 = arith.addf %556, %580 : vector<14x256xf32>
    %c76 = arith.constant 76 : index
    %582 = memref.load %arg1[%c76] : memref<162xf32, #tpu.memory_space<smem>>
    %583 = vector.broadcast %582 : f32 to vector<14x256xf32>
    %584 = arith.mulf %583, %573 : vector<14x256xf32>
    %585 = arith.addf %560, %584 : vector<14x256xf32>
    %c103 = arith.constant 103 : index
    %586 = memref.load %arg1[%c103] : memref<162xf32, #tpu.memory_space<smem>>
    %587 = vector.broadcast %586 : f32 to vector<14x256xf32>
    %588 = arith.mulf %587, %573 : vector<14x256xf32>
    %589 = arith.addf %564, %588 : vector<14x256xf32>
    %c130 = arith.constant 130 : index
    %590 = memref.load %arg1[%c130] : memref<162xf32, #tpu.memory_space<smem>>
    %591 = vector.broadcast %590 : f32 to vector<14x256xf32>
    %592 = arith.mulf %591, %573 : vector<14x256xf32>
    %593 = arith.addf %568, %592 : vector<14x256xf32>
    %c157 = arith.constant 157 : index
    %594 = memref.load %arg1[%c157] : memref<162xf32, #tpu.memory_space<smem>>
    %595 = vector.broadcast %594 : f32 to vector<14x256xf32>
    %596 = arith.mulf %595, %573 : vector<14x256xf32>
    %597 = arith.addf %572, %596 : vector<14x256xf32>
    %598 = vector.extract_strided_slice %547 {offsets = [2, 0], sizes = [14, 256], strides = [1, 1]} : vector<16x256xf32> to vector<14x256xf32>
    %c25 = arith.constant 25 : index
    %599 = memref.load %arg1[%c25] : memref<162xf32, #tpu.memory_space<smem>>
    %600 = vector.broadcast %599 : f32 to vector<14x256xf32>
    %601 = arith.mulf %600, %598 : vector<14x256xf32>
    %602 = arith.addf %577, %601 : vector<14x256xf32>
    %c52 = arith.constant 52 : index
    %603 = memref.load %arg1[%c52] : memref<162xf32, #tpu.memory_space<smem>>
    %604 = vector.broadcast %603 : f32 to vector<14x256xf32>
    %605 = arith.mulf %604, %598 : vector<14x256xf32>
    %606 = arith.addf %581, %605 : vector<14x256xf32>
    %c79 = arith.constant 79 : index
    %607 = memref.load %arg1[%c79] : memref<162xf32, #tpu.memory_space<smem>>
    %608 = vector.broadcast %607 : f32 to vector<14x256xf32>
    %609 = arith.mulf %608, %598 : vector<14x256xf32>
    %610 = arith.addf %585, %609 : vector<14x256xf32>
    %c106 = arith.constant 106 : index
    %611 = memref.load %arg1[%c106] : memref<162xf32, #tpu.memory_space<smem>>
    %612 = vector.broadcast %611 : f32 to vector<14x256xf32>
    %613 = arith.mulf %612, %598 : vector<14x256xf32>
    %614 = arith.addf %589, %613 : vector<14x256xf32>
    %c133 = arith.constant 133 : index
    %615 = memref.load %arg1[%c133] : memref<162xf32, #tpu.memory_space<smem>>
    %616 = vector.broadcast %615 : f32 to vector<14x256xf32>
    %617 = arith.mulf %616, %598 : vector<14x256xf32>
    %618 = arith.addf %593, %617 : vector<14x256xf32>
    %c160 = arith.constant 160 : index
    %619 = memref.load %arg1[%c160] : memref<162xf32, #tpu.memory_space<smem>>
    %620 = vector.broadcast %619 : f32 to vector<14x256xf32>
    %621 = arith.mulf %620, %598 : vector<14x256xf32>
    %622 = arith.addf %597, %621 : vector<14x256xf32>
    %c254_i32_21 = arith.constant 254 : i32
    %623 = tpu.dynamic_rotate %471 by %c254_i32_21 dim 1 : vector<16x256xf32>, i32 -> vector<16x256xf32>
    %624 = vector.extract_strided_slice %623 {offsets = [0, 0], sizes = [14, 256], strides = [1, 1]} : vector<16x256xf32> to vector<14x256xf32>
    %c20 = arith.constant 20 : index
    %625 = memref.load %arg1[%c20] : memref<162xf32, #tpu.memory_space<smem>>
    %626 = vector.broadcast %625 : f32 to vector<14x256xf32>
    %627 = arith.mulf %626, %624 : vector<14x256xf32>
    %628 = arith.addf %602, %627 : vector<14x256xf32>
    %c47 = arith.constant 47 : index
    %629 = memref.load %arg1[%c47] : memref<162xf32, #tpu.memory_space<smem>>
    %630 = vector.broadcast %629 : f32 to vector<14x256xf32>
    %631 = arith.mulf %630, %624 : vector<14x256xf32>
    %632 = arith.addf %606, %631 : vector<14x256xf32>
    %c74 = arith.constant 74 : index
    %633 = memref.load %arg1[%c74] : memref<162xf32, #tpu.memory_space<smem>>
    %634 = vector.broadcast %633 : f32 to vector<14x256xf32>
    %635 = arith.mulf %634, %624 : vector<14x256xf32>
    %636 = arith.addf %610, %635 : vector<14x256xf32>
    %c101 = arith.constant 101 : index
    %637 = memref.load %arg1[%c101] : memref<162xf32, #tpu.memory_space<smem>>
    %638 = vector.broadcast %637 : f32 to vector<14x256xf32>
    %639 = arith.mulf %638, %624 : vector<14x256xf32>
    %640 = arith.addf %614, %639 : vector<14x256xf32>
    %c128 = arith.constant 128 : index
    %641 = memref.load %arg1[%c128] : memref<162xf32, #tpu.memory_space<smem>>
    %642 = vector.broadcast %641 : f32 to vector<14x256xf32>
    %643 = arith.mulf %642, %624 : vector<14x256xf32>
    %644 = arith.addf %618, %643 : vector<14x256xf32>
    %c155 = arith.constant 155 : index
    %645 = memref.load %arg1[%c155] : memref<162xf32, #tpu.memory_space<smem>>
    %646 = vector.broadcast %645 : f32 to vector<14x256xf32>
    %647 = arith.mulf %646, %624 : vector<14x256xf32>
    %648 = arith.addf %622, %647 : vector<14x256xf32>
    %649 = vector.extract_strided_slice %623 {offsets = [1, 0], sizes = [14, 256], strides = [1, 1]} : vector<16x256xf32> to vector<14x256xf32>
    %c23 = arith.constant 23 : index
    %650 = memref.load %arg1[%c23] : memref<162xf32, #tpu.memory_space<smem>>
    %651 = vector.broadcast %650 : f32 to vector<14x256xf32>
    %652 = arith.mulf %651, %649 : vector<14x256xf32>
    %653 = arith.addf %628, %652 : vector<14x256xf32>
    %c50 = arith.constant 50 : index
    %654 = memref.load %arg1[%c50] : memref<162xf32, #tpu.memory_space<smem>>
    %655 = vector.broadcast %654 : f32 to vector<14x256xf32>
    %656 = arith.mulf %655, %649 : vector<14x256xf32>
    %657 = arith.addf %632, %656 : vector<14x256xf32>
    %c77 = arith.constant 77 : index
    %658 = memref.load %arg1[%c77] : memref<162xf32, #tpu.memory_space<smem>>
    %659 = vector.broadcast %658 : f32 to vector<14x256xf32>
    %660 = arith.mulf %659, %649 : vector<14x256xf32>
    %661 = arith.addf %636, %660 : vector<14x256xf32>
    %c104 = arith.constant 104 : index
    %662 = memref.load %arg1[%c104] : memref<162xf32, #tpu.memory_space<smem>>
    %663 = vector.broadcast %662 : f32 to vector<14x256xf32>
    %664 = arith.mulf %663, %649 : vector<14x256xf32>
    %665 = arith.addf %640, %664 : vector<14x256xf32>
    %c131 = arith.constant 131 : index
    %666 = memref.load %arg1[%c131] : memref<162xf32, #tpu.memory_space<smem>>
    %667 = vector.broadcast %666 : f32 to vector<14x256xf32>
    %668 = arith.mulf %667, %649 : vector<14x256xf32>
    %669 = arith.addf %644, %668 : vector<14x256xf32>
    %c158 = arith.constant 158 : index
    %670 = memref.load %arg1[%c158] : memref<162xf32, #tpu.memory_space<smem>>
    %671 = vector.broadcast %670 : f32 to vector<14x256xf32>
    %672 = arith.mulf %671, %649 : vector<14x256xf32>
    %673 = arith.addf %648, %672 : vector<14x256xf32>
    %674 = vector.extract_strided_slice %623 {offsets = [2, 0], sizes = [14, 256], strides = [1, 1]} : vector<16x256xf32> to vector<14x256xf32>
    %c26 = arith.constant 26 : index
    %675 = memref.load %arg1[%c26] : memref<162xf32, #tpu.memory_space<smem>>
    %676 = vector.broadcast %675 : f32 to vector<14x256xf32>
    %677 = arith.mulf %676, %674 : vector<14x256xf32>
    %678 = arith.addf %653, %677 : vector<14x256xf32>
    %c53 = arith.constant 53 : index
    %679 = memref.load %arg1[%c53] : memref<162xf32, #tpu.memory_space<smem>>
    %680 = vector.broadcast %679 : f32 to vector<14x256xf32>
    %681 = arith.mulf %680, %674 : vector<14x256xf32>
    %682 = arith.addf %657, %681 : vector<14x256xf32>
    %c80 = arith.constant 80 : index
    %683 = memref.load %arg1[%c80] : memref<162xf32, #tpu.memory_space<smem>>
    %684 = vector.broadcast %683 : f32 to vector<14x256xf32>
    %685 = arith.mulf %684, %674 : vector<14x256xf32>
    %686 = arith.addf %661, %685 : vector<14x256xf32>
    %c107 = arith.constant 107 : index
    %687 = memref.load %arg1[%c107] : memref<162xf32, #tpu.memory_space<smem>>
    %688 = vector.broadcast %687 : f32 to vector<14x256xf32>
    %689 = arith.mulf %688, %674 : vector<14x256xf32>
    %690 = arith.addf %665, %689 : vector<14x256xf32>
    %c134 = arith.constant 134 : index
    %691 = memref.load %arg1[%c134] : memref<162xf32, #tpu.memory_space<smem>>
    %692 = vector.broadcast %691 : f32 to vector<14x256xf32>
    %693 = arith.mulf %692, %674 : vector<14x256xf32>
    %694 = arith.addf %669, %693 : vector<14x256xf32>
    %c161 = arith.constant 161 : index
    %695 = memref.load %arg1[%c161] : memref<162xf32, #tpu.memory_space<smem>>
    %696 = vector.broadcast %695 : f32 to vector<14x256xf32>
    %697 = arith.mulf %696, %674 : vector<14x256xf32>
    %698 = arith.addf %673, %697 : vector<14x256xf32>
    %c0_22 = arith.constant 0 : index
    %c0_23 = arith.constant 0 : index
    %c0_24 = arith.constant 0 : index
    %c0_25 = arith.constant 0 : index
    %699 = vector.load %arg4[%c0_22, %c0_23, %c0_24, %c0_25] : memref<1x6x14x256xf32, #tpu.memory_space<vmem>>, vector<1x1x14x256xf32>
    %700 = vector.shape_cast %699 : vector<1x1x14x256xf32> to vector<14x256xf32>
    %701 = vector.shape_cast %678 : vector<14x256xf32> to vector<1x1x14x256xf32>
    tpu.vector_store %arg4[%c0_22, %c0_23, %c0_24, %c0_25], %701 {strides = array<i32>} : memref<1x6x14x256xf32, #tpu.memory_space<vmem>>, vector<1x1x14x256xf32>,
    %c0_26 = arith.constant 0 : index
    %c1_27 = arith.constant 1 : index
    %c0_28 = arith.constant 0 : index
    %c0_29 = arith.constant 0 : index
    %702 = vector.load %arg4[%c0_26, %c1_27, %c0_28, %c0_29] : memref<1x6x14x256xf32, #tpu.memory_space<vmem>>, vector<1x1x14x256xf32>
    %703 = vector.shape_cast %702 : vector<1x1x14x256xf32> to vector<14x256xf32>
    %704 = vector.shape_cast %682 : vector<14x256xf32> to vector<1x1x14x256xf32>
    tpu.vector_store %arg4[%c0_26, %c1_27, %c0_28, %c0_29], %704 {strides = array<i32>} : memref<1x6x14x256xf32, #tpu.memory_space<vmem>>, vector<1x1x14x256xf32>,
    %c0_30 = arith.constant 0 : index
    %c2_31 = arith.constant 2 : index
    %c0_32 = arith.constant 0 : index
    %c0_33 = arith.constant 0 : index
    %705 = vector.load %arg4[%c0_30, %c2_31, %c0_32, %c0_33] : memref<1x6x14x256xf32, #tpu.memory_space<vmem>>, vector<1x1x14x256xf32>
    %706 = vector.shape_cast %705 : vector<1x1x14x256xf32> to vector<14x256xf32>
    %707 = vector.shape_cast %686 : vector<14x256xf32> to vector<1x1x14x256xf32>
    tpu.vector_store %arg4[%c0_30, %c2_31, %c0_32, %c0_33], %707 {strides = array<i32>} : memref<1x6x14x256xf32, #tpu.memory_space<vmem>>, vector<1x1x14x256xf32>,
    %c0_34 = arith.constant 0 : index
    %c3_35 = arith.constant 3 : index
    %c0_36 = arith.constant 0 : index
    %c0_37 = arith.constant 0 : index
    %708 = vector.load %arg4[%c0_34, %c3_35, %c0_36, %c0_37] : memref<1x6x14x256xf32, #tpu.memory_space<vmem>>, vector<1x1x14x256xf32>
    %709 = vector.shape_cast %708 : vector<1x1x14x256xf32> to vector<14x256xf32>
    %710 = vector.shape_cast %690 : vector<14x256xf32> to vector<1x1x14x256xf32>
    tpu.vector_store %arg4[%c0_34, %c3_35, %c0_36, %c0_37], %710 {strides = array<i32>} : memref<1x6x14x256xf32, #tpu.memory_space<vmem>>, vector<1x1x14x256xf32>,
    %c0_38 = arith.constant 0 : index
    %c4_39 = arith.constant 4 : index
    %c0_40 = arith.constant 0 : index
    %c0_41 = arith.constant 0 : index
    %711 = vector.load %arg4[%c0_38, %c4_39, %c0_40, %c0_41] : memref<1x6x14x256xf32, #tpu.memory_space<vmem>>, vector<1x1x14x256xf32>
    %712 = vector.shape_cast %711 : vector<1x1x14x256xf32> to vector<14x256xf32>
    %713 = vector.shape_cast %694 : vector<14x256xf32> to vector<1x1x14x256xf32>
    tpu.vector_store %arg4[%c0_38, %c4_39, %c0_40, %c0_41], %713 {strides = array<i32>} : memref<1x6x14x256xf32, #tpu.memory_space<vmem>>, vector<1x1x14x256xf32>,
    %c0_42 = arith.constant 0 : index
    %c5_43 = arith.constant 5 : index
    %c0_44 = arith.constant 0 : index
    %c0_45 = arith.constant 0 : index
    %714 = vector.load %arg4[%c0_42, %c5_43, %c0_44, %c0_45] : memref<1x6x14x256xf32, #tpu.memory_space<vmem>>, vector<1x1x14x256xf32>
    %715 = vector.shape_cast %714 : vector<1x1x14x256xf32> to vector<14x256xf32>
    %716 = vector.shape_cast %698 : vector<14x256xf32> to vector<1x1x14x256xf32>
    tpu.vector_store %arg4[%c0_42, %c5_43, %c0_44, %c0_45], %716 {strides = array<i32>} : memref<1x6x14x256xf32, #tpu.memory_space<vmem>>, vector<1x1x14x256xf32>,
    return
  }
  func.func @transform_0(%arg0: i32) -> i32 {
    %c0_i32 = arith.constant 0 : i32
    %c0_i32_0 = arith.constant 0 : i32
    return %c0_i32 : i32
  }
  func.func @transform_1(%arg0: i32) -> i32 {
    %c0_i32 = arith.constant 0 : i32
    %c0_i32_0 = arith.constant 0 : i32
    return %c0_i32 : i32
  }
  func.func @transform_2(%arg0: i32) -> (i32, i32, i32, i32) {
    %c0_i32 = arith.constant 0 : i32
    %c0_i32_0 = arith.constant 0 : i32
    %c0_i32_1 = arith.constant 0 : i32
    %c0_i32_2 = arith.constant 0 : i32
    return %arg0, %c0_i32, %c0_i32_0, %c0_i32_1 : i32, i32, i32, i32
  }
  func.func @transform_3(%arg0: i32) -> (i32, i32, i32, i32) {
    %c0_i32 = arith.constant 0 : i32
    %c0_i32_0 = arith.constant 0 : i32
    %c0_i32_1 = arith.constant 0 : i32
    %c0_i32_2 = arith.constant 0 : i32
    return %arg0, %c0_i32, %c0_i32_0, %c0_i32_1 : i32, i32, i32, i32
  }
}

</mosaic_0001>

<bundles_post_ra>
// kernel: tpu_custom_call.1
= control target key start
LH: loop header
LB: loop body
LE: loop exit
PB: predicated region body
PF: predicated region fallthrough
CT: control target
= control target key end

     0   :  { %8 = vsyncpa [#allocation4], 0  ;;  %s8348_s0 = inlined_call_operand.hbm [shape: f32[162], index: 0, kind: input, shape index: {}]   ;;  %s8349_s1 = inlined_call_operand.hbm [shape: f32[6], index: 1, kind: input, shape index: {}]   ;;  %s8350_s2 = inlined_call_operand.hbm [shape: f32[1,3,16,256], index: 2, kind: input, shape index: {}]   ;;  %s8351_s3 = inlined_call_operand.vmem [shape: f32[1,6,14,256], index: 3, kind: output, shape index: {}]  }
   0x1   :  { %9 = vsyncpa [#allocation6], 0  ;;  %s16_s14 = sshll.u32 %s8348_s0, 4  ;;  %s17_s14 = int_to_ptr.hbm [resolvable:$true] %s16_s14 }
   0x2   :  { %10 = vsyncpa [#allocation3], 0  ;;  %s25_s17 = sshll.u32 %s8349_s1, 4  ;;  %s3582_s18 = smov [#allocation2]   ;;  %s26_s17 = int_to_ptr.hbm [resolvable:$true] %s25_s17 }
   0x3   :  { %19 = dma.hbm_to_smem %s17_s14, 32, %s3582_s18, [#allocation4]  }
   0x4   :  { %s3583_s19 = smov [#allocation5]   ;;  %s33_s22 = sshll.u32 %s8350_s2, 4  ;;  %s34_s22 = int_to_ptr.hbm [resolvable:$true] %s33_s22 }
   0x5   :  { %28 = dma.hbm_to_smem %s26_s17, 16, %s3583_s19, [#allocation6]  }
   0x6   :  { %s3584_s23 = smov [#allocation7]   ;;  %s3585_s0 = smov 256  }
   0x7   :  { %s35_s24 = sshll.u32 %s3584_s23, 4  ;;  %s3586_s25 = smov 16   ;;  %s36_s24 = int_to_ptr.vmem [resolvable:$true] %s35_s24 }
   0x8   :  { %41 = dma.hbm_to_vmem [thread:$0]  %s34_s22, 1536, %s36_s24, [#allocation3], %s3585_s0, %s3585_s0, %s3586_s25  }
   0x9   :  { %3576 = dma.done.wait [#allocation4], 32  }
   0xa   :  { %3577 = vsyncadd [#allocation4], 4294967264 }
   0xb   :  { %3578 = dma.done.wait [#allocation6], 16  }
   0xc   :  { %3579 = vsyncadd [#allocation6], 4294967280 }
   0xd   :  { %3580 = dma.done.wait [#allocation3], 1536  }
   0xe   :  { %3581 = vsyncadd [#allocation3], 4294965760 }
   0xf   :  { %54 = sfence }
  0x10   :  { %v3618_v0 = vld [vmem:[#allocation7 + $0x8] sm:$0xff]  ;;  %v3620_v1 = vld [vmem:[#allocation7] sm:$0xff]  ;;  %s3587_s1 = smov 127   ;;  %s3588_s2 = smov 126   ;;  %v3628_v2 = vld [vmem:[#allocation7 + $0x18] sm:$0xff]  ;;  %vm141_vm0 = vcmask 1046528  }
  0x11   :  { %425 = vrot.lane.b32.xlu1 %v3618_v0, %s3587_s1  ;;  %421 = vrot.lane.b32.xlu0 %v3620_v1, %s3587_s1  ;;  %8718 = vst [vmem:[#allocation11_spill] sm:$0xff] %v3628_v2  ;;  %v3630_v3 = vld [vmem:[#allocation7 + $0x10] sm:$0xff]  ;;  %v1146_v4 = vld [vmem:[#allocation7 + $0x20] sm:$0xff]  ;;  %v1147_v5 = vld [vmem:[#allocation7 + $0x28] sm:$0xff]  ;;  %s71_s26 = sld [smem:[#allocation2]]  ;;  %vm286_vm1 = vcmask 1045504  }
  0x12   :  { %784 = vrot.lane.b32.xlu2 %v3620_v1, %s3588_s2  ;;  %8719 = vst [vmem:[#allocation12_spill] sm:$0xff] %v3630_v3  ;;  %v1148_v6 = vld [vmem:[#allocation7 + $0x30] sm:$0xff]  ;;  %v1149_v7 = vld [vmem:[#allocation7 + $0x38] sm:$0xff]  ;;  %v2219_v8 = vld [vmem:[#allocation7 + $0x40] sm:$0xff]  ;;  %s3332_s27 = sld [smem:[#allocation2 + $0x1b]] }
  0x13   :  { %v2221_v9 = vld [vmem:[#allocation7 + $0x50] sm:$0xff]  ;;  %v2222_v10 = vld [vmem:[#allocation7 + $0x58] sm:$0xff]  ;;  %v2220_v11 = vld [vmem:[#allocation7 + $0x48] sm:$0xff]  ;;  %s3333_s28 = sld [smem:[#allocation2 + $0x36]] }
  0x14   :  { %s3334_s29 = sld [smem:[#allocation2 + $0x51]] }
  0x15   :  { %s3335_s30 = sld [smem:[#allocation2 + $0x6c]] }
  0x16   :  { %s3337_s4 = sld [smem:[#allocation2 + $0x3]] }
  0x17   :  { %s3338_s5 = sld [smem:[#allocation2 + $0x1e]]  ;;  %v3666_v12 = vstv %s71_s26 }
  0x18   :  { %s3339_s6 = sld [smem:[#allocation2 + $0x39]]  ;;  %8720 = vst [vmem:[#allocation13_spill] sm:$0xff] %v3666_v12  ;;  %v3668_v13 = vstv %s3332_s27  ;;  %v3690_v20 = vmul.f32 %v3666_v12, %v3618_v0 }
  0x19   :  { %427 = vrot.lane.b32.xlu1 %v3628_v2, %s3587_s1  ;;  %423 = vrot.lane.b32.xlu0 %v3630_v3, %s3587_s1  ;;  %s3340_s7 = sld [smem:[#allocation2 + $0x54]]  ;;  %8721 = vst [vmem:[#allocation14_spill] sm:$0xff] %v3668_v13  ;;  %v3670_v14 = vstv %s3333_s28  ;;  %v3694_v21 = vmul.f32 %v3668_v13, %v3618_v0 }
  0x1a   :  { %786 = vrot.lane.b32.xlu2 %v3630_v3, %s3588_s2  ;;  %s3336_s8 = sld [smem:[#allocation2 + $0x87]]  ;;  %8722 = vst [vmem:[#allocation15_spill] sm:$0xff] %v3670_v14  ;;  %v3680_v17 = vstv %s3334_s29  ;;  %v3698_v22 = vmul.f32 %v3670_v14, %v3618_v0 }
  0x1b   :  { %s3658_s9 = sld [smem:[#allocation2 + $0x6f]]  ;;  %8723 = vst [vmem:[#allocation16_spill] sm:$0xff] %v3680_v17  ;;  %v3700_v23 = vstv %s3335_s30  ;;  %v3718_v28 = vmul.f32 %v3680_v17, %v3618_v0 }
  0x1c   :  { %s3660_s10 = sld [smem:[#allocation2 + $0x8a]]  ;;  %v3674_v15 = vstv %s3337_s4  ;;  %8724 = vst [vmem:[#allocation17_spill] sm:$0xff] %v3700_v23  ;;  %v3734_v32 = vmul.f32 %v3700_v23, %v3618_v0 }
  0x1d   :  { %s3662_s11 = sld [smem:[#allocation2 + $0x6]]  ;;  %v3676_v16 = vstv %s3338_s5  ;;  %v134_v25 = vmul.f32 %v3674_v15, %v3618_v0  ;;  %v3710_v26 = vmul.f32 %v3674_v15, %v3628_v2  ;;  %v3738_v33 = vmul.f32 %v3674_v15, %v3630_v3 }
  0x1e   :  { %s3664_s12 = sld [smem:[#allocation2 + $0x21]]  ;;  %v3682_v18 = vstv %s3339_s6  ;;  %v159_v27 = vmul.f32 %v3676_v16, %v3618_v0  ;;  %v3722_v29 = vmul.f32 %v3676_v16, %v3628_v2  ;;  %v3754_v37 = vmul.f32 %v3676_v16, %v3630_v3 }
  0x1f   :  { %s3672_s13 = sld [smem:[#allocation2 + $0x3c]]  ;;  %v3684_v19 = vstv %s3340_s7  ;;  %8725 = vst [vmem:[#allocation18_spill] sm:$0xff] %v3710_v26  ;;  %v183_v30 = vmul.f32 %v3682_v18, %v3618_v0  ;;  %v3728_v31 = vmul.f32 %v3682_v18, %v3628_v2  ;;  %v145_v39 = vrot.slane %v134_v25, 1 }
  0x20   :  { %s3678_s14 = sld [smem:[#allocation2 + $0x57]]  ;;  %v3704_v24 = vstv %s3336_s8  ;;  %8726 = vst [vmem:[#allocation19_spill] sm:$0xff] %v3722_v29  ;;  %v207_v34 = vmul.f32 %v3684_v19, %v3618_v0  ;;  %v3744_v35 = vmul.f32 %v3684_v19, %v3628_v2  ;;  %v8355_v40 = vrot.slane %v3710_v26, 1 }
  0x21   :  { %790 = vrot.lane.b32.xlu1 %v3628_v2, %s3588_s2  ;;  %788 = vrot.lane.b32.xlu0 %v3618_v0, %s3588_s2  ;;  %s3686_s15 = sld [smem:[#allocation2 + $0x72]]  ;;  %8727 = vst [vmem:[#allocation20_spill] sm:$0xff] %v3728_v31  ;;  %v3750_v36 = vmul.f32 %v3704_v24, %v3618_v0  ;;  %v3757_v38 = vstv %s3658_s9  ;;  %v169_v41 = vrot.slane %v159_v27, 1  ;;  %v3764_v42 = vmul.f32 %v3682_v18, %v3630_v3 }
  0x22   :  { %1498 = vrot.lane.b32.xlu2 %v1146_v4, %s3587_s1  ;;  %s3702_s16 = sld [smem:[#allocation2 + $0x8d]]  ;;  %8728 = vst [vmem:[#allocation21_spill] sm:$0xff] %v3744_v35  ;;  %v8354_v43 = vrot.slane %v3722_v29, 1  ;;  %v193_v44 = vrot.slane %v183_v30, 1  ;;  %v8353_v45 = vrot.slane %v3728_v31, 1  ;;  %v3771_v46 = vstv %s3660_s10 }
  0x23   :  { %s3714_s17 = sld [smem:[#allocation2 + $0x1]]  ;;  %v3777_v47 = vmul.f32 %v3684_v19, %v3630_v3  ;;  %v217_v48 = vrot.slane %v207_v34, 1  ;;  %v8352_v49 = vrot.slane %v3744_v35, 1  ;;  %v231_v50 = vmul.f32 %v3757_v38, %v3618_v0 }
  0x24   :  { %s3730_s18 = sld [smem:[#allocation2 + $0x1c]]  ;;  %v3788_v53 = vmul.f32 %v3757_v38, %v3630_v3  ;;  %v3792_v54 = vmul.f32 %v3757_v38, %v3628_v2  ;;  %v3799_v55 = vsel %vm141_vm0, %v145_v39, %v8355_v40  ;;  %v3803_v56 = vmul.f32 %v3771_v46, %v3618_v0 }
  0x25   :  { %s3746_s19 = sld [smem:[#allocation2 + $0x37]]  ;;  %v3807_v57 = vmul.f32 %v3771_v46, %v3630_v3  ;;  %v3810_v58 = vstv %s3662_s11  ;;  %v3817_v59 = vsel %vm141_vm0, %v169_v41, %v8354_v43  ;;  %v3823_v61 = vsel %vm141_vm0, %v193_v44, %v8353_v45 }
  0x26   :  { %s3759_s20 = sld [smem:[#allocation2 + $0x52]]  ;;  %8729 = vst [vmem:[#allocation22_spill] sm:$0xff] %v3792_v54  ;;  %v3827_v62 = vmul.f32 %v3771_v46, %v3628_v2  ;;  %v265_v25 = vrot.slane %v3803_v56, 1  ;;  %v3855_v27 = vmul.f32 %v3810_v58, %v3628_v2  ;;  %v3858_v30 = vstv %s3678_s14 }
  0x27   :  { %s3766_s21 = sld [smem:[#allocation2 + $0x6d]]  ;;  %8730 = vst [vmem:[#allocation23_spill] sm:$0xff] %v3807_v57  ;;  %v3865_v39 = vmul.f32 %v3810_v58, %v3630_v3  ;;  %v3870_v44 = vstv %s3686_s15  ;;  %v352_v43 = vmul.f32 %v3858_v30, %v3618_v0  ;;  %v3898_v40 = vmul.f32 %v3858_v30, %v3628_v2 }
  0x28   :  { %s3773_s22 = sld [smem:[#allocation2 + $0x88]]  ;;  %8731 = vst [vmem:[#allocation24_spill] sm:$0xff] %v3827_v62  ;;  %v376_v63 = vmul.f32 %v3870_v44, %v3618_v0  ;;  %v3933_v35 = vmul.f32 %v3858_v30, %v3630_v3  ;;  %v429_v29 = vlaneseq }
  0x29   :  { %1502 = vrot.lane.b32.xlu1 %v1147_v5, %s3587_s1  ;;  %1500 = vrot.lane.b32.xlu0 %v1148_v6, %s3587_s1  ;;  %s3782_s23 = sld [smem:[#allocation2 + $0x4]]  ;;  %8732 = vst [vmem:[#allocation25_spill] sm:$0xff] %v3855_v27  ;;  %v362_v31 = vrot.slane %v352_v43, 2  ;;  %v8738_v43 = vrot.slane %v3827_v62, 1  ;;  %v8742_v62 = vrot.slane %v3898_v40, 2 }
  0x2a   :  { %1504 = vrot.lane.b32.xlu2 %v1149_v7, %s3587_s1  ;;  %s3794_s24 = sld [smem:[#allocation2 + $0x1f]]  ;;  %8735 = vst [vmem:[#allocation28_spill] sm:$0xff] %v3898_v40 }
  0x2b   :  { %s3812_s0 = sld [smem:[#allocation2 + $0x3a]] }
  0x2c   :  { %s3829_s25 = sld [smem:[#allocation2 + $0x55]] }
  0x2d   :  { %s3860_s26 = sld [smem:[#allocation2 + $0x7]] }
  0x2e   :  { %s3872_s27 = sld [smem:[#allocation2 + $0x22]] }
  0x2f   :  { %s3887_s28 = sld [smem:[#allocation2 + $0x3d]] }
  0x30   :  { %s3900_s29 = sld [smem:[#allocation2 + $0x58]] }
  0x31   :  { %1860 = vrot.lane.b32.xlu1 %v1148_v6, %s3588_s2  ;;  %1858 = vrot.lane.b32.xlu0 %v1146_v4, %s3588_s2  ;;  %v3835_v4 = vsel %vm141_vm0, %v217_v48, %v8352_v49  ;;  %v3838_v6 = vstv %s3664_s12  ;;  %v3885_v49 = vstv %s3702_s16  ;;  %s3909_s30 = sld [smem:[#allocation2 + $0x73]] }
  0x32   :  { %1862 = vrot.lane.b32.xlu2 %v1147_v5, %s3588_s2  ;;  %v241_v5 = vrot.slane %v231_v50, 1  ;;  %v304_v41 = vmul.f32 %v3838_v6, %v3618_v0  ;;  %v3876_v48 = vmul.f32 %v3838_v6, %v3628_v2  ;;  %v3923_v52 = vmul.f32 %v3885_v49, %v3628_v2  ;;  %s3925_s4 = sld [smem:[#allocation2 + $0x8e]] }
  0x33   :  { %s3929_s5 = sld [smem:[#allocation5]] }
  0x34   :  { %8733 = vst [vmem:[#allocation26_spill] sm:$0xff] %v3876_v48  ;;  %v314_v51 = vrot.slane %v304_v41, 2  ;;  %s3936_s6 = sld [smem:[#allocation5 + $0x1]]  ;;  %v3940_v41 = vmul.f32 %v3870_v44, %v3630_v3  ;;  %v8368_v57 = vrot.slane %v3923_v52, 2 }
  0x35   :  { %8737 = vst [vmem:[#allocation30_spill] sm:$0xff] %v3923_v52  ;;  %s3947_s7 = sld [smem:[#allocation5 + $0x2]]  ;;  %v4018_v52 = vstv %s3782_s23 }
  0x36   :  { %s3956_s8 = sld [smem:[#allocation5 + $0x3]]  ;;  %8750 = vst [vmem:[#allocation37_spill] sm:$0xff] %v4018_v52 }
  0x37   :  { %s3970_s9 = sld [smem:[#allocation5 + $0x4]]  ;;  %v4048_v52 = vstv %s3909_s30 }
  0x38   :  { %s3985_s10 = sld [smem:[#allocation5 + $0x5]]  ;;  %8760 = vst [vmem:[#allocation47_spill] sm:$0xff] %v4048_v52  ;;  %v103_v52 = vmul.f32 %v3680_v17, %v3620_v1  ;;  %v113_v17 = vmul.f32 %v3700_v23, %v3620_v1  ;;  %v230_v23 = vmul.f32 %v3757_v38, %v3620_v1  ;;  %v278_v38 = vmul.f32 %v3810_v58, %v3620_v1 }
  0x39   :  { %2571 = vrot.lane.b32.xlu1 %v2219_v8, %s3587_s1  ;;  %1864 = vrot.lane.b32.xlu0 %v1149_v7, %s3588_s2  ;;  %v386_v7 = vrot.slane %v376_v63, 2  ;;  %v8739_v63 = vrot.slane %v3855_v27, 2  ;;  %v4039_v27 = vstv %s3872_s27  ;;  %s4470_s11 = sld [smem:[#allocation2 + $0x2]] }
  0x3a   :  { %2573 = vrot.lane.b32.xlu2 %v2221_v9, %s3587_s1  ;;  %8757 = vst [vmem:[#allocation44_spill] sm:$0xff] %v4039_v27  ;;  %s4476_s12 = sld [smem:[#allocation2 + $0x1d]] }
  0x3b   :  { %s4488_s14 = sld [smem:[#allocation2 + $0x53]] }
  0x3c   :  { %s4490_s15 = sld [smem:[#allocation2 + $0x6e]] }
  0x3d   :  { %v4070_v27 = vstv %s3970_s9  ;;  %s4496_s16 = sld [smem:[#allocation2 + $0x89]] }
  0x3e   :  { %s4562_s23 = sld [smem:[#allocation2 + $0x8]] }
  0x3f   :  { %s4655_s27 = sld [smem:[#allocation2 + $0x8f]] }
  0x40   :  { %s4695_s30 = sld [smem:[#allocation2 + $0x75]] }
  0x41   :  { %2577 = vrot.lane.b32.xlu1 %v2222_v10, %s3587_s1  ;;  %2575 = vrot.lane.b32.xlu0 %v2220_v11, %s3587_s1  ;;  %s3840_s1 = sld [smem:[#allocation2 + $0x70]] }
  0x42   :  { %2931 = vrot.lane.b32.xlu2 %v2219_v8, %s3588_s2  ;;  %v8356_v8 = vrot.slane %v3792_v54, 1  ;;  %v3945_v54 = vmul.f32 %v3885_v49, %v3630_v3  ;;  %s5375_s9 = sld [smem:[#allocation2 + $0x78]] }
  0x44   :  { %v3892_v45 = vsel %vm141_vm0, %v241_v5, %v8356_v8  ;;  %v3907_v5 = vmul.f32 %v3870_v44, %v3628_v2  ;;  %v3913_v8 = vmul.f32 %v3838_v6, %v3630_v3 }
  0x46   :  { %8736 = vst [vmem:[#allocation29_spill] sm:$0xff] %v3907_v5 }
  0x47   :  { %v4030_v40 = vstv %s3840_s1  ;;  %s4619_s1 = sld [smem:[#allocation2 + $0x74]] }
  0x48   :  { %8754 = vst [vmem:[#allocation41_spill] sm:$0xff] %v4030_v40  ;;  %v4063_v40 = vstv %s3956_s8  ;;  %s5309_s8 = sld [smem:[#allocation2 + $0x5d]] }
  0x49   :  { %2935 = vrot.lane.b32.xlu1 %v2220_v11, %s3588_s2  ;;  %2933 = vrot.lane.b32.xlu0 %v2221_v9, %s3588_s2  ;;  %v279_v9 = vmul.f32 %v3810_v58, %v3618_v0  ;;  %8765 = vst [vmem:[#allocation52_spill] sm:$0xff] %v4063_v40 }
  0x4a   :  { %2937 = vrot.lane.b32.xlu2 %v2222_v10, %s3588_s2  ;;  %v3847_v10 = vstv %s3672_s13  ;;  %s3849_s2 = sld [smem:[#allocation2 + $0x8b]] }
  0x4b   :  { %v328_v50 = vmul.f32 %v3847_v10, %v3618_v0  ;;  %v3882_v56 = vmul.f32 %v3847_v10, %v3628_v2  ;;  %v290_v11 = vrot.slane %v279_v9, 2  ;;  %v3917_v60 = vmul.f32 %v3847_v10, %v3630_v3  ;;  %s4482_s13 = sld [smem:[#allocation2 + $0x38]] }
  0x4c   :  { %v400_v9 = vmul.f32 %v3885_v49, %v3618_v0  ;;  %v3952_v0 = vsel %vm141_vm0, %v265_v25, %v8738_v43  ;;  %v8740_v25 = vrot.slane %v3876_v48, 2  ;;  %v4036_v48 = vstv %s3860_s26  ;;  %s4643_s26 = sld [smem:[#allocation2 + $0x24]] }
  0x4d   :  { %8734 = vst [vmem:[#allocation27_spill] sm:$0xff] %v3882_v56  ;;  %v338_v34 = vrot.slane %v328_v50, 2  ;;  %v3961_v50 = vsel %vm286_vm1, %v290_v11, %v8739_v63  ;;  %v8741_v26 = vrot.slane %v3882_v56, 2  ;;  %v4015_v63 = vstv %s3773_s22  ;;  %s4552_s22 = sld [smem:[#allocation2 + $0x8c]] }
  0x4e   :  { %v410_v2 = vrot.slane %v400_v9, 2  ;;  %v3967_v43 = vsel %vm286_vm1, %v314_v51, %v8740_v25  ;;  %v3981_v51 = vsel %vm286_vm1, %v362_v31, %v8742_v62  ;;  %v3983_v25 = vand.u32 127, %v429_v29  ;;  %8749 = vst [vmem:[#allocation36_spill] sm:$0xff] %v4015_v63 }
  0x4f   :  { %v3975_v11 = vsel %vm286_vm1, %v338_v34, %v8741_v26  ;;  %v8744_v26 = vrot.slane %v3907_v5, 2  ;;  %v3995_v31 = vstv %s3714_s17  ;;  %v4003_v62 = vstv %s3730_s18  ;;  %8756 = vst [vmem:[#allocation43_spill] sm:$0xff] %v4036_v48  ;;  %s4508_s17 = sld [smem:[#allocation2 + $0x5]] }
  0x50   :  { %8743 = vst [vmem:[#allocation31_spill] sm:$0xff] %v3983_v25  ;;  %v4000_v29 = vsel %vm286_vm1, %v410_v2, %v8368_v57  ;;  %v4006_v9 = vstv %s3746_s19  ;;  %v4021_v2 = vstv %s3794_s24  ;;  %v4024_v57 = vstv %s3812_s0  ;;  %s4514_s18 = sld [smem:[#allocation2 + $0x20]] }
  0x51   :  { %v3991_v34 = vsel %vm286_vm1, %v386_v7, %v8744_v26  ;;  %8745 = vst [vmem:[#allocation32_spill] sm:$0xff] %v4003_v62  ;;  %v4009_v7 = vstv %s3759_s20  ;;  %v4012_v26 = vstv %s3766_s21  ;;  %v4027_v5 = vstv %s3829_s25  ;;  %s4526_s19 = sld [smem:[#allocation2 + $0x3b]] }
  0x52   :  { %8746 = vst [vmem:[#allocation33_spill] sm:$0xff] %v4006_v9  ;;  %v4033_v56 = vstv %s3849_s2  ;;  %v4042_v3 = vstv %s3887_s28  ;;  %v4045_v63 = vstv %s3900_s29  ;;  %v73_v48 = vmul.f32 %v3666_v12, %v3620_v1  ;;  %s4528_s20 = sld [smem:[#allocation2 + $0x56]] }
  0x53   :  { %8747 = vst [vmem:[#allocation34_spill] sm:$0xff] %v4009_v7  ;;  %v133_v7 = vmul.f32 %v3674_v15, %v3620_v1  ;;  %v158_v12 = vmul.f32 %v3676_v16, %v3620_v1  ;;  %v108_v16 = vadd.f32 %v3718_v28, %v4063_v40  ;;  %vm431_vm2 = vcmp.lt.s32.totalorder %v3983_v25, 127  ;;  %s4540_s21 = sld [smem:[#allocation2 + $0x71]] }
  0x54   :  { %8748 = vst [vmem:[#allocation35_spill] sm:$0xff] %v4012_v26  ;;  %v4060_v26 = vstv %s3947_s7  ;;  %s4582_s24 = sld [smem:[#allocation2 + $0x23]]  ;;  %vm792_vm3 = vcmp.lt.s32.totalorder %v3983_v25, 126 }
  0x55   :  { %8751 = vst [vmem:[#allocation38_spill] sm:$0xff] %v4021_v2  ;;  %v4051_v2 = vstv %s3925_s4  ;;  %v166_v28 = vrot.slane %v158_v12, 1  ;;  %v238_v12 = vrot.slane %v230_v23, 1  ;;  %s4592_s0 = sld [smem:[#allocation2 + $0x3e]] }
  0x56   :  { %8752 = vst [vmem:[#allocation39_spill] sm:$0xff] %v4024_v57  ;;  %v4054_v57 = vstv %s3929_s5  ;;  %s4612_s25 = sld [smem:[#allocation2 + $0x59]] }
  0x57   :  { %8753 = vst [vmem:[#allocation40_spill] sm:$0xff] %v4027_v5  ;;  %v4057_v5 = vstv %s3936_s6  ;;  %v77_v15 = vadd.f32 %v73_v48, %v4054_v57  ;;  %v142_v48 = vrot.slane %v133_v7, 1  ;;  %v8766_v7 = vrot.slane %v3738_v33, 1  ;;  %s4631_s2 = sld [smem:[#allocation2 + $0x9]] }
  0x58   :  { %8755 = vst [vmem:[#allocation42_spill] sm:$0xff] %v4033_v56  ;;  %v78_v56 = vadd.f32 %v3690_v20, %v4054_v57  ;;  %v88_v9 = vadd.f32 %v3694_v21, %v4057_v5  ;;  %v206_v20 = vmul.f32 %v3684_v19, %v3620_v1  ;;  %v254_v19 = vmul.f32 %v3771_v46, %v3620_v1  ;;  %s4673_s28 = sld [smem:[#allocation2 + $0x3f]] }
  0x59   :  { %8758 = vst [vmem:[#allocation45_spill] sm:$0xff] %v4042_v3  ;;  %v83_v3 = vmul.f32 %v3668_v13, %v3620_v1  ;;  %v182_v13 = vmul.f32 %v3682_v18, %v3620_v1  ;;  %v123_v18 = vmul.f32 %v3704_v24, %v3620_v1  ;;  %v144_v58 = vsel %vm141_vm0, %v142_v48, %v8766_v7  ;;  %v8771_v7 = vld [vmem:[#allocation23_spill] sm:$0xff]  ;;  %s4685_s29 = sld [smem:[#allocation2 + $0x5a]] }
  0x5a   :  { %8759 = vst [vmem:[#allocation46_spill] sm:$0xff] %v4045_v63  ;;  %v4073_v63 = vstv %s3985_s10  ;;  %v153_v46 = vadd.f32 %v3799_v55, %v78_v56  ;;  %v8769_v56 = vrot.slane %v3777_v47, 1  ;;  %s4725_s4 = sld [smem:[#allocation2 + $0x90]] }
  0x5b   :  { %8761 = vst [vmem:[#allocation48_spill] sm:$0xff] %v4051_v2  ;;  %v93_v2 = vmul.f32 %v3670_v14, %v3620_v1  ;;  %v98_v14 = vadd.f32 %v3698_v22, %v4060_v26  ;;  %v87_v62 = vadd.f32 %v83_v3, %v4057_v5  ;;  %v107_v22 = vadd.f32 %v103_v52, %v4063_v40  ;;  %s5269_s5 = sld [smem:[#allocation2 + $0xc]] }
  0x5c   :  { %8762 = vst [vmem:[#allocation49_spill] sm:$0xff] %v4054_v57  ;;  %v118_v3 = vadd.f32 %v3734_v32, %v4070_v27  ;;  %v117_v57 = vadd.f32 %v113_v17, %v4070_v27  ;;  %v214_v52 = vrot.slane %v206_v20, 1  ;;  %v127_v40 = vadd.f32 %v123_v18, %v4073_v63  ;;  %s5271_s6 = sld [smem:[#allocation2 + $0x27]] }
  0x5d   :  { %8763 = vst [vmem:[#allocation50_spill] sm:$0xff] %v4057_v5  ;;  %v97_v21 = vadd.f32 %v93_v2, %v4060_v26  ;;  %v190_v5 = vrot.slane %v182_v13, 1  ;;  %v128_v2 = vadd.f32 %v3750_v36, %v4073_v63  ;;  %v303_v32 = vmul.f32 %v3838_v6, %v3620_v1  ;;  %s5307_s7 = sld [smem:[#allocation2 + $0x42]] }
  0x5e   :  { %8764 = vst [vmem:[#allocation51_spill] sm:$0xff] %v4060_v26  ;;  %v177_v26 = vadd.f32 %v3817_v59, %v88_v9  ;;  %v262_v13 = vrot.slane %v254_v19, 1  ;;  %v327_v17 = vmul.f32 %v3847_v10, %v3620_v1  ;;  %v351_v36 = vmul.f32 %v3858_v30, %v3620_v1  ;;  %s5385_s10 = sld [smem:[#allocation2 + $0x93]] }
  0x5f   :  { %v8767_v20 = vrot.slane %v3754_v37, 1  ;;  %v8768_v59 = vrot.slane %v3764_v42, 1  ;;  %v201_v23 = vadd.f32 %v3823_v61, %v98_v14  ;;  %v216_v10 = vsel %vm141_vm0, %v214_v52, %v8769_v56 }
  0x60   :  { %v287_v9 = vrot.slane %v278_v38, 2  ;;  %v375_v30 = vmul.f32 %v3870_v44, %v3620_v1  ;;  %v399_v18 = vmul.f32 %v3885_v49, %v3620_v1  ;;  %v225_v19 = vadd.f32 %v3835_v4, %v108_v16 }
  0x61   :  { %v168_v55 = vsel %vm141_vm0, %v166_v28, %v8767_v20  ;;  %v192_v6 = vsel %vm141_vm0, %v190_v5, %v8768_v59  ;;  %v249_v48 = vadd.f32 %v3892_v45, %v118_v3  ;;  %v273_v28 = vadd.f32 %v3952_v0, %v128_v2 }
  0x62   :  { %v311_v5 = vrot.slane %v303_v32, 2  ;;  %v8770_v14 = vrot.slane %v3788_v53, 1  ;;  %v8772_v52 = vrot.slane %v8771_v7, 1  ;;  %v335_v20 = vrot.slane %v327_v17, 2 }
  0x63   :  { %v359_v44 = vrot.slane %v351_v36, 2  ;;  %v152_v1 = vadd.f32 %v144_v58, %v77_v15  ;;  %v176_v49 = vadd.f32 %v168_v55, %v87_v62  ;;  %v200_v4 = vadd.f32 %v192_v6, %v97_v21 }
  0x64   :  { %v240_v61 = vsel %vm141_vm0, %v238_v12, %v8770_v14  ;;  %v264_v38 = vsel %vm141_vm0, %v262_v13, %v8772_v52  ;;  %v224_v16 = vadd.f32 %v216_v10, %v107_v22  ;;  %v8773_v45 = vrot.slane %v3865_v39, 2 }
  0x65   :  { %v298_v3 = vadd.f32 %v3961_v50, %v153_v46  ;;  %v383_v2 = vrot.slane %v375_v30, 2  ;;  %v407_v32 = vrot.slane %v399_v18, 2  ;;  %v248_v12 = vadd.f32 %v240_v61, %v117_v57 }
  0x66   :  { %v289_v0 = vsel %vm286_vm1, %v287_v9, %v8773_v45  ;;  %v272_v14 = vadd.f32 %v264_v38, %v127_v40  ;;  %v8774_v13 = vrot.slane %v3913_v8, 2  ;;  %v322_v36 = vadd.f32 %v3967_v43, %v177_v26  ;;  %v8781_v38 = vld [vmem:[#allocation34_spill] sm:$0xff] }
  0x67   :  { %v8775_v62 = vrot.slane %v3917_v60, 2  ;;  %v8776_v21 = vrot.slane %v3933_v35, 2  ;;  %v297_v57 = vadd.f32 %v289_v0, %v152_v1  ;;  %v346_v46 = vadd.f32 %v3975_v11, %v201_v23 }
  0x68   :  { %v313_v17 = vsel %vm286_vm1, %v311_v5, %v8774_v13  ;;  %v370_v43 = vadd.f32 %v3981_v51, %v225_v19  ;;  %v394_v26 = vadd.f32 %v3991_v34, %v249_v48  ;;  %v8777_v55 = vrot.slane %v3940_v41, 2  ;;  %v8779_v34 = vld [vmem:[#allocation32_spill] sm:$0xff]  ;;  %v8780_v48 = vld [vmem:[#allocation33_spill] sm:$0xff] }
  0x69   :  { %v337_v15 = vsel %vm286_vm1, %v335_v20, %v8775_v62  ;;  %v361_v22 = vsel %vm286_vm1, %v359_v44, %v8776_v21  ;;  %v321_v58 = vadd.f32 %v313_v17, %v176_v49  ;;  %v8778_v10 = vrot.slane %v3945_v54, 2  ;;  %v8783_v49 = vld [vmem:[#allocation36_spill] sm:$0xff]  ;;  %v8793_v21 = vld [vmem:[#allocation38_spill] sm:$0xff] }
  0x6a   :  { %v385_v6 = vsel %vm286_vm1, %v383_v2, %v8777_v55  ;;  %v418_v30 = vadd.f32 %v4000_v29, %v273_v28  ;;  %v345_v18 = vadd.f32 %v337_v15, %v200_v4  ;;  %v369_v5 = vadd.f32 %v361_v22, %v224_v16  ;;  %v8786_v2 = vld [vmem:[#allocation37_spill] sm:$0xff] }
  0x6b   :  { %v409_v9 = vsel %vm286_vm1, %v407_v32, %v8778_v10  ;;  %v393_v28 = vadd.f32 %v385_v6, %v248_v12  ;;  %v8798_v10 = vld [vmem:[#allocation39_spill] sm:$0xff]  ;;  %v4794_v25 = vstv %s4673_s28  ;;  %s5663_s28 = sld [smem:[#allocation2 + $0x46]] }
  0x6c   :  { %v417_v52 = vadd.f32 %v409_v9, %v272_v14  ;;  %8936 = vst [vmem:[#allocation75_spill] sm:$0xff] %v4794_v25 }
  0x83   :  { %v426_v59 = vpop.permute.xlu1 %425  ;;  %v422_v56 = vpop.permute.xlu0 %421 }
  0x84   :  { %v4166_v50 = vsel %vm431_vm2, %v422_v56, %v426_v59  ;;  %v4170_v40 = vsel %vm431_vm2, %v426_v59, %v422_v56  ;;  %v8782_v59 = vld [vmem:[#allocation35_spill] sm:$0xff] }
  0x85   :  { %v438_v11 = vmul.f32 %v3995_v31, %v4166_v50  ;;  %v439_v51 = vmul.f32 %v3995_v31, %v4170_v40  ;;  %v448_v23 = vmul.f32 %v8779_v34, %v4166_v50  ;;  %v449_v19 = vmul.f32 %v8779_v34, %v4170_v40 }
  0x86   :  { %v458_v61 = vmul.f32 %v8780_v48, %v4166_v50  ;;  %v459_v29 = vmul.f32 %v8780_v48, %v4170_v40  ;;  %v468_v20 = vmul.f32 %v8781_v38, %v4166_v50  ;;  %v469_v44 = vmul.f32 %v8781_v38, %v4170_v40 }
  0x87   :  { %v478_v56 = vmul.f32 %v8782_v59, %v4166_v50  ;;  %v479_v1 = vmul.f32 %v8782_v59, %v4170_v40  ;;  %v488_v4 = vmul.f32 %v8783_v49, %v4166_v50  ;;  %v489_v16 = vmul.f32 %v8783_v49, %v4170_v40 }
  0x88   :  { %v4206_v45 = vadd.f32 %v438_v11, %v297_v57  ;;  %v4208_v0 = vadd.f32 %v439_v51, %v298_v3  ;;  %v4212_v32 = vmul.f32 %v8786_v2, %v4166_v50  ;;  %v4216_v12 = vmul.f32 %v8786_v2, %v4170_v40  ;;  %v8802_v11 = vld [vmem:[#allocation41_spill] sm:$0xff] }
  0x89   :  { %v4218_v14 = vadd.f32 %v448_v23, %v321_v58  ;;  %v4220_v13 = vadd.f32 %v449_v19, %v322_v36  ;;  %v4222_v17 = vadd.f32 %v458_v61, %v345_v18  ;;  %v4224_v62 = vadd.f32 %v459_v29, %v346_v46  ;;  %v8805_v29 = vld [vmem:[#allocation42_spill] sm:$0xff] }
  0x8a   :  { %8784 = vst [vmem:[#allocation23_spill] sm:$0xff] %v4206_v45  ;;  %v4226_v15 = vadd.f32 %v468_v20, %v369_v5  ;;  %v4228_v3 = vadd.f32 %v469_v44, %v370_v43  ;;  %v4232_v22 = vmul.f32 %v8793_v21, %v4166_v50  ;;  %v4236_v57 = vmul.f32 %v8793_v21, %v4170_v40  ;;  %v8799_v5 = vld [vmem:[#allocation40_spill] sm:$0xff]  ;;  %v8808_v20 = vld [vmem:[#allocation43_spill] sm:$0xff]  ;;  %v8814_v43 = vld [vmem:[#allocation45_spill] sm:$0xff] }
  0x8b   :  { %8785 = vst [vmem:[#allocation32_spill] sm:$0xff] %v4208_v0  ;;  %v4238_v58 = vadd.f32 %v478_v56, %v393_v28  ;;  %v4240_v36 = vadd.f32 %v479_v1, %v394_v26  ;;  %v4242_v55 = vadd.f32 %v488_v4, %v417_v52  ;;  %v4244_v46 = vadd.f32 %v489_v16, %v418_v30  ;;  %v8811_v1 = vld [vmem:[#allocation44_spill] sm:$0xff]  ;;  %v8822_v45 = vld [vmem:[#allocation11_spill] sm:$0xff] }
  0x8c   :  { %8787 = vst [vmem:[#allocation33_spill] sm:$0xff] %v4218_v14  ;;  %v4250_v9 = vmul.f32 %v8798_v10, %v4166_v50  ;;  %v4254_v18 = vmul.f32 %v8798_v10, %v4170_v40  ;;  %v4258_v26 = vmul.f32 %v8799_v5, %v4166_v50  ;;  %v4262_v30 = vmul.f32 %v8799_v5, %v4170_v40  ;;  %v8821_v14 = vld [vmem:[#allocation13_spill] sm:$0xff] }
  0x8d   :  { %8788 = vst [vmem:[#allocation34_spill] sm:$0xff] %v4220_v13  ;;  %v4266_v51 = vmul.f32 %v8802_v11, %v4166_v50  ;;  %v4270_v23 = vmul.f32 %v8802_v11, %v4170_v40  ;;  %v4276_v28 = vmul.f32 %v8805_v29, %v4166_v50  ;;  %v4280_v52 = vmul.f32 %v8805_v29, %v4170_v40  ;;  %v8820_v13 = vld [vmem:[#allocation12_spill] sm:$0xff] }
  0x8e   :  { %8789 = vst [vmem:[#allocation35_spill] sm:$0xff] %v4222_v17  ;;  %v4284_v44 = vmul.f32 %v8808_v20, %v4166_v50  ;;  %v4288_v56 = vmul.f32 %v8808_v20, %v4170_v40  ;;  %v4292_v4 = vmul.f32 %v8811_v1, %v4166_v50  ;;  %v4296_v16 = vmul.f32 %v8811_v1, %v4170_v40 }
  0x8f   :  { %8790 = vst [vmem:[#allocation36_spill] sm:$0xff] %v4224_v62  ;;  %v4302_v6 = vmul.f32 %v8814_v43, %v4166_v50  ;;  %v75_v0 = vmul.f32 %v8821_v14, %v8820_v13  ;;  %v125_v19 = vmul.f32 %v3704_v24, %v8820_v13 }
  0x90   :  { %8791 = vst [vmem:[#allocation37_spill] sm:$0xff] %v4226_v15  ;;  %v8817_v15 = vld [vmem:[#allocation46_spill] sm:$0xff] }
  0x91   :  { %8792 = vst [vmem:[#allocation53_spill] sm:$0xff] %v4228_v3  ;;  %v4316_v62 = vmul.f32 %v8817_v15, %v4166_v50  ;;  %v4320_v17 = vmul.f32 %v8817_v15, %v4170_v40  ;;  %v8823_v15 = vld [vmem:[#allocation14_spill] sm:$0xff] }
  0x92   :  { %8794 = vst [vmem:[#allocation38_spill] sm:$0xff] %v4238_v58  ;;  %v8824_v58 = vld [vmem:[#allocation15_spill] sm:$0xff] }
  0x93   :  { %8795 = vst [vmem:[#allocation54_spill] sm:$0xff] %v4240_v36  ;;  %v86_v36 = vmul.f32 %v8823_v15, %v8822_v45  ;;  %v96_v61 = vmul.f32 %v8824_v58, %v8822_v45 }
  0x94   :  { %8796 = vst [vmem:[#allocation55_spill] sm:$0xff] %v4242_v55  ;;  %v95_v55 = vmul.f32 %v8824_v58, %v8820_v13  ;;  %v8829_v58 = vld [vmem:[#allocation17_spill] sm:$0xff] }
  0x95   :  { %8797 = vst [vmem:[#allocation56_spill] sm:$0xff] %v4244_v46  ;;  %v4306_v46 = vmul.f32 %v8814_v43, %v4170_v40  ;;  %v116_v3 = vmul.f32 %v8829_v58, %v8822_v45  ;;  %v8831_v43 = vld [vmem:[#allocation50_spill] sm:$0xff] }
  0x96   :  { %8800 = vst [vmem:[#allocation39_spill] sm:$0xff] %v4258_v26 }
  0x97   :  { %8801 = vst [vmem:[#allocation40_spill] sm:$0xff] %v4262_v30 }
  0x98   :  { %8803 = vst [vmem:[#allocation41_spill] sm:$0xff] %v4266_v51 }
  0x99   :  { %8804 = vst [vmem:[#allocation57_spill] sm:$0xff] %v4270_v23  ;;  %v8832_v23 = vld [vmem:[#allocation51_spill] sm:$0xff] }
  0x9a   :  { %8806 = vst [vmem:[#allocation42_spill] sm:$0xff] %v4276_v28  ;;  %v85_v28 = vmul.f32 %v8823_v15, %v8820_v13  ;;  %v99_v51 = vadd.f32 %v95_v55, %v8832_v23  ;;  %v100_v20 = vadd.f32 %v96_v61, %v8832_v23  ;;  %v428_v23 = vpop.permute.xlu1 %427  ;;  %v424_v61 = vpop.permute.xlu0 %423 }
  0x9b   :  { %8807 = vst [vmem:[#allocation58_spill] sm:$0xff] %v4280_v52  ;;  %v76_v52 = vmul.f32 %v8821_v14, %v8822_v45 }
  0x9c   :  { %8809 = vst [vmem:[#allocation59_spill] sm:$0xff] %v4284_v44  ;;  %v89_v1 = vadd.f32 %v85_v28, %v8831_v43 }
  0x9d   :  { %8810 = vst [vmem:[#allocation60_spill] sm:$0xff] %v4288_v56  ;;  %v115_v56 = vmul.f32 %v8829_v58, %v8820_v13  ;;  %v8833_v58 = vld [vmem:[#allocation48_spill] sm:$0xff] }
  0x9e   :  { %8812 = vst [vmem:[#allocation61_spill] sm:$0xff] %v4292_v4  ;;  %v4370_v30 = vmul.f32 %v8833_v58, %v4166_v50 }
  0x9f   :  { %8813 = vst [vmem:[#allocation62_spill] sm:$0xff] %v4296_v16  ;;  %v8826_v16 = vld [vmem:[#allocation47_spill] sm:$0xff]  ;;  %v119_v55 = vadd.f32 %v115_v56, %v4070_v27 }
  0xa0   :  { %8815 = vst [vmem:[#allocation63_spill] sm:$0xff] %v4302_v6  ;;  %v4348_v4 = vmul.f32 %v8826_v16, %v4166_v50  ;;  %v4352_v15 = vmul.f32 %v8826_v16, %v4170_v40  ;;  %v90_v16 = vadd.f32 %v86_v36, %v8831_v43  ;;  %v120_v43 = vadd.f32 %v116_v3, %v4070_v27  ;;  %v8841_v36 = vld [vmem:[#allocation19_spill] sm:$0xff] }
  0xa1   :  { %8816 = vst [vmem:[#allocation64_spill] sm:$0xff] %v4306_v46  ;;  %v8825_v46 = vld [vmem:[#allocation16_spill] sm:$0xff]  ;;  %v129_v50 = vadd.f32 %v125_v19, %v4073_v63  ;;  %v8843_v27 = vrot.slane %v3764_v42, 1 }
  0xa2   :  { %8818 = vst [vmem:[#allocation65_spill] sm:$0xff] %v4316_v62  ;;  %v105_v6 = vmul.f32 %v8825_v46, %v8820_v13  ;;  %v106_v14 = vmul.f32 %v8825_v46, %v8822_v45  ;;  %v126_v46 = vmul.f32 %v3704_v24, %v8822_v45  ;;  %v4374_v13 = vmul.f32 %v8833_v58, %v4170_v40  ;;  %v8836_v24 = vld [vmem:[#allocation52_spill] sm:$0xff] }
  0xa3   :  { %8819 = vst [vmem:[#allocation66_spill] sm:$0xff] %v4320_v17  ;;  %v8830_v17 = vld [vmem:[#allocation49_spill] sm:$0xff]  ;;  %v8837_v40 = vrot.slane %v3738_v33, 1  ;;  %v202_v3 = vadd.f32 %v8843_v27, %v99_v51  ;;  %v4408_v51 = vsel %vm431_vm2, %v424_v61, %v428_v23  ;;  %v4734_v33 = vstv %s4526_s19  ;;  %s5553_s19 = sld [smem:[#allocation2 + $0x40]] }
  0xa4   :  { %8827 = vst [vmem:[#allocation12_spill] sm:$0xff] %v4348_v4  ;;  %v79_v62 = vadd.f32 %v75_v0, %v8830_v17  ;;  %v80_v44 = vadd.f32 %v76_v52, %v8830_v17  ;;  %v109_v45 = vadd.f32 %v105_v6, %v8836_v24  ;;  %v110_v0 = vadd.f32 %v106_v14, %v8836_v24  ;;  %v8838_v6 = vld [vmem:[#allocation18_spill] sm:$0xff]  ;;  %v8844_v4 = vld [vmem:[#allocation20_spill] sm:$0xff] }
  0xa5   :  { %8828 = vst [vmem:[#allocation13_spill] sm:$0xff] %v4352_v15  ;;  %v130_v28 = vadd.f32 %v126_v46, %v4073_v63  ;;  %v8839_v58 = vrot.slane %v8838_v6, 1  ;;  %v8840_v24 = vrot.slane %v3754_v37, 1  ;;  %v8842_v15 = vrot.slane %v8841_v36, 1 }
  0xa6   :  { %8834 = vst [vmem:[#allocation11_spill] sm:$0xff] %v4370_v30  ;;  %v154_v52 = vadd.f32 %v8837_v40, %v79_v62  ;;  %v8845_v26 = vrot.slane %v8844_v4, 1  ;;  %v8846_v62 = vrot.slane %v3777_v47, 1  ;;  %v8852_v47 = vrot.slane %v8771_v7, 1  ;;  %v8853_v4 = vld [vmem:[#allocation24_spill] sm:$0xff]  ;;  %v8856_v40 = vld [vmem:[#allocation25_spill] sm:$0xff] }
  0xa7   :  { %8835 = vst [vmem:[#allocation14_spill] sm:$0xff] %v4374_v13  ;;  %v155_v14 = vadd.f32 %v8839_v58, %v80_v44  ;;  %v178_v17 = vadd.f32 %v8840_v24, %v89_v1  ;;  %v179_v56 = vadd.f32 %v8842_v15, %v90_v16  ;;  %v8847_v44 = vld [vmem:[#allocation21_spill] sm:$0xff]  ;;  %v8849_v1 = vrot.slane %v3788_v53, 1  ;;  %v8850_v16 = vld [vmem:[#allocation22_spill] sm:$0xff]  ;;  %v8862_v7 = vld [vmem:[#allocation27_spill] sm:$0xff] }
  0xa8   :  { %v203_v19 = vadd.f32 %v8845_v26, %v100_v20  ;;  %v226_v46 = vadd.f32 %v8846_v62, %v109_v45  ;;  %v8848_v58 = vrot.slane %v8847_v44, 1  ;;  %v8851_v15 = vrot.slane %v8850_v16, 1  ;;  %v8859_v62 = vld [vmem:[#allocation26_spill] sm:$0xff] }
  0xa9   :  { %v250_v36 = vadd.f32 %v8849_v1, %v119_v55  ;;  %v4412_v26 = vsel %vm431_vm2, %v428_v23, %v424_v61  ;;  %v274_v20 = vadd.f32 %v8852_v47, %v129_v50  ;;  %v8854_v45 = vrot.slane %v8853_v4, 1 }
  0xaa   :  { %v227_v37 = vadd.f32 %v8848_v58, %v110_v0  ;;  %v251_v42 = vadd.f32 %v8851_v15, %v120_v43  ;;  %v8855_v53 = vrot.slane %v3865_v39, 2  ;;  %v8857_v6 = vrot.slane %v8856_v40, 2  ;;  %v8868_v15 = vld [vmem:[#allocation29_spill] sm:$0xff] }
  0xab   :  { %v275_v0 = vadd.f32 %v8854_v45, %v130_v28  ;;  %v8858_v24 = vrot.slane %v3913_v8, 2  ;;  %v8860_v44 = vrot.slane %v8859_v62, 2  ;;  %v8861_v23 = vrot.slane %v3917_v60, 2  ;;  %v8865_v60 = vld [vmem:[#allocation28_spill] sm:$0xff] }
  0xac   :  { %v299_v55 = vadd.f32 %v8855_v53, %v154_v52  ;;  %v300_v43 = vadd.f32 %v8857_v6, %v155_v14  ;;  %v8863_v50 = vrot.slane %v8862_v7, 2  ;;  %v440_v28 = vmul.f32 %v3995_v31, %v4408_v51  ;;  %v8871_v53 = vld [vmem:[#allocation30_spill] sm:$0xff] }
  0xad   :  { %v323_v27 = vadd.f32 %v8858_v24, %v178_v17  ;;  %v324_v58 = vadd.f32 %v8860_v44, %v179_v56  ;;  %v347_v61 = vadd.f32 %v8861_v23, %v202_v3  ;;  %v441_v39 = vmul.f32 %v3995_v31, %v4412_v26 }
  0xae   :  { %v348_v1 = vadd.f32 %v8863_v50, %v203_v19  ;;  %v450_v52 = vmul.f32 %v8779_v34, %v4408_v51  ;;  %v451_v8 = vmul.f32 %v8779_v34, %v4412_v26  ;;  %v8864_v17 = vrot.slane %v3933_v35, 2 }
  0xaf   :  { %v8866_v56 = vrot.slane %v8865_v60, 2  ;;  %v8867_v19 = vrot.slane %v3940_v41, 2  ;;  %v8869_v47 = vrot.slane %v8868_v15, 2  ;;  %v8870_v31 = vrot.slane %v3945_v54, 2 }
  0xb0   :  { %v371_v14 = vadd.f32 %v8864_v17, %v226_v46  ;;  %v8872_v40 = vrot.slane %v8871_v53, 2  ;;  %v460_v34 = vmul.f32 %v8780_v48, %v4408_v51  ;;  %v461_v35 = vmul.f32 %v8780_v48, %v4412_v26 }
  0xb1   :  { %v372_v3 = vadd.f32 %v8866_v56, %v227_v37  ;;  %v395_v16 = vadd.f32 %v8867_v19, %v250_v36  ;;  %v396_v4 = vadd.f32 %v8869_v47, %v251_v42  ;;  %v419_v45 = vadd.f32 %v8870_v31, %v274_v20 }
  0xb2   :  { %v420_v6 = vadd.f32 %v8872_v40, %v275_v0  ;;  %v470_v46 = vmul.f32 %v8781_v38, %v4408_v51  ;;  %v471_v41 = vmul.f32 %v8781_v38, %v4412_v26  ;;  %v500_v37 = vmul.f32 %v8786_v2, %v4408_v51 }
  0xb3   :  { %v501_v54 = vmul.f32 %v8786_v2, %v4412_v26  ;;  %v444_v36 = vadd.f32 %v440_v28, %v299_v55  ;;  %v445_v42 = vadd.f32 %v441_v39, %v300_v43  ;;  %v454_v20 = vadd.f32 %v450_v52, %v323_v27 }
  0xb4   :  { %v455_v0 = vadd.f32 %v451_v8, %v324_v58  ;;  %v480_v24 = vmul.f32 %v8782_v59, %v4408_v51  ;;  %v481_v48 = vmul.f32 %v8782_v59, %v4412_v26  ;;  %v524_v62 = vmul.f32 %v8793_v21, %v4408_v51 }
  0xb5   :  { %v525_v38 = vmul.f32 %v8793_v21, %v4412_v26  ;;  %v464_v44 = vadd.f32 %v460_v34, %v347_v61  ;;  %v465_v2 = vadd.f32 %v461_v35, %v348_v1  ;;  %v490_v55 = vmul.f32 %v8783_v49, %v4408_v51 }
  0xb6   :  { %v491_v43 = vmul.f32 %v8783_v49, %v4412_v26  ;;  %v507_v27 = vrot.slane %v500_v37, 1  ;;  %v510_v59 = vrot.slane %v501_v54, 1  ;;  %v548_v58 = vmul.f32 %v8798_v10, %v4408_v51  ;;  %v8885_v54 = vld [vmem:[#allocation39_spill] sm:$0xff] }
  0xb7   :  { %v549_v21 = vmul.f32 %v8798_v10, %v4412_v26  ;;  %v474_v23 = vadd.f32 %v470_v46, %v371_v14  ;;  %v475_v61 = vadd.f32 %v471_v41, %v372_v3  ;;  %v572_v7 = vmul.f32 %v8799_v5, %v4408_v51 }
  0xb8   :  { %v573_v49 = vmul.f32 %v8799_v5, %v4412_v26  ;;  %v484_v50 = vadd.f32 %v480_v24, %v395_v16  ;;  %v485_v1 = vadd.f32 %v481_v48, %v396_v4  ;;  %v531_v28 = vrot.slane %v524_v62, 1 }
  0xb9   :  { %v534_v39 = vrot.slane %v525_v38, 1  ;;  %v494_v52 = vadd.f32 %v490_v55, %v419_v45  ;;  %v495_v10 = vadd.f32 %v491_v43, %v420_v6  ;;  %v596_v8 = vmul.f32 %v8802_v11, %v4408_v51  ;;  %v8891_v38 = vld [vmem:[#allocation43_spill] sm:$0xff]  ;;  %v8892_v55 = vld [vmem:[#allocation41_spill] sm:$0xff] }
  0xba   :  { %v597_v17 = vmul.f32 %v8802_v11, %v4412_v26  ;;  %v8873_v5 = vrot.slane %v4212_v32, 1  ;;  %v8875_v60 = vrot.slane %v4216_v12, 1  ;;  %v555_v3 = vrot.slane %v548_v58, 1 }
  0xbb   :  { %v558_v19 = vrot.slane %v549_v21, 1  ;;  %v579_v16 = vrot.slane %v572_v7, 1  ;;  %v582_v15 = vrot.slane %v573_v49, 1  ;;  %v620_v11 = vmul.f32 %v8805_v29, %v4408_v51 }
  0xbc   :  { %v4501_v14 = vsel %vm141_vm0, %v8873_v5, %v507_v27  ;;  %v4506_v56 = vsel %vm141_vm0, %v8875_v60, %v510_v59  ;;  %v621_v32 = vmul.f32 %v8805_v29, %v4412_v26  ;;  %v518_v47 = vadd.f32 %v507_v27, %v444_v36  ;;  %v8900_v5 = vld [vmem:[#allocation42_spill] sm:$0xff] }
  0xbd   :  { %8874 = vst [vmem:[#allocation15_spill] sm:$0xff] %v4501_v14  ;;  %v519_v4 = vadd.f32 %v510_v59, %v445_v42  ;;  %v8877_v12 = vrot.slane %v4232_v22, 1  ;;  %v8879_v45 = vrot.slane %v4236_v57, 1  ;;  %v542_v40 = vadd.f32 %v531_v28, %v454_v20  ;;  %v8888_v20 = vld [vmem:[#allocation40_spill] sm:$0xff]  ;;  %v8895_v59 = vld [vmem:[#allocation57_spill] sm:$0xff] }
  0xbe   :  { %8876 = vst [vmem:[#allocation16_spill] sm:$0xff] %v4506_v56  ;;  %v543_v6 = vadd.f32 %v534_v39, %v455_v0  ;;  %v603_v34 = vrot.slane %v596_v8, 1  ;;  %v606_v29 = vrot.slane %v597_v17, 1  ;;  %v8881_v35 = vrot.slane %v4250_v9, 1 }
  0xbf   :  { %v4519_v31 = vsel %vm141_vm0, %v8877_v12, %v531_v28  ;;  %v4524_v53 = vsel %vm141_vm0, %v8879_v45, %v534_v39  ;;  %v8883_v46 = vrot.slane %v4254_v18, 1  ;;  %v566_v41 = vadd.f32 %v555_v3, %v464_v44  ;;  %v8899_v39 = vld [vmem:[#allocation45_spill] sm:$0xff] }
  0xc0   :  { %8878 = vst [vmem:[#allocation17_spill] sm:$0xff] %v4519_v31  ;;  %v4533_v22 = vsel %vm141_vm0, %v8881_v35, %v555_v3  ;;  %v567_v37 = vadd.f32 %v558_v19, %v465_v2  ;;  %v8886_v36 = vrot.slane %v8885_v54, 1  ;;  %v8889_v0 = vrot.slane %v8888_v20, 1  ;;  %v8910_v54 = vld [vmem:[#allocation47_spill] sm:$0xff] }
  0xc1   :  { %8880 = vst [vmem:[#allocation49_spill] sm:$0xff] %v4524_v53  ;;  %v4538_v57 = vsel %vm141_vm0, %v8883_v46, %v558_v19  ;;  %v627_v24 = vrot.slane %v620_v11, 1  ;;  %v630_v48 = vrot.slane %v621_v32, 1  ;;  %v590_v18 = vadd.f32 %v579_v16, %v474_v23  ;;  %v8898_v23 = vld [vmem:[#allocation44_spill] sm:$0xff]  ;;  %v8903_v19 = vld [vmem:[#allocation58_spill] sm:$0xff]  ;;  %v4614_v32 = vpop.permute.xlu2 %784 }
  0xc2   :  { %8882 = vst [vmem:[#allocation50_spill] sm:$0xff] %v4533_v22  ;;  %v4545_v42 = vsel %vm141_vm0, %v8886_v36, %v579_v16  ;;  %v4550_v9 = vsel %vm141_vm0, %v8889_v0, %v582_v15  ;;  %v591_v62 = vadd.f32 %v582_v15, %v475_v61  ;;  %v4556_v44 = vmul.f32 %v8891_v38, %v4408_v51  ;;  %v8913_v0 = vld [vmem:[#allocation48_spill] sm:$0xff] }
  0xc3   :  { %8884 = vst [vmem:[#allocation51_spill] sm:$0xff] %v4538_v57  ;;  %v4560_v2 = vmul.f32 %v8891_v38, %v4412_v26  ;;  %v8893_v43 = vrot.slane %v8892_v55, 1  ;;  %v8896_v58 = vrot.slane %v8895_v59, 1  ;;  %v4576_v61 = vmul.f32 %v8898_v23, %v4408_v51 }
  0xc4   :  { %8887 = vst [vmem:[#allocation52_spill] sm:$0xff] %v4545_v42  ;;  %v4580_v7 = vmul.f32 %v8898_v23, %v4412_v26  ;;  %v614_v49 = vadd.f32 %v603_v34, %v484_v50  ;;  %v615_v28 = vadd.f32 %v606_v29, %v485_v1  ;;  %v4586_v8 = vmul.f32 %v8899_v39, %v4408_v51  ;;  %v8906_v1 = vld [vmem:[#allocation46_spill] sm:$0xff] }
  0xc5   :  { %8890 = vst [vmem:[#allocation18_spill] sm:$0xff] %v4550_v9  ;;  %v4567_v27 = vsel %vm141_vm0, %v8893_v43, %v603_v34  ;;  %v4572_v21 = vsel %vm141_vm0, %v8896_v58, %v606_v29  ;;  %v4590_v17 = vmul.f32 %v8899_v39, %v4412_v26  ;;  %v8901_v60 = vrot.slane %v8900_v5, 1 }
  0xc6   :  { %8894 = vst [vmem:[#allocation19_spill] sm:$0xff] %v4567_v27  ;;  %v8904_v16 = vrot.slane %v8903_v19, 1  ;;  %v4606_v15 = vmul.f32 %v8906_v1, %v4408_v51  ;;  %v4610_v11 = vmul.f32 %v8906_v1, %v4412_v26  ;;  %v638_v12 = vadd.f32 %v627_v24, %v494_v52 }
  0xc7   :  { %8897 = vst [vmem:[#allocation20_spill] sm:$0xff] %v4572_v21  ;;  %v4597_v3 = vsel %vm141_vm0, %v8901_v60, %v627_v24  ;;  %v639_v45 = vadd.f32 %v630_v48, %v495_v10  ;;  %v8444_v34 = vrot.slane %v4556_v44, 2  ;;  %v8443_v29 = vrot.slane %v4560_v2, 2 }
  0xc8   :  { %8902 = vst [vmem:[#allocation21_spill] sm:$0xff] %v4597_v3  ;;  %v4602_v50 = vsel %vm141_vm0, %v8904_v16, %v630_v48  ;;  %v8442_v35 = vrot.slane %v4576_v61, 2  ;;  %v8441_v46 = vrot.slane %v4580_v7, 2  ;;  %v4625_v36 = vmul.f32 %v8910_v54, %v4408_v51 }
  0xc9   :  { %8905 = vst [vmem:[#allocation22_spill] sm:$0xff] %v4602_v50  ;;  %v4629_v52 = vmul.f32 %v8910_v54, %v4412_v26  ;;  %v8440_v10 = vrot.slane %v4586_v8, 2  ;;  %v8439_v20 = vrot.slane %v4590_v17, 2  ;;  %v4637_v24 = vmul.f32 %v8913_v0, %v4408_v51  ;;  %v791_v54 = vpop.permute.xlu1 %790  ;;  %v4777_v50 = vld [vmem:[#allocation7 + $0x30] sm:$0xff] }
  0xca   :  { %8907 = vst [vmem:[#allocation24_spill] sm:$0xff] %v4606_v15  ;;  %v4641_v48 = vmul.f32 %v8913_v0, %v4412_v26  ;;  %v4647_v38 = vadd.f32 %v8444_v34, %v518_v47  ;;  %v4651_v55 = vadd.f32 %v8443_v29, %v519_v4  ;;  %v8438_v43 = vrot.slane %v4606_v15, 2 }
  0xcb   :  { %8908 = vst [vmem:[#allocation25_spill] sm:$0xff] %v4610_v11  ;;  %v8437_v51 = vrot.slane %v4610_v11, 2  ;;  %v4659_v26 = vadd.f32 %v8442_v35, %v542_v40  ;;  %v4663_v47 = vadd.f32 %v8441_v46, %v543_v6  ;;  %v4667_v4 = vadd.f32 %v8440_v10, %v566_v41 }
  0xcc   :  { %8909 = vst [vmem:[#allocation26_spill] sm:$0xff] %v4614_v32  ;;  %v4671_v59 = vadd.f32 %v8439_v20, %v567_v37  ;;  %v4677_v40 = vadd.f32 %v8438_v43, %v590_v18  ;;  %v8436_v41 = vrot.slane %v4625_v36, 2  ;;  %v8435_v58 = vrot.slane %v4629_v52, 2  ;;  %v4783_v32 = vld [vmem:[#allocation7 + $0x38] sm:$0xff] }
  0xcd   :  { %8911 = vst [vmem:[#allocation27_spill] sm:$0xff] %v4625_v36  ;;  %v4681_v6 = vadd.f32 %v8437_v51, %v591_v62  ;;  %v8434_v37 = vrot.slane %v4637_v24, 2  ;;  %v8433_v23 = vrot.slane %v4641_v48, 2  ;;  %v4690_v18 = vstv %s4470_s11  ;;  %s5399_s11 = sld [smem:[#allocation2 + $0xf]] }
  0xce   :  { %8912 = vst [vmem:[#allocation28_spill] sm:$0xff] %v4629_v52  ;;  %v4693_v39 = vstv %s4476_s12  ;;  %v4699_v62 = vadd.f32 %v8436_v41, %v614_v49  ;;  %v4703_v5 = vadd.f32 %v8435_v58, %v615_v28  ;;  %v4706_v60 = vstv %s4482_s13  ;;  %s5413_s12 = sld [smem:[#allocation2 + $0x2a]] }
  0xcf   :  { %8914 = vst [vmem:[#allocation29_spill] sm:$0xff] %v4637_v24  ;;  %v4709_v19 = vstv %s4488_s14  ;;  %v4713_v16 = vadd.f32 %v8434_v37, %v638_v12  ;;  %v4717_v49 = vadd.f32 %v8433_v23, %v639_v45  ;;  %v4720_v1 = vstv %s4490_s15  ;;  %v787_v45 = vpop.permute.xlu2 %786  ;;  %s5480_s13 = sld [smem:[#allocation2 + $0x45]] }
  0xd0   :  { %8915 = vst [vmem:[#allocation30_spill] sm:$0xff] %v4641_v48  ;;  %v4723_v28 = vstv %s4496_s16  ;;  %v4728_v0 = vstv %s4508_s17  ;;  %v4731_v12 = vstv %s4514_s18  ;;  %v4737_v63 = vstv %s4528_s20  ;;  %s5497_s14 = sld [smem:[#allocation2 + $0x60]] }
  0xd1   :  { %8916 = vst [vmem:[#allocation39_spill] sm:$0xff] %v4690_v18  ;;  %v4740_v23 = vstv %s4540_s21  ;;  %v4743_v37 = vstv %s4552_s22  ;;  %v4746_v58 = vstv %s4631_s2  ;;  %v4749_v41 = vstv %s4643_s26  ;;  %s5502_s15 = sld [smem:[#allocation2 + $0x7b]] }
  0xd2   :  { %8917 = vst [vmem:[#allocation40_spill] sm:$0xff] %v4693_v39  ;;  %v4752_v51 = vstv %s4562_s23  ;;  %v4755_v43 = vstv %s4582_s24  ;;  %v4759_v20 = vsel %vm792_vm3, %v787_v45, %v791_v54  ;;  %v4763_v10 = vsel %vm792_vm3, %v791_v54, %v787_v45  ;;  %s5505_s16 = sld [smem:[#allocation2 + $0x96]] }
  0xd3   :  { %8918 = vst [vmem:[#allocation43_spill] sm:$0xff] %v4706_v60  ;;  %v4766_v46 = vstv %s4592_s0  ;;  %v4769_v35 = vstv %s4612_s25  ;;  %v4772_v29 = vstv %s4619_s1  ;;  %v4775_v34 = vstv %s4655_s27  ;;  %s5517_s17 = sld [smem:[#allocation2 + $0xa]] }
  0xd4   :  { %8919 = vst [vmem:[#allocation41_spill] sm:$0xff] %v4709_v19  ;;  %v4781_v3 = vmul.f32 %v4777_v50, %v4746_v58  ;;  %v4787_v54 = vmul.f32 %v4783_v32, %v4746_v58  ;;  %v4791_v45 = vmul.f32 %v4777_v50, %v4749_v41  ;;  %v4797_v21 = vstv %s4685_s29  ;;  %s5535_s18 = sld [smem:[#allocation2 + $0x25]] }
  0xd5   :  { %8920 = vst [vmem:[#allocation57_spill] sm:$0xff] %v4720_v1  ;;  %v4800_v27 = vstv %s4695_s30  ;;  %v801_v9 = vmul.f32 %v4690_v18, %v4759_v20  ;;  %v802_v42 = vmul.f32 %v4690_v18, %v4763_v10  ;;  %v812_v13 = vmul.f32 %v4693_v39, %v4763_v10  ;;  %s5571_s20 = sld [smem:[#allocation2 + $0x5b]] }
  0xd6   :  { %8921 = vst [vmem:[#allocation44_spill] sm:$0xff] %v4723_v28  ;;  %v821_v48 = vmul.f32 %v4706_v60, %v4759_v20  ;;  %v822_v30 = vmul.f32 %v4706_v60, %v4763_v10  ;;  %v4816_v24 = vmul.f32 %v4783_v32, %v4749_v41  ;;  %v4820_v57 = vmul.f32 %v4777_v50, %v4794_v25  ;;  %s5585_s21 = sld [smem:[#allocation2 + $0x76]] }
  0xd7   :  { %8922 = vst [vmem:[#allocation45_spill] sm:$0xff] %v4728_v0  ;;  %v4824_v18 = vmul.f32 %v4783_v32, %v4794_v25  ;;  %v4827_v22 = vstv %s4725_s4  ;;  %v4835_v60 = vmul.f32 %v4783_v32, %v4797_v21  ;;  %v4843_v53 = vmul.f32 %v4783_v32, %v4800_v27  ;;  %s5591_s22 = sld [smem:[#allocation2 + $0x91]] }
  0xd8   :  { %8923 = vst [vmem:[#allocation42_spill] sm:$0xff] %v4731_v12  ;;  %v805_v25 = vadd.f32 %v801_v9, %v4647_v38  ;;  %v806_v31 = vadd.f32 %v802_v42, %v4651_v55  ;;  %v831_v56 = vmul.f32 %v4709_v19, %v4759_v20  ;;  %v832_v14 = vmul.f32 %v4709_v19, %v4763_v10  ;;  %s5601_s23 = sld [smem:[#allocation2 + $0xd]] }
  0xd9   :  { %8924 = vst [vmem:[#allocation58_spill] sm:$0xff] %v4734_v33  ;;  %v816_v52 = vadd.f32 %v812_v13, %v4663_v47  ;;  %v825_v36 = vadd.f32 %v821_v48, %v4667_v4  ;;  %v826_v11 = vadd.f32 %v822_v30, %v4671_v59  ;;  %v842_v42 = vmul.f32 %v4720_v1, %v4763_v10  ;;  %s5611_s24 = sld [smem:[#allocation2 + $0x28]] }
  0xda   :  { %8925 = vst [vmem:[#allocation46_spill] sm:$0xff] %v4737_v63  ;;  %v4861_v9 = vmul.f32 %v4728_v0, %v4759_v20  ;;  %v4865_v38 = vmul.f32 %v4728_v0, %v4763_v10  ;;  %v4869_v13 = vmul.f32 %v4731_v12, %v4759_v20  ;;  %v4873_v30 = vmul.f32 %v4731_v12, %v4763_v10  ;;  %s5621_s0 = sld [smem:[#allocation2 + $0x43]] }
  0xdb   :  { %8926 = vst [vmem:[#allocation47_spill] sm:$0xff] %v4740_v23  ;;  %v4877_v48 = vmul.f32 %v4734_v33, %v4759_v20  ;;  %v4881_v55 = vmul.f32 %v4734_v33, %v4763_v10  ;;  %v852_v47 = vmul.f32 %v4723_v28, %v4763_v10  ;;  %v4889_v4 = vmul.f32 %v4737_v63, %v4759_v20  ;;  %s5631_s25 = sld [smem:[#allocation2 + $0x5e]] }
  0xdc   :  { %8927 = vst [vmem:[#allocation48_spill] sm:$0xff] %v4743_v37  ;;  %v4893_v59 = vmul.f32 %v4737_v63, %v4763_v10  ;;  %v4899_v33 = vmul.f32 %v4740_v23, %v4759_v20  ;;  %v4903_v12 = vmul.f32 %v4740_v23, %v4763_v10  ;;  %v846_v19 = vadd.f32 %v842_v42, %v4703_v5  ;;  %s5635_s1 = sld [smem:[#allocation2 + $0x79]] }
  0xdd   :  { %8928 = vst [vmem:[#allocation67_spill] sm:$0xff] %v4746_v58  ;;  %v811_v58 = vmul.f32 %v4693_v39, %v4759_v20  ;;  %v4831_v39 = vmul.f32 %v4777_v50, %v4797_v21  ;;  %v8489_v0 = vrot.slane %v4861_v9, 1  ;;  %v8488_v63 = vrot.slane %v4865_v38, 1  ;;  %s5639_s2 = sld [smem:[#allocation2 + $0x94]] }
  0xde   :  { %8929 = vst [vmem:[#allocation68_spill] sm:$0xff] %v4749_v41  ;;  %v4839_v41 = vmul.f32 %v4777_v50, %v4800_v27  ;;  %v856_v23 = vadd.f32 %v852_v47, %v4717_v49  ;;  %v4937_v47 = vmul.f32 %v4752_v51, %v4763_v10  ;;  %v8945_v42 = vrot.slane %v4869_v13, 1  ;;  %s5643_s26 = sld [smem:[#allocation2 + $0x10]] }
  0xdf   :  { %8930 = vst [vmem:[#allocation69_spill] sm:$0xff] %v4752_v51  ;;  %v880_v49 = vadd.f32 %v8488_v63, %v806_v31  ;;  %v8947_v63 = vrot.slane %v4889_v4, 1  ;;  %s5647_s27 = sld [smem:[#allocation2 + $0x2b]] }
  0xe0   :  { %8931 = vst [vmem:[#allocation70_spill] sm:$0xff] %v4755_v43  ;;  %s5677_s29 = sld [smem:[#allocation2 + $0x61]] }
  0xe1   :  { %8932 = vst [vmem:[#allocation71_spill] sm:$0xff] %v4766_v46  ;;  %s5703_s30 = sld [smem:[#allocation2 + $0x7c]] }
  0xe2   :  { %8933 = vst [vmem:[#allocation72_spill] sm:$0xff] %v4769_v35  ;;  %s5717_s4 = sld [smem:[#allocation2 + $0x97]] }
  0xe3   :  { %8934 = vst [vmem:[#allocation73_spill] sm:$0xff] %v4772_v29 }
  0xe4   :  { %8935 = vst [vmem:[#allocation74_spill] sm:$0xff] %v4775_v34 }
  0xe5   :  { %8937 = vst [vmem:[#allocation76_spill] sm:$0xff] %v4797_v21  ;;  %v815_v21 = vadd.f32 %v811_v58, %v4659_v26  ;;  %v851_v26 = vmul.f32 %v4723_v28, %v4759_v20  ;;  %v835_v58 = vadd.f32 %v831_v56, %v4677_v40  ;;  %v4921_v56 = vmul.f32 %v4743_v37, %v4759_v20 }
  0xe6   :  { %8938 = vst [vmem:[#allocation77_spill] sm:$0xff] %v4800_v27  ;;  %v841_v27 = vmul.f32 %v4720_v1, %v4759_v20  ;;  %v836_v1 = vadd.f32 %v832_v14, %v4681_v6  ;;  %v8496_v14 = vrot.slane %v4873_v30, 1  ;;  %v8495_v6 = vrot.slane %v4881_v55, 1 }
  0xe7   :  { %8939 = vst [vmem:[#allocation78_spill] sm:$0xff] %v4827_v22  ;;  %v855_v15 = vadd.f32 %v851_v26, %v4713_v16  ;;  %v4925_v40 = vmul.f32 %v4743_v37, %v4763_v10  ;;  %v879_v16 = vadd.f32 %v8489_v0, %v805_v25  ;;  %v4933_v26 = vmul.f32 %v4752_v51, %v4759_v20 }
  0xe8   :  { %8940 = vst [vmem:[#allocation79_spill] sm:$0xff] %v4865_v38  ;;  %v845_v28 = vadd.f32 %v841_v27, %v4699_v62  ;;  %v903_v5 = vadd.f32 %v8945_v42, %v815_v21  ;;  %v904_v62 = vadd.f32 %v8496_v14, %v816_v52  ;;  %v8946_v27 = vrot.slane %v4877_v48, 1 }
  0xe9   :  { %8941 = vst [vmem:[#allocation80_spill] sm:$0xff] %v4889_v4  ;;  %v928_v31 = vadd.f32 %v8495_v6, %v826_v11  ;;  %v951_v0 = vadd.f32 %v8947_v63, %v835_v58  ;;  %v8948_v37 = vrot.slane %v4893_v59, 1  ;;  %v4953_v51 = vmul.f32 %v4755_v43, %v4759_v20 }
  0xea   :  { %8942 = vst [vmem:[#allocation81_spill] sm:$0xff] %v4893_v59  ;;  %v927_v25 = vadd.f32 %v8946_v27, %v825_v36  ;;  %v4957_v21 = vmul.f32 %v4755_v43, %v4763_v10  ;;  %v8949_v52 = vrot.slane %v4899_v33, 1  ;;  %v8950_v27 = vrot.slane %v4903_v12, 1 }
  0xeb   :  { %8943 = vst [vmem:[#allocation82_spill] sm:$0xff] %v4899_v33  ;;  %v952_v38 = vadd.f32 %v8948_v37, %v836_v1  ;;  %v8511_v42 = vrot.slane %v4921_v56, 1  ;;  %v4969_v58 = vmul.f32 %v4766_v46, %v4759_v20  ;;  %v4973_v6 = vmul.f32 %v4766_v46, %v4763_v10 }
  0xec   :  { %8944 = vst [vmem:[#allocation83_spill] sm:$0xff] %v4903_v12  ;;  %v975_v36 = vadd.f32 %v8949_v52, %v845_v28  ;;  %v976_v11 = vadd.f32 %v8950_v27, %v846_v19  ;;  %v4977_v28 = vmul.f32 %v4769_v35, %v4759_v20  ;;  %v4981_v19 = vmul.f32 %v4769_v35, %v4763_v10 }
  0xed   :  { %v4985_v52 = vmul.f32 %v4772_v29, %v4759_v20  ;;  %v4989_v27 = vmul.f32 %v4772_v29, %v4763_v10  ;;  %v4995_v37 = vmul.f32 %v4775_v34, %v4759_v20  ;;  %v4999_v63 = vmul.f32 %v4775_v34, %v4763_v10 }
  0xee   :  { %v999_v35 = vadd.f32 %v8511_v42, %v855_v15  ;;  %v8951_v46 = vrot.slane %v4925_v40, 1  ;;  %v8952_v29 = vrot.slane %v4933_v26, 2  ;;  %v8953_v14 = vrot.slane %v4937_v47, 2 }
  0xef   :  { %v8954_v43 = vrot.slane %v4953_v51, 2  ;;  %v8955_v59 = vrot.slane %v4957_v21, 2  ;;  %v8517_v10 = vrot.slane %v4969_v58, 2  ;;  %v8512_v34 = vrot.slane %v4973_v6, 2 }
  0xf0   :  { %v1000_v12 = vadd.f32 %v8951_v46, %v856_v23  ;;  %v1023_v33 = vadd.f32 %v8952_v29, %v879_v16  ;;  %v1024_v1 = vadd.f32 %v8953_v14, %v880_v49  ;;  %v8516_v15 = vrot.slane %v4977_v28, 2 }
  0xf1   :  { %v1047_v20 = vadd.f32 %v8954_v43, %v903_v5  ;;  %v1048_v4 = vadd.f32 %v8955_v59, %v904_v62  ;;  %v8515_v46 = vrot.slane %v4981_v19, 2  ;;  %v8514_v23 = vrot.slane %v4985_v52, 2 }
  0xf2   :  { %v8513_v29 = vrot.slane %v4989_v27, 2  ;;  %v1071_v14 = vadd.f32 %v8517_v10, %v927_v25  ;;  %v1072_v43 = vadd.f32 %v8512_v34, %v928_v31  ;;  %v8521_v59 = vrot.slane %v4995_v37, 2  ;;  %v8962_v10 = vld [vmem:[#allocation60_spill] sm:$0xff] }
  0xf3   :  { %v8520_v62 = vrot.slane %v4999_v63, 2  ;;  %v1095_v5 = vadd.f32 %v8516_v15, %v951_v0  ;;  %v1096_v16 = vadd.f32 %v8515_v46, %v952_v38  ;;  %v1119_v49 = vadd.f32 %v8514_v23, %v975_v36 }
  0xf4   :  { %v1120_v42 = vadd.f32 %v8513_v29, %v976_v11  ;;  %v1204_v25 = vmul.f32 %v4777_v50, %v4827_v22  ;;  %v1205_v31 = vmul.f32 %v4783_v32, %v4827_v22  ;;  %v1143_v34 = vadd.f32 %v8521_v59, %v999_v35  ;;  %v8959_v29 = vld [vmem:[#allocation59_spill] sm:$0xff] }
  0xf5   :  { %v1144_v0 = vadd.f32 %v8520_v62, %v1000_v12  ;;  %v5042_v38 = vadd.f32 %v4781_v3, %v1023_v33  ;;  %v5045_v36 = vadd.f32 %v4787_v54, %v1024_v1  ;;  %v8958_v11 = vrot.slane %v4556_v44, 2  ;;  %v9012_v62 = vld [vmem:[#allocation36_spill] sm:$0xff] }
  0xf6   :  { %v8960_v23 = vrot.slane %v8959_v29, 2  ;;  %v8961_v15 = vrot.slane %v4560_v2, 2  ;;  %v8963_v22 = vrot.slane %v8962_v10, 2  ;;  %v5058_v12 = vadd.f32 %v4791_v45, %v1047_v20  ;;  %v8984_v29 = vld [vmem:[#allocation64_spill] sm:$0xff] }
  0xf7   :  { %8956 = vst [vmem:[#allocation84_spill] sm:$0xff] %v5042_v38  ;;  %v5061_v33 = vadd.f32 %v4816_v24, %v1048_v4  ;;  %v5064_v3 = vadd.f32 %v4820_v57, %v1071_v14  ;;  %v5067_v44 = vadd.f32 %v4824_v18, %v1072_v43  ;;  %v5070_v54 = vadd.f32 %v4831_v39, %v1095_v5  ;;  %v8975_v18 = vld [vmem:[#allocation61_spill] sm:$0xff]  ;;  %v8986_v43 = vld [vmem:[#allocation24_spill] sm:$0xff] }
  0xf8   :  { %8957 = vst [vmem:[#allocation85_spill] sm:$0xff] %v5045_v36  ;;  %v652_v46 = vsel %vm286_vm1, %v8960_v23, %v8958_v11  ;;  %v655_v35 = vsel %vm286_vm1, %v8963_v22, %v8961_v15  ;;  %v5073_v2 = vadd.f32 %v4835_v60, %v1096_v16  ;;  %v5076_v22 = vadd.f32 %v4839_v41, %v1119_v49  ;;  %v8978_v60 = vld [vmem:[#allocation62_spill] sm:$0xff]  ;;  %v8988_v16 = vld [vmem:[#allocation65_spill] sm:$0xff]  ;;  %v9036_v36 = vld [vmem:[#allocation39_spill] sm:$0xff] }
  0xf9   :  { %8964 = vst [vmem:[#allocation59_spill] sm:$0xff] %v5058_v12  ;;  %v5079_v45 = vadd.f32 %v4843_v53, %v1120_v42  ;;  %v5081_v24 = vadd.f32 %v1204_v25, %v1143_v34  ;;  %v5083_v4 = vadd.f32 %v1205_v31, %v1144_v0  ;;  %v8974_v57 = vrot.slane %v4576_v61, 2  ;;  %v8981_v53 = vld [vmem:[#allocation63_spill] sm:$0xff]  ;;  %v8990_v25 = vld [vmem:[#allocation25_spill] sm:$0xff]  ;;  %v8992_v0 = vld [vmem:[#allocation66_spill] sm:$0xff] }
  0xfa   :  { %8965 = vst [vmem:[#allocation60_spill] sm:$0xff] %v5061_v33  ;;  %v8976_v1 = vrot.slane %v8975_v18, 2  ;;  %v8977_v20 = vrot.slane %v4580_v7, 2  ;;  %v8979_v10 = vrot.slane %v8978_v60, 2  ;;  %v8980_v15 = vrot.slane %v4586_v8, 2  ;;  %v8998_v60 = vld [vmem:[#allocation28_spill] sm:$0xff] }
  0xfb   :  { %8966 = vst [vmem:[#allocation86_spill] sm:$0xff] %v5064_v3  ;;  %v8982_v42 = vrot.slane %v8981_v53, 2  ;;  %v8983_v23 = vrot.slane %v4590_v17, 2  ;;  %v8985_v61 = vrot.slane %v8984_v29, 2  ;;  %v8987_v5 = vrot.slane %v8986_v43, 2  ;;  %v9002_v29 = vld [vmem:[#allocation23_spill] sm:$0xff] }
  0xfc   :  { %8967 = vst [vmem:[#allocation87_spill] sm:$0xff] %v5067_v44  ;;  %v676_v39 = vsel %vm286_vm1, %v8976_v1, %v8974_v57  ;;  %v679_v41 = vsel %vm286_vm1, %v8979_v10, %v8977_v20  ;;  %v8989_v7 = vrot.slane %v8988_v16, 2  ;;  %v8991_v31 = vrot.slane %v8990_v25, 2  ;;  %v8994_v57 = vld [vmem:[#allocation27_spill] sm:$0xff]  ;;  %v8996_v1 = vld [vmem:[#allocation12_spill] sm:$0xff]  ;;  %v9006_v25 = vld [vmem:[#allocation33_spill] sm:$0xff] }
  0xfd   :  { %8968 = vst [vmem:[#allocation88_spill] sm:$0xff] %v5070_v54  ;;  %v700_v34 = vsel %vm286_vm1, %v8982_v42, %v8980_v15  ;;  %v703_v14 = vsel %vm286_vm1, %v8985_v61, %v8983_v23  ;;  %v8993_v8 = vrot.slane %v8992_v0, 2  ;;  %v8995_v18 = vrot.slane %v8994_v57, 2  ;;  %v9000_v15 = vld [vmem:[#allocation13_spill] sm:$0xff]  ;;  %v789_v23 = vpop.permute.xlu0 %788  ;;  %v9003_v61 = vld [vmem:[#allocation15_spill] sm:$0xff]  ;;  %v9005_v16 = vld [vmem:[#allocation16_spill] sm:$0xff] }
  0xfe   :  { %8969 = vst [vmem:[#allocation89_spill] sm:$0xff] %v5073_v2  ;;  %v724_v49 = vsel %vm286_vm1, %v8989_v7, %v8987_v5  ;;  %v8997_v17 = vrot.slane %v8996_v1, 2  ;;  %v8999_v10 = vrot.slane %v8998_v60, 2  ;;  %v9001_v53 = vrot.slane %v9000_v15, 2  ;;  %v9004_v5 = vld [vmem:[#allocation32_spill] sm:$0xff]  ;;  %v9009_v57 = vld [vmem:[#allocation49_spill] sm:$0xff] }
  0xff   :  { %8970 = vst [vmem:[#allocation90_spill] sm:$0xff] %v5076_v22  ;;  %v727_v11 = vsel %vm286_vm1, %v8993_v8, %v8991_v31  ;;  %v516_v43 = vadd.f32 %v9003_v61, %v9002_v29  ;;  %v517_v7 = vadd.f32 %v9005_v16, %v9004_v5  ;;  %v9007_v31 = vld [vmem:[#allocation17_spill] sm:$0xff]  ;;  %v9008_v8 = vld [vmem:[#allocation34_spill] sm:$0xff]  ;;  %v9013_v15 = vld [vmem:[#allocation51_spill] sm:$0xff] }
 0x100   :  { %8971 = vst [vmem:[#allocation91_spill] sm:$0xff] %v5079_v45  ;;  %v748_v20 = vsel %vm286_vm1, %v8997_v17, %v8995_v18  ;;  %v751_v42 = vsel %vm286_vm1, %v9001_v53, %v8999_v10  ;;  %v540_v0 = vadd.f32 %v9007_v31, %v9006_v25  ;;  %v541_v1 = vadd.f32 %v9009_v57, %v9008_v8  ;;  %v9010_v18 = vld [vmem:[#allocation35_spill] sm:$0xff]  ;;  %v9011_v17 = vld [vmem:[#allocation50_spill] sm:$0xff]  ;;  %v9014_v10 = vld [vmem:[#allocation29_spill] sm:$0xff] }
 0x101   :  { %8972 = vst [vmem:[#allocation92_spill] sm:$0xff] %v5081_v24  ;;  %v564_v60 = vadd.f32 %v9011_v17, %v9010_v18  ;;  %v565_v59 = vadd.f32 %v9013_v15, %v9012_v62  ;;  %v9015_v53 = vrot.slane %v9014_v10, 2  ;;  %v9018_v61 = vld [vmem:[#allocation30_spill] sm:$0xff]  ;;  %v9022_v31 = vld [vmem:[#allocation37_spill] sm:$0xff]  ;;  %v9023_v8 = vld [vmem:[#allocation52_spill] sm:$0xff] }
 0x102   :  { %8973 = vst [vmem:[#allocation93_spill] sm:$0xff] %v5083_v4  ;;  %v9016_v4 = vld [vmem:[#allocation11_spill] sm:$0xff]  ;;  %v9019_v5 = vrot.slane %v9018_v61, 2  ;;  %v9020_v16 = vld [vmem:[#allocation14_spill] sm:$0xff]  ;;  %v588_v57 = vadd.f32 %v9023_v8, %v9022_v31  ;;  %v9024_v22 = vld [vmem:[#allocation53_spill] sm:$0xff] }
 0x103   :  { %v9017_v24 = vrot.slane %v9016_v4, 2  ;;  %v9021_v45 = vrot.slane %v9020_v16, 2  ;;  %v9025_v18 = vld [vmem:[#allocation18_spill] sm:$0xff]  ;;  %v9027_v62 = vld [vmem:[#allocation19_spill] sm:$0xff]  ;;  %v9029_v54 = vld [vmem:[#allocation20_spill] sm:$0xff]  ;;  %v709_v3 = vadd.f32 %v703_v14, %v565_v59 }
 0x104   :  { %v589_v17 = vadd.f32 %v9025_v18, %v9024_v22  ;;  %v9026_v2 = vld [vmem:[#allocation38_spill] sm:$0xff]  ;;  %v9032_v61 = vld [vmem:[#allocation55_spill] sm:$0xff]  ;;  %v9034_v22 = vld [vmem:[#allocation56_spill] sm:$0xff]  ;;  %v661_v18 = vadd.f32 %v655_v35, %v517_v7  ;;  %v732_v33 = vadd.f32 %v724_v49, %v588_v57 }
 0x105   :  { %v772_v29 = vsel %vm286_vm1, %v9017_v24, %v9015_v53  ;;  %v775_v25 = vsel %vm286_vm1, %v9021_v45, %v9019_v5  ;;  %v612_v15 = vadd.f32 %v9027_v62, %v9026_v2  ;;  %v9028_v10 = vld [vmem:[#allocation54_spill] sm:$0xff]  ;;  %v9033_v5 = vld [vmem:[#allocation21_spill] sm:$0xff]  ;;  %v660_v2 = vadd.f32 %v652_v46, %v516_v43 }
 0x106   :  { %v613_v4 = vadd.f32 %v9029_v54, %v9028_v10  ;;  %v9030_v44 = vld [vmem:[#allocation26_spill] sm:$0xff]  ;;  %v636_v16 = vadd.f32 %v9033_v5, %v9032_v61  ;;  %v684_v62 = vadd.f32 %v676_v39, %v540_v0  ;;  %v685_v54 = vadd.f32 %v679_v41, %v541_v1  ;;  %v9038_v46 = vld [vmem:[#allocation45_spill] sm:$0xff] }
 0x107   :  { %v5158_v53 = vsel %vm792_vm3, %v9030_v44, %v789_v23  ;;  %v5163_v45 = vsel %vm792_vm3, %v789_v23, %v9030_v44  ;;  %v9035_v31 = vld [vmem:[#allocation22_spill] sm:$0xff]  ;;  %v708_v10 = vadd.f32 %v700_v34, %v564_v60  ;;  %v733_v12 = vadd.f32 %v727_v11, %v589_v17  ;;  %v9037_v23 = vld [vmem:[#allocation40_spill] sm:$0xff]  ;;  %v9039_v34 = vld [vmem:[#allocation43_spill] sm:$0xff] }
 0x108   :  { %v637_v8 = vadd.f32 %v9035_v31, %v9034_v22  ;;  %v799_v38 = vmul.f32 %v9036_v36, %v5158_v53  ;;  %v800_v44 = vmul.f32 %v9036_v36, %v5163_v45  ;;  %v809_v61 = vmul.f32 %v9037_v23, %v5158_v53  ;;  %v9040_v43 = vld [vmem:[#allocation41_spill] sm:$0xff]  ;;  %v9041_v57 = vld [vmem:[#allocation42_spill] sm:$0xff] }
 0x109   :  { %v810_v5 = vmul.f32 %v9037_v23, %v5163_v45  ;;  %v859_v35 = vmul.f32 %v9038_v46, %v5158_v53  ;;  %v860_v59 = vmul.f32 %v9038_v46, %v5163_v45  ;;  %v756_v39 = vadd.f32 %v748_v20, %v612_v15 }
 0x10a   :  { %v757_v41 = vadd.f32 %v751_v42, %v613_v4  ;;  %v819_v14 = vmul.f32 %v9039_v34, %v5158_v53  ;;  %v820_v36 = vmul.f32 %v9039_v34, %v5163_v45  ;;  %v780_v49 = vadd.f32 %v772_v29, %v636_v16  ;;  %v9042_v16 = vld [vmem:[#allocation58_spill] sm:$0xff] }
 0x10b   :  { %v781_v11 = vadd.f32 %v775_v25, %v637_v8  ;;  %v829_v7 = vmul.f32 %v9040_v43, %v5158_v53  ;;  %v830_v0 = vmul.f32 %v9040_v43, %v5163_v45  ;;  %v803_v1 = vadd.f32 %v799_v38, %v660_v2 }
 0x10c   :  { %v804_v60 = vadd.f32 %v800_v44, %v661_v18  ;;  %v883_v20 = vmul.f32 %v9041_v57, %v5158_v53  ;;  %v884_v42 = vmul.f32 %v9041_v57, %v5163_v45  ;;  %v813_v17 = vadd.f32 %v809_v61, %v684_v62  ;;  %v9043_v18 = vld [vmem:[#allocation57_spill] sm:$0xff]  ;;  %v9044_v61 = vld [vmem:[#allocation46_spill] sm:$0xff] }
 0x10d   :  { %v814_v15 = vadd.f32 %v810_v5, %v685_v54  ;;  %v867_v4 = vrot.slane %v859_v35, 1  ;;  %v870_v22 = vrot.slane %v860_v59, 1  ;;  %v823_v29 = vadd.f32 %v819_v14, %v708_v10  ;;  %v9045_v5 = vld [vmem:[#allocation44_spill] sm:$0xff]  ;;  %v9047_v59 = vld [vmem:[#allocation79_spill] sm:$0xff] }
 0x10e   :  { %v824_v25 = vadd.f32 %v820_v36, %v709_v3  ;;  %v907_v31 = vmul.f32 %v9042_v16, %v5158_v53  ;;  %v908_v8 = vmul.f32 %v9042_v16, %v5163_v45  ;;  %v833_v38 = vadd.f32 %v829_v7, %v732_v33  ;;  %v9049_v7 = vld [vmem:[#allocation47_spill] sm:$0xff]  ;;  %v9050_v16 = vld [vmem:[#allocation48_spill] sm:$0xff] }
 0x10f   :  { %v834_v2 = vadd.f32 %v830_v0, %v733_v12  ;;  %v839_v44 = vmul.f32 %v9043_v18, %v5158_v53  ;;  %v840_v23 = vmul.f32 %v9043_v18, %v5163_v45  ;;  %v891_v62 = vrot.slane %v883_v20, 1 }
 0x110   :  { %v894_v54 = vrot.slane %v884_v42, 1  ;;  %v931_v10 = vmul.f32 %v9044_v61, %v5158_v53  ;;  %v932_v3 = vmul.f32 %v9044_v61, %v5163_v45  ;;  %v849_v46 = vmul.f32 %v9045_v5, %v5158_v53 }
 0x111   :  { %v850_v12 = vmul.f32 %v9045_v5, %v5163_v45  ;;  %v9046_v33 = vrot.slane %v4861_v9, 1  ;;  %v9048_v34 = vrot.slane %v9047_v59, 1  ;;  %v915_v36 = vrot.slane %v907_v31, 1 }
 0x112   :  { %v918_v43 = vrot.slane %v908_v8, 1  ;;  %v955_v0 = vmul.f32 %v9049_v7, %v5158_v53  ;;  %v956_v57 = vmul.f32 %v9049_v7, %v5163_v45  ;;  %v843_v20 = vadd.f32 %v839_v44, %v756_v39 }
 0x113   :  { %v869_v35 = vsel %vm141_vm0, %v867_v4, %v9046_v33  ;;  %v872_v14 = vsel %vm141_vm0, %v870_v22, %v9048_v34  ;;  %v844_v42 = vadd.f32 %v840_v23, %v757_v41  ;;  %v979_v18 = vmul.f32 %v9050_v16, %v5158_v53 }
 0x114   :  { %v980_v9 = vmul.f32 %v9050_v16, %v5163_v45  ;;  %v9051_v4 = vrot.slane %v4869_v13, 1  ;;  %v9052_v31 = vrot.slane %v4873_v30, 1  ;;  %v939_v61 = vrot.slane %v931_v10, 1  ;;  %v9055_v10 = vld [vmem:[#allocation80_spill] sm:$0xff] }
 0x115   :  { %v942_v5 = vrot.slane %v932_v3, 1  ;;  %v853_v33 = vadd.f32 %v849_v46, %v780_v49  ;;  %v854_v59 = vadd.f32 %v850_v12, %v781_v11  ;;  %v877_v39 = vadd.f32 %v869_v35, %v803_v1  ;;  %v9057_v11 = vld [vmem:[#allocation81_spill] sm:$0xff] }
 0x116   :  { %v893_v22 = vsel %vm141_vm0, %v891_v62, %v9051_v4  ;;  %v896_v8 = vsel %vm141_vm0, %v894_v54, %v9052_v31  ;;  %v878_v41 = vadd.f32 %v872_v14, %v804_v60  ;;  %v9053_v44 = vrot.slane %v4877_v48, 1  ;;  %v9059_v60 = vld [vmem:[#allocation69_spill] sm:$0xff] }
 0x117   :  { %v9054_v34 = vrot.slane %v4881_v55, 1  ;;  %v963_v7 = vrot.slane %v955_v0, 1  ;;  %v966_v62 = vrot.slane %v956_v57, 1  ;;  %v901_v16 = vadd.f32 %v893_v22, %v813_v17  ;;  %v9060_v17 = vld [vmem:[#allocation70_spill] sm:$0xff]  ;;  %v9063_v57 = vld [vmem:[#allocation83_spill] sm:$0xff] }
 0x118   :  { %v917_v23 = vsel %vm141_vm0, %v915_v36, %v9053_v44  ;;  %v902_v30 = vadd.f32 %v896_v8, %v814_v15  ;;  %v987_v4 = vrot.slane %v979_v18, 1  ;;  %v990_v54 = vrot.slane %v980_v9, 1  ;;  %v9061_v36 = vld [vmem:[#allocation82_spill] sm:$0xff]  ;;  %v9065_v22 = vld [vmem:[#allocation71_spill] sm:$0xff] }
 0x119   :  { %v920_v13 = vsel %vm141_vm0, %v918_v43, %v9054_v34  ;;  %v9056_v3 = vrot.slane %v9055_v10, 1  ;;  %v9058_v1 = vrot.slane %v9057_v11, 1  ;;  %v1003_v46 = vmul.f32 %v9059_v60, %v5158_v53 }
 0x11a   :  { %v1004_v55 = vmul.f32 %v9059_v60, %v5163_v45  ;;  %v925_v12 = vadd.f32 %v917_v23, %v823_v29  ;;  %v926_v35 = vadd.f32 %v920_v13, %v824_v25  ;;  %v1027_v15 = vmul.f32 %v9060_v17, %v5158_v53  ;;  %v9070_v60 = vld [vmem:[#allocation74_spill] sm:$0xff] }
 0x11b   :  { %v941_v49 = vsel %vm141_vm0, %v939_v61, %v9056_v3  ;;  %v944_v48 = vsel %vm141_vm0, %v942_v5, %v9058_v1  ;;  %v1028_v14 = vmul.f32 %v9060_v17, %v5163_v45  ;;  %v9062_v43 = vrot.slane %v9061_v36, 1 }
 0x11c   :  { %v9064_v18 = vrot.slane %v9063_v57, 1  ;;  %v1051_v31 = vmul.f32 %v9065_v22, %v5158_v53  ;;  %v1052_v29 = vmul.f32 %v9065_v22, %v5163_v45  ;;  %v949_v25 = vadd.f32 %v941_v49, %v833_v38 }
 0x11d   :  { %v965_v0 = vsel %vm141_vm0, %v963_v7, %v9062_v43  ;;  %v950_v8 = vadd.f32 %v944_v48, %v834_v2  ;;  %v9066_v61 = vrot.slane %v4921_v56, 1  ;;  %v9067_v44 = vrot.slane %v4925_v40, 1  ;;  %v9068_v7 = vld [vmem:[#allocation72_spill] sm:$0xff] }
 0x11e   :  { %v968_v9 = vsel %vm141_vm0, %v966_v62, %v9064_v18  ;;  %v1011_v34 = vrot.slane %v1003_v46, 2  ;;  %v1014_v13 = vrot.slane %v1004_v55, 2  ;;  %v1075_v62 = vmul.f32 %v9068_v7, %v5158_v53 }
 0x11f   :  { %v989_v5 = vsel %vm141_vm0, %v987_v4, %v9066_v61  ;;  %v992_v23 = vsel %vm141_vm0, %v990_v54, %v9067_v44  ;;  %v1076_v10 = vmul.f32 %v9068_v7, %v5163_v45  ;;  %v973_v3 = vadd.f32 %v965_v0, %v843_v20  ;;  %v9069_v54 = vld [vmem:[#allocation73_spill] sm:$0xff]  ;;  %v5325_v44 = vld [vmem:[#allocation7 + $0x20] sm:$0xff] }
 0x120   :  { %v974_v11 = vadd.f32 %v968_v9, %v844_v42  ;;  %v1035_v38 = vrot.slane %v1027_v15, 2  ;;  %v1038_v2 = vrot.slane %v1028_v14, 2  ;;  %v997_v56 = vadd.f32 %v989_v5, %v853_v33 }
 0x121   :  { %v998_v4 = vadd.f32 %v992_v23, %v854_v59  ;;  %v1059_v49 = vrot.slane %v1051_v31, 2  ;;  %v1062_v40 = vrot.slane %v1052_v29, 2  ;;  %v1099_v1 = vmul.f32 %v9069_v54, %v5158_v53  ;;  %v9079_v23 = vld [vmem:[#allocation67_spill] sm:$0xff] }
 0x122   :  { %v1100_v48 = vmul.f32 %v9069_v54, %v5163_v45  ;;  %v1123_v20 = vmul.f32 %v9070_v60, %v5158_v53  ;;  %v1124_v42 = vmul.f32 %v9070_v60, %v5163_v45  ;;  %v9071_v46 = vrot.slane %v4933_v26, 2 }
 0x123   :  { %v9072_v59 = vrot.slane %v4937_v47, 2  ;;  %v1083_v17 = vrot.slane %v1075_v62, 2  ;;  %v1086_v15 = vrot.slane %v1076_v10, 2  ;;  %v9073_v43 = vrot.slane %v4953_v51, 2 }
 0x124   :  { %v1013_v33 = vsel %vm286_vm1, %v1011_v34, %v9071_v46  ;;  %v9074_v45 = vrot.slane %v4957_v21, 2  ;;  %v9075_v47 = vrot.slane %v4969_v58, 2  ;;  %v1107_v51 = vrot.slane %v1099_v1, 2  ;;  %v5332_v34 = vld [vmem:[#allocation7 + $0x28] sm:$0xff] }
 0x125   :  { %v1016_v55 = vsel %vm286_vm1, %v1014_v13, %v9072_v59  ;;  %v5287_v14 = vadd.f32 %v1013_v33, %v877_v39  ;;  %v1037_v53 = vsel %vm286_vm1, %v1035_v38, %v9073_v43  ;;  %v9076_v39 = vrot.slane %v4973_v6, 2 }
 0x126   :  { %v5289_v36 = vadd.f32 %v1016_v55, %v878_v41  ;;  %v1040_v26 = vsel %vm286_vm1, %v1038_v2, %v9074_v45  ;;  %v5297_v0 = vadd.f32 %v1037_v53, %v901_v16  ;;  %v1061_v18 = vsel %vm286_vm1, %v1059_v49, %v9075_v47  ;;  %v9089_v55 = vld [vmem:[#allocation75_spill] sm:$0xff] }
 0x127   :  { %v5299_v57 = vadd.f32 %v1040_v26, %v902_v30  ;;  %v1064_v41 = vsel %vm286_vm1, %v1062_v40, %v9076_v39  ;;  %v1110_v9 = vrot.slane %v1100_v48, 2  ;;  %v1131_v21 = vrot.slane %v1123_v20, 2  ;;  %v9090_v39 = vld [vmem:[#allocation76_spill] sm:$0xff] }
 0x128   :  { %v1134_v22 = vrot.slane %v1124_v42, 2  ;;  %v5311_v16 = vadd.f32 %v1061_v18, %v925_v12  ;;  %v5313_v30 = vadd.f32 %v1064_v41, %v926_v35  ;;  %v9077_v58 = vrot.slane %v4977_v28, 2 }
 0x129   :  { %v9078_v31 = vrot.slane %v4981_v19, 2  ;;  %v5329_v12 = vmul.f32 %v5325_v44, %v9079_v23  ;;  %v1211_v35 = vstv %s5269_s5  ;;  %v5336_v28 = vmul.f32 %v5332_v34, %v9079_v23  ;;  %v9080_v19 = vld [vmem:[#allocation68_spill] sm:$0xff]  ;;  %v9094_v23 = vld [vmem:[#allocation78_spill] sm:$0xff]  ;;  %s5946_s5 = sld [smem:[#allocation2 + $0xb]] }
 0x12a   :  { %v1085_v6 = vsel %vm286_vm1, %v1083_v17, %v9077_v58  ;;  %v5340_v13 = vmul.f32 %v5325_v44, %v9080_v19  ;;  %v9081_v7 = vrot.slane %v4985_v52, 2  ;;  %v9082_v10 = vrot.slane %v4989_v27, 2 }
 0x12b   :  { %v1088_v29 = vsel %vm286_vm1, %v1086_v15, %v9078_v31  ;;  %v5321_v61 = vadd.f32 %v1085_v6, %v949_v25  ;;  %v5344_v25 = vmul.f32 %v5332_v34, %v9080_v19  ;;  %v9083_v2 = vrot.slane %v4995_v37, 2 }
 0x12c   :  { %v5323_v5 = vadd.f32 %v1088_v29, %v950_v8  ;;  %v1235_v8 = vstv %s5271_s6  ;;  %v1109_v62 = vsel %vm286_vm1, %v1107_v51, %v9081_v7  ;;  %v1112_v38 = vsel %vm286_vm1, %v1110_v9, %v9082_v10  ;;  %s5962_s6 = sld [smem:[#allocation2 + $0x26]] }
 0x12d   :  { %v1133_v49 = vsel %vm286_vm1, %v1131_v21, %v9083_v2  ;;  %v9084_v40 = vrot.slane %v4999_v63, 2  ;;  %v1212_v1 = vmul.f32 %v5325_v44, %v1211_v35  ;;  %v1213_v48 = vmul.f32 %v5332_v34, %v1211_v35 }
 0x12e   :  { %v5362_v52 = vmul.f32 %v4777_v50, %v1211_v35  ;;  %v5365_v27 = vmul.f32 %v4783_v32, %v1211_v35  ;;  %v1236_v37 = vmul.f32 %v5325_v44, %v1235_v8  ;;  %v1237_v60 = vmul.f32 %v5332_v34, %v1235_v8 }
 0x12f   :  { %v1136_v54 = vsel %vm286_vm1, %v1134_v22, %v9084_v40  ;;  %v5370_v63 = vmul.f32 %v4777_v50, %v1235_v8  ;;  %v5373_v20 = vmul.f32 %v4783_v32, %v1235_v8  ;;  %v5377_v42 = vadd.f32 %v1109_v62, %v973_v3  ;;  %v9091_v22 = vld [vmem:[#allocation77_spill] sm:$0xff] }
 0x130   :  { %9085 = vst [vmem:[#allocation61_spill] sm:$0xff] %v5362_v52  ;;  %v5379_v46 = vadd.f32 %v1112_v38, %v974_v11  ;;  %v5381_v33 = vadd.f32 %v1133_v49, %v997_v56  ;;  %v5383_v59 = vadd.f32 %v1136_v54, %v998_v4  ;;  %v5389_v17 = vmul.f32 %v5325_v44, %v9089_v55 }
 0x131   :  { %9086 = vst [vmem:[#allocation62_spill] sm:$0xff] %v5365_v27  ;;  %v5393_v15 = vmul.f32 %v5332_v34, %v9089_v55  ;;  %v1259_v43 = vstv %s5307_s7  ;;  %v1283_v53 = vstv %s5309_s8  ;;  %v1220_v3 = vrot.slane %v1212_v1, 1  ;;  %s6104_s7 = sld [smem:[#allocation2 + $0x41]] }
 0x132   :  { %9087 = vst [vmem:[#allocation63_spill] sm:$0xff] %v5370_v63  ;;  %v8525_v11 = vrot.slane %v5362_v52, 1  ;;  %v1223_v45 = vrot.slane %v1213_v48, 1  ;;  %v8524_v56 = vrot.slane %v5365_v27, 1  ;;  %v1244_v4 = vrot.slane %v1236_v37, 1  ;;  %s6116_s8 = sld [smem:[#allocation2 + $0x5c]] }
 0x133   :  { %9088 = vst [vmem:[#allocation64_spill] sm:$0xff] %v5373_v20  ;;  %v8523_v26 = vrot.slane %v5370_v63, 1  ;;  %v1247_v47 = vrot.slane %v1237_v60, 1  ;;  %v8522_v18 = vrot.slane %v5373_v20, 1  ;;  %v5405_v41 = vmul.f32 %v5325_v44, %v9090_v39 }
 0x134   :  { %v5409_v51 = vmul.f32 %v5332_v34, %v9090_v39  ;;  %v1260_v9 = vmul.f32 %v5325_v44, %v1259_v43  ;;  %v1261_v21 = vmul.f32 %v5332_v34, %v1259_v43  ;;  %v5417_v58 = vmul.f32 %v5325_v44, %v9091_v22 }
 0x135   :  { %v5421_v6 = vmul.f32 %v5332_v34, %v9091_v22  ;;  %v5424_v31 = vmul.f32 %v4777_v50, %v1259_v43  ;;  %v5427_v29 = vmul.f32 %v4783_v32, %v1259_v43  ;;  %v5431_v35 = vmul.f32 %v5325_v44, %v9094_v23 }
 0x136   :  { %v5435_v19 = vmul.f32 %v5332_v34, %v9094_v23  ;;  %v5440_v8 = vsel %vm141_vm0, %v1220_v3, %v8525_v11  ;;  %v1284_v7 = vmul.f32 %v5325_v44, %v1283_v53  ;;  %v5446_v62 = vsel %vm141_vm0, %v1223_v45, %v8524_v56 }
 0x137   :  { %9092 = vst [vmem:[#allocation24_spill] sm:$0xff] %v5424_v31  ;;  %v5451_v10 = vsel %vm141_vm0, %v1244_v4, %v8523_v26  ;;  %v5456_v38 = vsel %vm141_vm0, %v1247_v47, %v8522_v18  ;;  %v1307_v2 = vstv %s5375_s9  ;;  %v1268_v49 = vrot.slane %v1260_v9, 1  ;;  %s6128_s9 = sld [smem:[#allocation2 + $0x77]] }
 0x138   :  { %9093 = vst [vmem:[#allocation65_spill] sm:$0xff] %v5427_v29  ;;  %v1271_v40 = vrot.slane %v1261_v21, 1  ;;  %v1285_v54 = vmul.f32 %v5332_v34, %v1283_v53  ;;  %v1331_v1 = vstv %s5385_s10  ;;  %v5464_v60 = vmul.f32 %v4777_v50, %v1283_v53  ;;  %s6134_s10 = sld [smem:[#allocation2 + $0x92]] }
 0x139   :  { %v5467_v55 = vmul.f32 %v4783_v32, %v1283_v53  ;;  %v1292_v43 = vrot.slane %v1284_v7, 1  ;;  %v1308_v3 = vmul.f32 %v5325_v44, %v1307_v2  ;;  %v5471_v45 = vmul.f32 %v4777_v50, %v1307_v2 }
 0x13a   :  { %9095 = vst [vmem:[#allocation25_spill] sm:$0xff] %v5464_v60  ;;  %v1355_v4 = vstv %s5399_s11  ;;  %v1309_v47 = vmul.f32 %v5332_v34, %v1307_v2  ;;  %v5476_v39 = vmul.f32 %v4783_v32, %v1307_v2  ;;  %v1332_v9 = vmul.f32 %v5325_v44, %v1331_v1  ;;  %s6150_s11 = sld [smem:[#allocation2 + $0xe]] }
 0x13b   :  { %9096 = vst [vmem:[#allocation66_spill] sm:$0xff] %v5467_v55  ;;  %v1333_v21 = vmul.f32 %v5332_v34, %v1331_v1  ;;  %v1295_v53 = vrot.slane %v1285_v54, 1  ;;  %v5483_v22 = vmul.f32 %v4777_v50, %v1331_v1  ;;  %v5486_v23 = vmul.f32 %v4783_v32, %v1331_v1 }
 0x13c   :  { %9097 = vst [vmem:[#allocation27_spill] sm:$0xff] %v5471_v45  ;;  %v1379_v7 = vstv %s5413_s12  ;;  %v1356_v18 = vmul.f32 %v5325_v44, %v1355_v4  ;;  %v1357_v26 = vmul.f32 %v5332_v34, %v1355_v4  ;;  %v5492_v2 = vmul.f32 %v4777_v50, %v1355_v4  ;;  %s6156_s12 = sld [smem:[#allocation2 + $0x29]] }
 0x13d   :  { %9098 = vst [vmem:[#allocation12_spill] sm:$0xff] %v5476_v39  ;;  %v5495_v56 = vmul.f32 %v4783_v32, %v1355_v4  ;;  %v1316_v37 = vrot.slane %v1308_v3, 1  ;;  %v1319_v48 = vrot.slane %v1309_v47, 1  ;;  %v1340_v63 = vrot.slane %v1332_v9, 1 }
 0x13e   :  { %9099 = vst [vmem:[#allocation28_spill] sm:$0xff] %v5483_v22  ;;  %v1343_v27 = vrot.slane %v1333_v21, 1  ;;  %v5510_v54 = vmul.f32 %v5325_v44, %v1379_v7  ;;  %v5513_v3 = vmul.f32 %v5332_v34, %v1379_v7  ;;  %v1364_v1 = vrot.slane %v1356_v18, 2 }
 0x13f   :  { %9100 = vst [vmem:[#allocation13_spill] sm:$0xff] %v5486_v23  ;;  %v1367_v11 = vrot.slane %v1357_v26, 2  ;;  %v9103_v21 = vrot.slane %v5424_v31, 1  ;;  %v9104_v52 = vrot.slane %v5427_v29, 1  ;;  %v5530_v24 = vmul.f32 %v4777_v50, %v1379_v7 }
 0x140   :  { %9101 = vst [vmem:[#allocation23_spill] sm:$0xff] %v5492_v2  ;;  %v5533_v26 = vmul.f32 %v4783_v32, %v1379_v7  ;;  %v9106_v18 = vrot.slane %v5464_v60, 1  ;;  %v1403_v7 = vstv %s5480_s13  ;;  %v9109_v47 = vrot.slane %v5476_v39, 1  ;;  %s6172_s13 = sld [smem:[#allocation2 + $0x44]] }
 0x141   :  { %9102 = vst [vmem:[#allocation15_spill] sm:$0xff] %v5495_v56  ;;  %v5522_v4 = vsel %vm141_vm0, %v1268_v49, %v9103_v21  ;;  %v5527_v20 = vsel %vm141_vm0, %v1271_v40, %v9104_v52  ;;  %v9107_v49 = vrot.slane %v5467_v55, 1  ;;  %v9108_v52 = vrot.slane %v5471_v45, 1 }
 0x142   :  { %9105 = vst [vmem:[#allocation32_spill] sm:$0xff] %v5533_v26  ;;  %v5540_v9 = vsel %vm141_vm0, %v1292_v43, %v9106_v18  ;;  %v5558_v60 = vsel %vm141_vm0, %v1319_v48, %v9109_v47  ;;  %v9110_v43 = vrot.slane %v5483_v22, 1  ;;  %v9116_v47 = vrot.slane %v5495_v56, 2 }
 0x143   :  { %v5545_v21 = vsel %vm141_vm0, %v1295_v53, %v9107_v49  ;;  %v5550_v40 = vsel %vm141_vm0, %v1316_v37, %v9108_v52  ;;  %v9112_v53 = vrot.slane %v5486_v23, 1  ;;  %v1388_v37 = vrot.slane %v5510_v54, 2 }
 0x144   :  { %v5563_v18 = vsel %vm141_vm0, %v1340_v63, %v9110_v43  ;;  %v9114_v52 = vrot.slane %v5492_v2, 2  ;;  %v5581_v63 = vsel %vm286_vm1, %v1367_v11, %v9116_v47  ;;  %v1391_v43 = vrot.slane %v5513_v3, 2 }
 0x145   :  { %9111 = vst [vmem:[#allocation16_spill] sm:$0xff] %v5563_v18  ;;  %v5568_v49 = vsel %vm141_vm0, %v1343_v27, %v9112_v53  ;;  %v1427_v23 = vstv %s5497_s14  ;;  %v1404_v53 = vmul.f32 %v5325_v44, %v1403_v7  ;;  %v1451_v2 = vstv %s5502_s15  ;;  %s6174_s14 = sld [smem:[#allocation2 + $0x5f]] }
 0x146   :  { %9113 = vst [vmem:[#allocation33_spill] sm:$0xff] %v5568_v49  ;;  %v5576_v48 = vsel %vm286_vm1, %v1364_v1, %v9114_v52  ;;  %v1405_v1 = vmul.f32 %v5332_v34, %v1403_v7  ;;  %v5595_v52 = vmul.f32 %v4777_v50, %v1403_v7  ;;  %v5598_v11 = vmul.f32 %v4783_v32, %v1403_v7  ;;  %s6180_s15 = sld [smem:[#allocation2 + $0x7a]] }
 0x147   :  { %9115 = vst [vmem:[#allocation17_spill] sm:$0xff] %v5576_v48  ;;  %v1475_v3 = vstv %s5505_s16  ;;  %v1428_v47 = vmul.f32 %v5325_v44, %v1427_v23  ;;  %v1429_v54 = vmul.f32 %v5332_v34, %v1427_v23  ;;  %v5606_v27 = vmul.f32 %v4777_v50, %v1427_v23  ;;  %s6186_s16 = sld [smem:[#allocation2 + $0x95]] }
 0x148   :  { %9117 = vst [vmem:[#allocation34_spill] sm:$0xff] %v5581_v63  ;;  %v5609_v56 = vmul.f32 %v4783_v32, %v1427_v23  ;;  %v1452_v22 = vmul.f32 %v5325_v44, %v1451_v2  ;;  %v1453_v7 = vmul.f32 %v5332_v34, %v1451_v2  ;;  %v5616_v39 = vmul.f32 %v4777_v50, %v1451_v2 }
 0x149   :  { %9118 = vst [vmem:[#allocation49_spill] sm:$0xff] %v5595_v52  ;;  %v5619_v45 = vmul.f32 %v4783_v32, %v1451_v2  ;;  %v1476_v55 = vmul.f32 %v5325_v44, %v1475_v3  ;;  %v1477_v29 = vmul.f32 %v5332_v34, %v1475_v3  ;;  %v5626_v23 = vmul.f32 %v4777_v50, %v1475_v3 }
 0x14a   :  { %9119 = vst [vmem:[#allocation35_spill] sm:$0xff] %v5598_v11  ;;  %v5629_v31 = vmul.f32 %v4783_v32, %v1475_v3  ;;  %v1412_v63 = vrot.slane %v1404_v53, 2  ;;  %v8541_v48 = vrot.slane %v5595_v52, 2  ;;  %v1415_v49 = vrot.slane %v1405_v1, 2 }
 0x14b   :  { %9120 = vst [vmem:[#allocation50_spill] sm:$0xff] %v5606_v27  ;;  %v1436_v18 = vrot.slane %v1428_v47, 2  ;;  %v1439_v34 = vrot.slane %v1429_v54, 2  ;;  %v8542_v50 = vrot.slane %v5609_v56, 2  ;;  %v1460_v32 = vrot.slane %v1452_v22, 2 }
 0x14c   :  { %9121 = vst [vmem:[#allocation36_spill] sm:$0xff] %v5609_v56  ;;  %v1463_v53 = vrot.slane %v1453_v7, 2  ;;  %v1484_v2 = vrot.slane %v1476_v55, 2  ;;  %v8547_v47 = vrot.slane %v5626_v23, 2  ;;  %v1487_v44 = vrot.slane %v1477_v29, 2 }
 0x14d   :  { %9122 = vst [vmem:[#allocation51_spill] sm:$0xff] %v5616_v39  ;;  %v9126_v22 = vrot.slane %v5530_v24, 2  ;;  %v9127_v7 = vrot.slane %v5533_v26, 2  ;;  %v1414_v29 = vsel %vm286_vm1, %v1412_v63, %v8541_v48  ;;  %v9128_v55 = vrot.slane %v5598_v11, 2 }
 0x14e   :  { %9123 = vst [vmem:[#allocation29_spill] sm:$0xff] %v5619_v45  ;;  %v5675_v63 = vstv %s5535_s18  ;;  %v5686_v48 = vstv %s5553_s19  ;;  %v9132_v56 = vrot.slane %v5629_v31, 2  ;;  %v5701_v11 = vstv %s5591_s22  ;;  %s6202_s18 = sld [smem:[#allocation2 + $0x2c]] }
 0x14f   :  { %9124 = vst [vmem:[#allocation11_spill] sm:$0xff] %v5626_v23  ;;  %v5652_v3 = vsel %vm286_vm1, %v1388_v37, %v9126_v22  ;;  %v1393_v1 = vsel %vm286_vm1, %v1391_v43, %v9127_v7  ;;  %v1417_v54 = vsel %vm286_vm1, %v1415_v49, %v9128_v55  ;;  %v9129_v37 = vrot.slane %v5606_v27, 2  ;;  %s6208_s19 = sld [smem:[#allocation2 + $0x47]] }
 0x150   :  { %9125 = vst [vmem:[#allocation30_spill] sm:$0xff] %v5629_v31  ;;  %v1441_v43 = vsel %vm286_vm1, %v1439_v34, %v8542_v50  ;;  %v5672_v7 = vstv %s5517_s17  ;;  %v9130_v49 = vrot.slane %v5616_v39, 2  ;;  %v5689_v34 = vstv %s5571_s20  ;;  %s6192_s17 = sld [smem:[#allocation2 + $0x11]] }
 0x151   :  { %v1438_v22 = vsel %vm286_vm1, %v1436_v18, %v9129_v37  ;;  %v9131_v18 = vrot.slane %v5619_v45, 2  ;;  %v1486_v50 = vsel %vm286_vm1, %v1484_v2, %v8547_v47  ;;  %v1489_v27 = vsel %vm286_vm1, %v1487_v44, %v9132_v56  ;;  %s6216_s20 = sld [smem:[#allocation2 + $0x62]] }
 0x152   :  { %v1462_v55 = vsel %vm286_vm1, %v1460_v32, %v9130_v49  ;;  %v5698_v39 = vstv %s5585_s21  ;;  %v5706_v32 = vstv %s5601_s23  ;;  %v5712_v49 = vstv %s5621_s0  ;;  %s6238_s21 = sld [smem:[#allocation2 + $0x7d]] }
 0x153   :  { %v1465_v37 = vsel %vm286_vm1, %v1463_v53, %v9131_v18  ;;  %v5709_v53 = vstv %s5611_s24  ;;  %v5715_v18 = vstv %s5631_s25  ;;  %v5720_v2 = vstv %s5635_s1  ;;  %s6252_s22 = sld [smem:[#allocation2 + $0x98]] }
 0x154   :  { %v5723_v56 = vstv %s5639_s2  ;;  %v1156_v44 = vadd.f32 %v5329_v12, %v5287_v14  ;;  %v1157_v47 = vadd.f32 %v5336_v28, %v5289_v36  ;;  %v1166_v31 = vadd.f32 %v5340_v13, %v5297_v0  ;;  %s6290_s23 = sld [smem:[#allocation2 + $0x12]] }
 0x155   :  { %v1167_v23 = vadd.f32 %v5344_v25, %v5299_v57  ;;  %v1176_v45 = vadd.f32 %v5389_v17, %v5311_v16  ;;  %v1177_v52 = vadd.f32 %v5393_v15, %v5313_v30  ;;  %v1186_v26 = vadd.f32 %v5405_v41, %v5321_v61  ;;  %v1503_v25 = vpop.permute.xlu1 %1502  ;;  %s6302_s24 = sld [smem:[#allocation2 + $0x2d]] }
 0x156   :  { %v1187_v14 = vadd.f32 %v5409_v51, %v5323_v5  ;;  %v1196_v36 = vadd.f32 %v5417_v58, %v5377_v42  ;;  %v1197_v0 = vadd.f32 %v5421_v6, %v5379_v46  ;;  %v5746_v12 = vstv %s5643_s26  ;;  %v1499_v58 = vpop.permute.xlu2 %1498  ;;  %s6442_s0 = sld [smem:[#allocation2 + $0x48]] }
 0x157   :  { %v5749_v57 = vstv %s5647_s27  ;;  %v1206_v16 = vadd.f32 %v5431_v35, %v5381_v33  ;;  %v1207_v30 = vadd.f32 %v5435_v19, %v5383_v59  ;;  %v5756_v61 = vstv %s5663_s28  ;;  %s6460_s25 = sld [smem:[#allocation2 + $0x63]] }
 0x158   :  { %v5759_v5 = vstv %s5677_s29  ;;  %v1230_v28 = vadd.f32 %v5440_v8, %v1156_v44  ;;  %v1231_v13 = vadd.f32 %v5446_v62, %v1157_v47  ;;  %v1254_v42 = vadd.f32 %v5451_v10, %v1166_v31  ;;  %v9134_v31 = vld [vmem:[#allocation16_spill] sm:$0xff]  ;;  %v9135_v8 = vld [vmem:[#allocation33_spill] sm:$0xff]  ;;  %s6472_s1 = sld [smem:[#allocation2 + $0x7e]] }
 0x159   :  { %v1255_v46 = vadd.f32 %v5456_v38, %v1167_v23  ;;  %v1278_v33 = vadd.f32 %v5522_v4, %v1176_v45  ;;  %v1279_v17 = vadd.f32 %v5527_v20, %v1177_v52  ;;  %v1302_v59 = vadd.f32 %v5540_v9, %v1186_v26  ;;  %v9136_v10 = vld [vmem:[#allocation17_spill] sm:$0xff]  ;;  %v9137_v20 = vld [vmem:[#allocation34_spill] sm:$0xff]  ;;  %s6484_s2 = sld [smem:[#allocation2 + $0x99]] }
 0x15a   :  { %v1303_v15 = vadd.f32 %v5545_v21, %v1187_v14  ;;  %v1326_v41 = vadd.f32 %v5550_v40, %v1196_v36  ;;  %v1327_v51 = vadd.f32 %v5558_v60, %v1197_v0  ;;  %v5772_v6 = vstv %s5703_s30  ;;  %s6750_s26 = sld [smem:[#allocation2 + $0x15]] }
 0x15b   :  { %v5775_v35 = vstv %s5717_s4  ;;  %v1350_v19 = vadd.f32 %v9134_v31, %v1206_v16  ;;  %v1351_v62 = vadd.f32 %v9135_v8, %v1207_v30  ;;  %v1374_v38 = vadd.f32 %v9136_v10, %v1230_v28  ;;  %s6758_s27 = sld [smem:[#allocation2 + $0x30]] }
 0x15c   :  { %9133 = vst [vmem:[#allocation14_spill] sm:$0xff] %v5775_v35  ;;  %v1375_v45 = vadd.f32 %v9137_v20, %v1231_v13  ;;  %v5783_v9 = vsel %vm431_vm2, %v1499_v58, %v1503_v25  ;;  %v5787_v60 = vsel %vm431_vm2, %v1503_v25, %v1499_v58  ;;  %v1398_v26 = vadd.f32 %v5652_v3, %v1254_v42  ;;  %s6764_s28 = sld [smem:[#allocation2 + $0x4b]] }
 0x15d   :  { %v1399_v21 = vadd.f32 %v1393_v1, %v1255_v46  ;;  %v1422_v40 = vadd.f32 %v1414_v29, %v1278_v33  ;;  %v1423_v52 = vadd.f32 %v1417_v54, %v1279_v17  ;;  %v1446_v23 = vadd.f32 %v1438_v22, %v1302_v59  ;;  %s6773_s29 = sld [smem:[#allocation2 + $0x66]] }
 0x15e   :  { %v1447_v47 = vadd.f32 %v1441_v43, %v1303_v15  ;;  %v1470_v44 = vadd.f32 %v1462_v55, %v1326_v41  ;;  %v1471_v14 = vadd.f32 %v1465_v37, %v1327_v51  ;;  %v1494_v36 = vadd.f32 %v1486_v50, %v1350_v19  ;;  %s6782_s30 = sld [smem:[#allocation2 + $0x81]] }
 0x15f   :  { %v1495_v0 = vadd.f32 %v1489_v27, %v1351_v62  ;;  %v1512_v16 = vmul.f32 %v5672_v7, %v5783_v9  ;;  %v1513_v30 = vmul.f32 %v5672_v7, %v5787_v60  ;;  %v1522_v28 = vmul.f32 %v5675_v63, %v5783_v9  ;;  %s6789_s4 = sld [smem:[#allocation2 + $0x9c]] }
 0x160   :  { %v1523_v3 = vmul.f32 %v5675_v63, %v5787_v60  ;;  %v1532_v1 = vmul.f32 %v5686_v48, %v5783_v9  ;;  %v1533_v54 = vmul.f32 %v5686_v48, %v5787_v60  ;;  %v1542_v29 = vmul.f32 %v5689_v34, %v5783_v9 }
 0x161   :  { %v5802_v50 = vadd.f32 %v1512_v16, %v1374_v38  ;;  %v5804_v27 = vadd.f32 %v1513_v30, %v1375_v45  ;;  %v1543_v22 = vmul.f32 %v5689_v34, %v5787_v60  ;;  %v5810_v43 = vadd.f32 %v1522_v28, %v1398_v26 }
 0x162   :  { %v5812_v55 = vadd.f32 %v1523_v3, %v1399_v21  ;;  %v5814_v37 = vadd.f32 %v1532_v1, %v1422_v40  ;;  %v5816_v13 = vadd.f32 %v1533_v54, %v1423_v52  ;;  %v5820_v25 = vmul.f32 %v5706_v32, %v5783_v9 }
 0x163   :  { %9139 = vst [vmem:[#allocation37_spill] sm:$0xff] %v5802_v50  ;;  %v5824_v42 = vmul.f32 %v5706_v32, %v5787_v60  ;;  %v5828_v46 = vmul.f32 %v5709_v53, %v5783_v9  ;;  %v5832_v33 = vmul.f32 %v5709_v53, %v5787_v60  ;;  %v1552_v17 = vmul.f32 %v5698_v39, %v5783_v9  ;;  %v9179_v50 = vld [vmem:[#allocation65_spill] sm:$0xff] }
 0x164   :  { %9140 = vst [vmem:[#allocation52_spill] sm:$0xff] %v5804_v27  ;;  %v1553_v59 = vmul.f32 %v5698_v39, %v5787_v60  ;;  %v1562_v15 = vmul.f32 %v5701_v11, %v5783_v9  ;;  %v1563_v41 = vmul.f32 %v5701_v11, %v5787_v60  ;;  %v5842_v51 = vadd.f32 %v1542_v29, %v1446_v23  ;;  %v9176_v27 = vld [vmem:[#allocation24_spill] sm:$0xff] }
 0x165   :  { %9141 = vst [vmem:[#allocation53_spill] sm:$0xff] %v5810_v43  ;;  %v5844_v58 = vadd.f32 %v1543_v22, %v1447_v47  ;;  %v5848_v31 = vmul.f32 %v5712_v49, %v5783_v9  ;;  %v5852_v19 = vmul.f32 %v5712_v49, %v5787_v60  ;;  %v5854_v8 = vadd.f32 %v1552_v17, %v1470_v44  ;;  %v9167_v44 = vld [vmem:[#allocation62_spill] sm:$0xff] }
 0x166   :  { %9142 = vst [vmem:[#allocation18_spill] sm:$0xff] %v5812_v55  ;;  %v5856_v62 = vadd.f32 %v1553_v59, %v1471_v14  ;;  %v5858_v10 = vadd.f32 %v1562_v15, %v1494_v36  ;;  %v5860_v38 = vadd.f32 %v1563_v41, %v1495_v0  ;;  %v5868_v40 = vmul.f32 %v5715_v18, %v5783_v9  ;;  %v9163_v15 = vld [vmem:[#allocation84_spill] sm:$0xff]  ;;  %v9164_v41 = vld [vmem:[#allocation61_spill] sm:$0xff] }
 0x167   :  { %9143 = vst [vmem:[#allocation38_spill] sm:$0xff] %v5814_v37  ;;  %v5872_v52 = vmul.f32 %v5715_v18, %v5787_v60  ;;  %v5876_v23 = vmul.f32 %v5720_v2, %v5783_v9  ;;  %v5880_v47 = vmul.f32 %v5720_v2, %v5787_v60  ;;  %v5886_v36 = vmul.f32 %v5723_v56, %v5783_v9  ;;  %v9173_v37 = vld [vmem:[#allocation64_spill] sm:$0xff] }
 0x168   :  { %9144 = vst [vmem:[#allocation19_spill] sm:$0xff] %v5816_v13  ;;  %v5890_v0 = vmul.f32 %v5723_v56, %v5787_v60  ;;  %v5894_v16 = vmul.f32 %v5746_v12, %v5783_v9  ;;  %v5898_v30 = vmul.f32 %v5746_v12, %v5787_v60  ;;  %v5902_v28 = vmul.f32 %v5749_v57, %v5783_v9 }
 0x169   :  { %9145 = vst [vmem:[#allocation54_spill] sm:$0xff] %v5842_v51  ;;  %v5906_v3 = vmul.f32 %v5749_v57, %v5787_v60  ;;  %v5910_v1 = vmul.f32 %v5756_v61, %v5783_v9  ;;  %v5914_v54 = vmul.f32 %v5756_v61, %v5787_v60  ;;  %v5918_v29 = vmul.f32 %v5759_v5, %v5783_v9 }
 0x16a   :  { %9146 = vst [vmem:[#allocation20_spill] sm:$0xff] %v5844_v58  ;;  %v5922_v22 = vmul.f32 %v5759_v5, %v5787_v60  ;;  %v5932_v21 = vmul.f32 %v5772_v6, %v5783_v9  ;;  %v5936_v26 = vmul.f32 %v5772_v6, %v5787_v60  ;;  %v5954_v59 = vmul.f32 %v5775_v35, %v5787_v60  ;;  %v9170_v58 = vld [vmem:[#allocation63_spill] sm:$0xff]  ;;  %v9172_v60 = vld [vmem:[#allocation60_spill] sm:$0xff] }
 0x16b   :  { %9147 = vst [vmem:[#allocation26_spill] sm:$0xff] %v5854_v8  ;;  %v9165_v17 = vrot.slane %v9164_v41, 1  ;;  %v9171_v51 = vrot.slane %v9170_v58, 1  ;;  %v9174_v55 = vrot.slane %v9173_v37, 1  ;;  %v1505_v41 = vpop.permute.xlu2 %1504  ;;  %v9182_v8 = vld [vmem:[#allocation25_spill] sm:$0xff]  ;;  %v9187_v37 = vld [vmem:[#allocation90_spill] sm:$0xff] }
 0x16c   :  { %9148 = vst [vmem:[#allocation55_spill] sm:$0xff] %v5856_v62  ;;  %v9168_v62 = vrot.slane %v9167_v44, 1  ;;  %v9177_v44 = vrot.slane %v9176_v27, 1  ;;  %v9184_v58 = vld [vmem:[#allocation89_spill] sm:$0xff] }
 0x16d   :  { %9149 = vst [vmem:[#allocation21_spill] sm:$0xff] %v5858_v10  ;;  %v1232_v14 = vadd.f32 %v9165_v17, %v9163_v15  ;;  %v9166_v10 = vld [vmem:[#allocation85_spill] sm:$0xff]  ;;  %v1257_v43 = vadd.f32 %v9174_v55, %v9172_v60  ;;  %v1501_v17 = vpop.permute.xlu0 %1500  ;;  %v9175_v15 = vld [vmem:[#allocation86_spill] sm:$0xff]  ;;  %v9188_v55 = vld [vmem:[#allocation27_spill] sm:$0xff] }
 0x16e   :  { %9150 = vst [vmem:[#allocation56_spill] sm:$0xff] %v5860_v38  ;;  %v5950_v38 = vmul.f32 %v5775_v35, %v5783_v9  ;;  %v1233_v45 = vadd.f32 %v9168_v62, %v9166_v10  ;;  %v9169_v9 = vld [vmem:[#allocation59_spill] sm:$0xff]  ;;  %v1280_v62 = vadd.f32 %v9177_v44, %v9175_v15  ;;  %v9189_v60 = vrot.slane %v9188_v55, 1  ;;  %v9193_v44 = vld [vmem:[#allocation92_spill] sm:$0xff] }
 0x16f   :  { %9151 = vst [vmem:[#allocation22_spill] sm:$0xff] %v5894_v16  ;;  %v1256_v13 = vadd.f32 %v9171_v51, %v9169_v9  ;;  %v9178_v10 = vld [vmem:[#allocation87_spill] sm:$0xff]  ;;  %v9185_v51 = vld [vmem:[#allocation66_spill] sm:$0xff]  ;;  %v9197_v16 = vld [vmem:[#allocation13_spill] sm:$0xff] }
 0x170   :  { %9152 = vst [vmem:[#allocation39_spill] sm:$0xff] %v5898_v30  ;;  %v9186_v9 = vrot.slane %v9185_v51, 1  ;;  %v9194_v30 = vld [vmem:[#allocation28_spill] sm:$0xff]  ;;  %v9199_v51 = vld [vmem:[#allocation23_spill] sm:$0xff] }
 0x171   :  { %9153 = vst [vmem:[#allocation40_spill] sm:$0xff] %v5902_v28  ;;  %v9191_v28 = vld [vmem:[#allocation12_spill] sm:$0xff] }
 0x172   :  { %9154 = vst [vmem:[#allocation45_spill] sm:$0xff] %v5906_v3  ;;  %v9190_v3 = vld [vmem:[#allocation91_spill] sm:$0xff]  ;;  %v9192_v27 = vrot.slane %v9191_v28, 1 }
 0x173   :  { %9155 = vst [vmem:[#allocation43_spill] sm:$0xff] %v5910_v1  ;;  %v1328_v1 = vadd.f32 %v9189_v60, %v9187_v37  ;;  %v9201_v37 = vld [vmem:[#allocation15_spill] sm:$0xff] }
 0x174   :  { %9156 = vst [vmem:[#allocation41_spill] sm:$0xff] %v5914_v54  ;;  %v1305_v54 = vadd.f32 %v9186_v9, %v9184_v58  ;;  %v1329_v15 = vadd.f32 %v9192_v27, %v9190_v3  ;;  %v9200_v9 = vrot.slane %v9199_v51, 2  ;;  %v9202_v60 = vrot.slane %v9201_v37, 2  ;;  %v9204_v27 = vld [vmem:[#allocation32_spill] sm:$0xff] }
 0x175   :  { %9157 = vst [vmem:[#allocation42_spill] sm:$0xff] %v5918_v29  ;;  %v9203_v3 = vrot.slane %v5530_v24, 2  ;;  %v9210_v24 = vld [vmem:[#allocation50_spill] sm:$0xff] }
 0x176   :  { %9158 = vst [vmem:[#allocation58_spill] sm:$0xff] %v5922_v22  ;;  %v9180_v22 = vrot.slane %v9179_v50, 1  ;;  %v9195_v50 = vrot.slane %v9194_v30, 1  ;;  %v1376_v55 = vadd.f32 %v9200_v9, %v1232_v14  ;;  %v1377_v28 = vadd.f32 %v9202_v60, %v1233_v45  ;;  %v9206_v14 = vld [vmem:[#allocation49_spill] sm:$0xff]  ;;  %v9208_v9 = vld [vmem:[#allocation35_spill] sm:$0xff] }
 0x177   :  { %9159 = vst [vmem:[#allocation57_spill] sm:$0xff] %v5932_v21  ;;  %v9181_v21 = vld [vmem:[#allocation88_spill] sm:$0xff]  ;;  %v1400_v30 = vadd.f32 %v9203_v3, %v1256_v13  ;;  %v9209_v45 = vrot.slane %v9208_v9, 2  ;;  %v9211_v60 = vrot.slane %v9210_v24, 2  ;;  %v6035_v9 = vstv %s5946_s5  ;;  %s6797_s5 = sld [smem:[#allocation2 + $0x18]] }
 0x178   :  { %9160 = vst [vmem:[#allocation46_spill] sm:$0xff] %v5936_v26  ;;  %v1281_v20 = vadd.f32 %v9180_v22, %v9178_v10  ;;  %v9183_v26 = vrot.slane %v9182_v8, 1  ;;  %v1352_v22 = vadd.f32 %v9195_v50, %v9193_v44  ;;  %v9196_v10 = vld [vmem:[#allocation93_spill] sm:$0xff]  ;;  %v9198_v8 = vrot.slane %v9197_v16, 1  ;;  %v9212_v3 = vld [vmem:[#allocation36_spill] sm:$0xff] }
 0x179   :  { %9161 = vst [vmem:[#allocation44_spill] sm:$0xff] %v5950_v38  ;;  %v9205_v44 = vrot.slane %v9204_v27, 2  ;;  %v6008_v16 = vsel %vm431_vm2, %v1501_v17, %v1505_v41  ;;  %v9213_v27 = vrot.slane %v9212_v3, 2 }
 0x17a   :  { %9162 = vst [vmem:[#allocation79_spill] sm:$0xff] %v5954_v59  ;;  %v1304_v29 = vadd.f32 %v9183_v26, %v9181_v21  ;;  %v1353_v26 = vadd.f32 %v9198_v8, %v9196_v10  ;;  %v6012_v10 = vsel %vm431_vm2, %v1505_v41, %v1501_v17  ;;  %v9207_v8 = vrot.slane %v9206_v14, 2  ;;  %v9216_v59 = vld [vmem:[#allocation29_spill] sm:$0xff]  ;;  %v9218_v41 = vld [vmem:[#allocation11_spill] sm:$0xff]  ;;  %v9220_v14 = vld [vmem:[#allocation30_spill] sm:$0xff] }
 0x17b   :  { %v1401_v50 = vadd.f32 %v9205_v44, %v1257_v43  ;;  %v1425_v37 = vadd.f32 %v9209_v45, %v1281_v20  ;;  %v1449_v43 = vadd.f32 %v9213_v27, %v1305_v54  ;;  %v9214_v44 = vld [vmem:[#allocation51_spill] sm:$0xff]  ;;  %v9217_v38 = vrot.slane %v9216_v59, 2 }
 0x17c   :  { %v1424_v51 = vadd.f32 %v9207_v8, %v1280_v62  ;;  %v1448_v13 = vadd.f32 %v9211_v60, %v1304_v29  ;;  %v9215_v58 = vrot.slane %v9214_v44, 2  ;;  %v9219_v17 = vrot.slane %v9218_v41, 2 }
 0x17d   :  { %v1473_v4 = vadd.f32 %v9217_v38, %v1329_v15  ;;  %v9221_v62 = vrot.slane %v9220_v14, 2  ;;  %v1514_v20 = vmul.f32 %v5672_v7, %v6008_v16  ;;  %v1515_v29 = vmul.f32 %v5672_v7, %v6012_v10 }
 0x17e   :  { %v1472_v21 = vadd.f32 %v9215_v58, %v1328_v1  ;;  %v1496_v35 = vadd.f32 %v9219_v17, %v1352_v22  ;;  %v6038_v54 = vstv %s5962_s6  ;;  %v1524_v1 = vmul.f32 %v5675_v63, %v6008_v16  ;;  %s6804_s6 = sld [smem:[#allocation2 + $0x33]] }
 0x17f   :  { %v1497_v8 = vadd.f32 %v9221_v62, %v1353_v26  ;;  %v1525_v38 = vmul.f32 %v5675_v63, %v6012_v10  ;;  %v1534_v59 = vmul.f32 %v5686_v48, %v6008_v16  ;;  %v1535_v15 = vmul.f32 %v5686_v48, %v6012_v10 }
 0x180   :  { %v1544_v22 = vmul.f32 %v5689_v34, %v6008_v16  ;;  %v1545_v7 = vmul.f32 %v5689_v34, %v6012_v10  ;;  %v1574_v26 = vmul.f32 %v5706_v32, %v6008_v16  ;;  %v1575_v58 = vmul.f32 %v5706_v32, %v6012_v10 }
 0x181   :  { %v1518_v45 = vadd.f32 %v1514_v20, %v1376_v55  ;;  %v1519_v63 = vadd.f32 %v1515_v29, %v1377_v28  ;;  %v1528_v24 = vadd.f32 %v1524_v1, %v1400_v30  ;;  %v1529_v60 = vadd.f32 %v1525_v38, %v1401_v50 }
 0x182   :  { %v1538_v3 = vadd.f32 %v1534_v59, %v1424_v51  ;;  %v1539_v27 = vadd.f32 %v1535_v15, %v1425_v37  ;;  %v1598_v48 = vmul.f32 %v5709_v53, %v6008_v16  ;;  %v1599_v44 = vmul.f32 %v5709_v53, %v6012_v10 }
 0x183   :  { %v1548_v41 = vadd.f32 %v1544_v22, %v1448_v13  ;;  %v1549_v34 = vadd.f32 %v1545_v7, %v1449_v43  ;;  %v1554_v17 = vmul.f32 %v5698_v39, %v6008_v16  ;;  %v1555_v32 = vmul.f32 %v5698_v39, %v6012_v10 }
 0x184   :  { %v1581_v55 = vrot.slane %v1574_v26, 1  ;;  %v1584_v28 = vrot.slane %v1575_v58, 1  ;;  %v1622_v30 = vmul.f32 %v5712_v49, %v6008_v16  ;;  %v1623_v50 = vmul.f32 %v5712_v49, %v6012_v10 }
 0x185   :  { %v1564_v51 = vmul.f32 %v5701_v11, %v6008_v16  ;;  %v1565_v53 = vmul.f32 %v5701_v11, %v6012_v10  ;;  %v1646_v37 = vmul.f32 %v5715_v18, %v6008_v16  ;;  %v1647_v39 = vmul.f32 %v5715_v18, %v6012_v10 }
 0x186   :  { %v1558_v13 = vadd.f32 %v1554_v17, %v1472_v21  ;;  %v1559_v43 = vadd.f32 %v1555_v32, %v1473_v4  ;;  %v1605_v14 = vrot.slane %v1598_v48, 1  ;;  %v1608_v62 = vrot.slane %v1599_v44, 1 }
 0x187   :  { %v1568_v20 = vadd.f32 %v1564_v51, %v1496_v35  ;;  %v1569_v29 = vadd.f32 %v1565_v53, %v1497_v8  ;;  %v1670_v49 = vmul.f32 %v5720_v2, %v6008_v16  ;;  %v1671_v1 = vmul.f32 %v5720_v2, %v6012_v10 }
 0x188   :  { %v9222_v11 = vrot.slane %v5820_v25, 1  ;;  %v9223_v59 = vrot.slane %v5824_v42, 1  ;;  %v1629_v4 = vrot.slane %v1622_v30, 1  ;;  %v1632_v21 = vrot.slane %v1623_v50, 1 }
 0x189   :  { %v1653_v35 = vrot.slane %v1646_v37, 1  ;;  %v1656_v8 = vrot.slane %v1647_v39, 1  ;;  %v1694_v15 = vmul.f32 %v5723_v56, %v6008_v16  ;;  %v1695_v2 = vmul.f32 %v5723_v56, %v6012_v10 }
 0x18a   :  { %v6083_v38 = vsel %vm141_vm0, %v9222_v11, %v1581_v55  ;;  %v6088_v18 = vsel %vm141_vm0, %v9223_v59, %v1584_v28  ;;  %v1592_v22 = vadd.f32 %v1581_v55, %v1518_v45  ;;  %v1593_v25 = vadd.f32 %v1584_v28, %v1519_v63 }
 0x18b   :  { %v9224_v7 = vrot.slane %v5828_v46, 1  ;;  %v9225_v42 = vrot.slane %v5832_v33, 1  ;;  %v1616_v48 = vadd.f32 %v1605_v14, %v1528_v24  ;;  %v1617_v44 = vadd.f32 %v1608_v62, %v1529_v60 }
 0x18c   :  { %v1677_v17 = vrot.slane %v1670_v49, 1  ;;  %v1680_v32 = vrot.slane %v1671_v1, 1  ;;  %v9226_v56 = vrot.slane %v5848_v31, 1  ;;  %v9227_v46 = vrot.slane %v5852_v19, 1 }
 0x18d   :  { %v6097_v26 = vsel %vm141_vm0, %v9224_v7, %v1605_v14  ;;  %v6102_v58 = vsel %vm141_vm0, %v9225_v42, %v1608_v62  ;;  %v1640_v33 = vadd.f32 %v1629_v4, %v1538_v3  ;;  %v1641_v55 = vadd.f32 %v1632_v21, %v1539_v27 }
 0x18e   :  { %v6109_v45 = vsel %vm141_vm0, %v9226_v56, %v1629_v4  ;;  %v6114_v63 = vsel %vm141_vm0, %v9227_v46, %v1632_v21  ;;  %v9228_v24 = vrot.slane %v5868_v40, 1  ;;  %v9229_v28 = vrot.slane %v5872_v52, 1 }
 0x18f   :  { %v1701_v30 = vrot.slane %v1694_v15, 1  ;;  %v1704_v50 = vrot.slane %v1695_v2, 1  ;;  %v1664_v19 = vadd.f32 %v1653_v35, %v1548_v41  ;;  %v1665_v51 = vadd.f32 %v1656_v8, %v1549_v34 }
 0x190   :  { %v6121_v60 = vsel %vm141_vm0, %v9228_v24, %v1653_v35  ;;  %v6126_v31 = vsel %vm141_vm0, %v9229_v28, %v1656_v8  ;;  %v1718_v3 = vmul.f32 %v5746_v12, %v6008_v16  ;;  %v1719_v40 = vmul.f32 %v5746_v12, %v6012_v10  ;;  %v9234_v8 = vld [vmem:[#allocation14_spill] sm:$0xff] }
 0x191   :  { %v9230_v27 = vrot.slane %v5876_v23, 1  ;;  %v9231_v53 = vrot.slane %v5880_v47, 1  ;;  %v1742_v41 = vmul.f32 %v5749_v57, %v6008_v16  ;;  %v1743_v34 = vmul.f32 %v5749_v57, %v6012_v10 }
 0x192   :  { %v1688_v12 = vadd.f32 %v1677_v17, %v1558_v13  ;;  %v1689_v39 = vadd.f32 %v1680_v32, %v1559_v43  ;;  %v1766_v23 = vmul.f32 %v5756_v61, %v6008_v16  ;;  %v1767_v14 = vmul.f32 %v5756_v61, %v6012_v10 }
 0x193   :  { %v6139_v52 = vsel %vm141_vm0, %v9230_v27, %v1677_v17  ;;  %v6144_v37 = vsel %vm141_vm0, %v9231_v53, %v1680_v32  ;;  %v9232_v47 = vrot.slane %v5886_v36, 1  ;;  %v9233_v49 = vrot.slane %v5890_v0, 1  ;;  %v9244_v27 = vld [vmem:[#allocation45_spill] sm:$0xff] }
 0x194   :  { %v1790_v13 = vmul.f32 %v5759_v5, %v6008_v16  ;;  %v1791_v43 = vmul.f32 %v5759_v5, %v6012_v10  ;;  %v1712_v61 = vadd.f32 %v1701_v30, %v1568_v20  ;;  %v1713_v1 = vadd.f32 %v1704_v50, %v1569_v29 }
 0x195   :  { %v6161_v62 = vsel %vm141_vm0, %v9232_v47, %v1701_v30  ;;  %v6166_v57 = vsel %vm141_vm0, %v9233_v49, %v1704_v50  ;;  %v1725_v11 = vrot.slane %v1718_v3, 2  ;;  %v1728_v36 = vrot.slane %v1719_v40, 2  ;;  %v9250_v47 = vld [vmem:[#allocation41_spill] sm:$0xff] }
 0x196   :  { %v1749_v59 = vrot.slane %v1742_v41, 2  ;;  %v1752_v4 = vrot.slane %v1743_v34, 2  ;;  %v1814_v0 = vmul.f32 %v5772_v6, %v6008_v16  ;;  %v1815_v21 = vmul.f32 %v5772_v6, %v6012_v10 }
 0x197   :  { %v1773_v35 = vrot.slane %v1766_v23, 2  ;;  %v1776_v5 = vrot.slane %v1767_v14, 2  ;;  %v1838_v20 = vmul.f32 %v9234_v8, %v6008_v16  ;;  %v1839_v29 = vmul.f32 %v9234_v8, %v6012_v10 }
 0x198   :  { %v6188_v15 = vadd.f32 %v1725_v11, %v1592_v22  ;;  %v6190_v2 = vadd.f32 %v1728_v36, %v1593_v25  ;;  %v1797_v7 = vrot.slane %v1790_v13, 2  ;;  %v1800_v42 = vrot.slane %v1791_v43, 2  ;;  %v9252_v43 = vld [vmem:[#allocation42_spill] sm:$0xff] }
 0x199   :  { %v6194_v6 = vadd.f32 %v1749_v59, %v1616_v48  ;;  %v6196_v17 = vadd.f32 %v1752_v4, %v1617_v44  ;;  %v6198_v32 = vadd.f32 %v1773_v35, %v1640_v33  ;;  %v6200_v16 = vadd.f32 %v1776_v5, %v1641_v55  ;;  %v9236_v48 = vld [vmem:[#allocation22_spill] sm:$0xff]  ;;  %v9238_v33 = vld [vmem:[#allocation39_spill] sm:$0xff] }
 0x19a   :  { %v6204_v10 = vadd.f32 %v1797_v7, %v1664_v19  ;;  %v6206_v22 = vadd.f32 %v1800_v42, %v1665_v51  ;;  %v1821_v25 = vrot.slane %v1814_v0, 2  ;;  %v1824_v56 = vrot.slane %v1815_v21, 2  ;;  %v9242_v51 = vld [vmem:[#allocation40_spill] sm:$0xff] }
 0x19b   :  { %v1845_v46 = vrot.slane %v1838_v20, 2  ;;  %v1848_v24 = vrot.slane %v1839_v29, 2  ;;  %v9237_v28 = vrot.slane %v9236_v48, 2  ;;  %v9239_v30 = vrot.slane %v9238_v33, 2  ;;  %v9260_v20 = vld [vmem:[#allocation44_spill] sm:$0xff]  ;;  %v9262_v48 = vld [vmem:[#allocation79_spill] sm:$0xff] }
 0x19c   :  { %9235 = vst [vmem:[#allocation47_spill] sm:$0xff] %v6206_v22  ;;  %v6218_v50 = vadd.f32 %v1821_v25, %v1688_v12  ;;  %v6220_v19 = vadd.f32 %v1824_v56, %v1689_v39  ;;  %v9243_v3 = vrot.slane %v9242_v51, 2  ;;  %v9245_v53 = vrot.slane %v9244_v27, 2  ;;  %v9248_v12 = vld [vmem:[#allocation43_spill] sm:$0xff]  ;;  %v9277_v22 = vld [vmem:[#allocation56_spill] sm:$0xff] }
 0x19d   :  { %v1726_v44 = vsel %vm286_vm1, %v9237_v28, %v1725_v11  ;;  %v1729_v55 = vsel %vm286_vm1, %v9239_v30, %v1728_v36  ;;  %v6228_v34 = vadd.f32 %v1845_v46, %v1712_v61  ;;  %v6230_v23 = vadd.f32 %v1848_v24, %v1713_v1  ;;  %v9254_v1 = vld [vmem:[#allocation58_spill] sm:$0xff] }
 0x19e   :  { %9240 = vst [vmem:[#allocation48_spill] sm:$0xff] %v6218_v50  ;;  %v1750_v40 = vsel %vm286_vm1, %v9243_v3, %v1749_v59  ;;  %v1753_v41 = vsel %vm286_vm1, %v9245_v53, %v1752_v4  ;;  %v9249_v14 = vrot.slane %v9248_v12, 2  ;;  %v9251_v49 = vrot.slane %v9250_v47, 2  ;;  %v9256_v4 = vld [vmem:[#allocation57_spill] sm:$0xff] }
 0x19f   :  { %9241 = vst [vmem:[#allocation80_spill] sm:$0xff] %v6220_v19  ;;  %v9253_v11 = vrot.slane %v9252_v43, 2  ;;  %v9255_v36 = vrot.slane %v9254_v1, 2  ;;  %v9257_v0 = vrot.slane %v9256_v4, 2  ;;  %v9261_v29 = vrot.slane %v9260_v20, 2  ;;  %v9264_v47 = vld [vmem:[#allocation37_spill] sm:$0xff]  ;;  %v1863_v20 = vpop.permute.xlu2 %1862 }
 0x1a0   :  { %9246 = vst [vmem:[#allocation81_spill] sm:$0xff] %v6228_v34  ;;  %v1774_v39 = vsel %vm286_vm1, %v9249_v14, %v1773_v35  ;;  %v1777_v13 = vsel %vm286_vm1, %v9251_v49, %v1776_v5  ;;  %v9258_v35 = vld [vmem:[#allocation46_spill] sm:$0xff]  ;;  %v9263_v28 = vrot.slane %v9262_v48, 2  ;;  %v6261_v33 = vstv %s6104_s7  ;;  %v9265_v43 = vld [vmem:[#allocation52_spill] sm:$0xff]  ;;  %v9268_v4 = vld [vmem:[#allocation53_spill] sm:$0xff]  ;;  %s6815_s7 = sld [smem:[#allocation2 + $0x4e]] }
 0x1a1   :  { %9247 = vst [vmem:[#allocation69_spill] sm:$0xff] %v6230_v23  ;;  %v1798_v61 = vsel %vm286_vm1, %v9253_v11, %v1797_v7  ;;  %v1801_v59 = vsel %vm286_vm1, %v9255_v36, %v1800_v42  ;;  %v1822_v21 = vsel %vm286_vm1, %v9257_v0, %v1821_v25  ;;  %v9259_v8 = vrot.slane %v9258_v35, 2  ;;  %v9269_v35 = vld [vmem:[#allocation18_spill] sm:$0xff]  ;;  %v9273_v23 = vld [vmem:[#allocation20_spill] sm:$0xff] }
 0x1a2   :  { %v1846_v7 = vsel %vm286_vm1, %v9261_v29, %v1845_v46  ;;  %v1849_v42 = vsel %vm286_vm1, %v9263_v28, %v1848_v24  ;;  %v6264_v25 = vstv %s6116_s8  ;;  %v6267_v30 = vstv %s6128_s9  ;;  %v1859_v29 = vpop.permute.xlu0 %1858  ;;  %v9274_v19 = vld [vmem:[#allocation26_spill] sm:$0xff]  ;;  %s6822_s8 = sld [smem:[#allocation2 + $0x69]] }
 0x1a3   :  { %v1825_v5 = vsel %vm286_vm1, %v9259_v8, %v1824_v56  ;;  %v6270_v56 = vstv %s6134_s10  ;;  %v6273_v51 = vstv %s6150_s11  ;;  %v6276_v3 = vstv %s6156_s12  ;;  %s6836_s9 = sld [smem:[#allocation2 + $0x84]] }
 0x1a4   :  { %v6279_v27 = vstv %s6172_s13  ;;  %v6282_v46 = vstv %s6174_s14  ;;  %v6285_v53 = vstv %s6180_s15  ;;  %v6288_v24 = vstv %s6186_s16  ;;  %s6846_s10 = sld [smem:[#allocation2 + $0x9f]] }
 0x1a5   :  { %v6293_v12 = vstv %s6192_s17  ;;  %v6296_v14 = vstv %s6202_s18  ;;  %v1590_v49 = vadd.f32 %v6083_v38, %v9264_v47  ;;  %v1591_v11 = vadd.f32 %v6088_v18, %v9265_v43  ;;  %v9270_v38 = vld [vmem:[#allocation38_spill] sm:$0xff]  ;;  %v9271_v18 = vld [vmem:[#allocation19_spill] sm:$0xff]  ;;  %s6860_s11 = sld [smem:[#allocation2 + $0x13]] }
 0x1a6   :  { %v6305_v1 = vstv %s6208_s19  ;;  %v6308_v36 = vstv %s6216_s20  ;;  %v1614_v0 = vadd.f32 %v6097_v26, %v9268_v4  ;;  %v1615_v8 = vadd.f32 %v6102_v58, %v9269_v35  ;;  %v9272_v47 = vld [vmem:[#allocation54_spill] sm:$0xff]  ;;  %v9275_v4 = vld [vmem:[#allocation55_spill] sm:$0xff]  ;;  %v9276_v35 = vld [vmem:[#allocation21_spill] sm:$0xff]  ;;  %s6874_s12 = sld [smem:[#allocation2 + $0x2e]] }
 0x1a7   :  { %9266 = vst [vmem:[#allocation70_spill] sm:$0xff] %v6305_v1  ;;  %v1638_v48 = vadd.f32 %v6109_v45, %v9270_v38  ;;  %v1639_v28 = vadd.f32 %v6114_v63, %v9271_v18  ;;  %v1662_v43 = vadd.f32 %v6121_v60, %v9272_v47  ;;  %v1663_v34 = vadd.f32 %v6126_v31, %v9273_v23  ;;  %s6884_s13 = sld [smem:[#allocation2 + $0x49]] }
 0x1a8   :  { %9267 = vst [vmem:[#allocation82_spill] sm:$0xff] %v6308_v36  ;;  %v1686_v26 = vadd.f32 %v6139_v52, %v9274_v19  ;;  %v1687_v58 = vadd.f32 %v6144_v37, %v9275_v4  ;;  %v1710_v50 = vadd.f32 %v6161_v62, %v9276_v35  ;;  %v1711_v45 = vadd.f32 %v6166_v57, %v9277_v22  ;;  %s6901_s14 = sld [smem:[#allocation2 + $0x64]] }
 0x1a9   :  { %v6331_v38 = vstv %s6238_s21  ;;  %v6334_v63 = vstv %s6252_s22  ;;  %v1734_v60 = vadd.f32 %v1726_v44, %v1590_v49  ;;  %v1735_v18 = vadd.f32 %v1729_v55, %v1591_v11  ;;  %s6918_s15 = sld [smem:[#allocation2 + $0x7f]] }
 0x1aa   :  { %9278 = vst [vmem:[#allocation83_spill] sm:$0xff] %v6331_v38  ;;  %v1758_v31 = vadd.f32 %v1750_v40, %v1614_v0  ;;  %v1759_v23 = vadd.f32 %v1753_v41, %v1615_v8  ;;  %v6338_v19 = vsel %vm792_vm3, %v1859_v29, %v1863_v20  ;;  %v6342_v37 = vsel %vm792_vm3, %v1863_v20, %v1859_v29  ;;  %s6934_s16 = sld [smem:[#allocation2 + $0x9a]] }
 0x1ab   :  { %v1782_v62 = vadd.f32 %v1774_v39, %v1638_v48  ;;  %v1783_v57 = vadd.f32 %v1777_v13, %v1639_v28  ;;  %v1806_v22 = vadd.f32 %v1798_v61, %v1662_v43  ;;  %v1807_v47 = vadd.f32 %v1801_v59, %v1663_v34  ;;  %s6948_s17 = sld [smem:[#allocation2 + $0x16]] }
 0x1ac   :  { %v1830_v4 = vadd.f32 %v1822_v21, %v1686_v26  ;;  %v1831_v35 = vadd.f32 %v1825_v5, %v1687_v58  ;;  %v1854_v44 = vadd.f32 %v1846_v7, %v1710_v50  ;;  %v1855_v49 = vadd.f32 %v1849_v42, %v1711_v45  ;;  %s6956_s18 = sld [smem:[#allocation2 + $0x31]] }
 0x1ad   :  { %v1872_v55 = vmul.f32 %v6035_v9, %v6338_v19  ;;  %v1873_v40 = vmul.f32 %v6035_v9, %v6342_v37  ;;  %v6349_v41 = vstv %s6290_s23  ;;  %v6352_v11 = vstv %s6302_s24  ;;  %s6964_s19 = sld [smem:[#allocation2 + $0x4c]] }
 0x1ae   :  { %9280 = vst [vmem:[#allocation71_spill] sm:$0xff] %v6349_v41  ;;  %v1882_v39 = vmul.f32 %v6038_v54, %v6338_v19  ;;  %v1883_v34 = vmul.f32 %v6038_v54, %v6342_v37  ;;  %v1892_v50 = vmul.f32 %v6261_v33, %v6338_v19  ;;  %v1893_v13 = vmul.f32 %v6261_v33, %v6342_v37  ;;  %s6974_s20 = sld [smem:[#allocation2 + $0x67]] }
 0x1af   :  { %9281 = vst [vmem:[#allocation72_spill] sm:$0xff] %v6352_v11  ;;  %v6362_v61 = vadd.f32 %v1872_v55, %v1734_v60  ;;  %v6364_v59 = vadd.f32 %v1873_v40, %v1735_v18  ;;  %v1902_v21 = vmul.f32 %v6264_v25, %v6338_v19  ;;  %v1903_v5 = vmul.f32 %v6264_v25, %v6342_v37  ;;  %s6990_s21 = sld [smem:[#allocation2 + $0x82]] }
 0x1b0   :  { %v6370_v7 = vadd.f32 %v1882_v39, %v1758_v31  ;;  %v6372_v42 = vadd.f32 %v1883_v34, %v1759_v23  ;;  %v6374_v0 = vadd.f32 %v1892_v50, %v1782_v62  ;;  %v6376_v8 = vadd.f32 %v1893_v13, %v1783_v57  ;;  %s7006_s22 = sld [smem:[#allocation2 + $0x9d]] }
 0x1b1   :  { %v1912_v20 = vmul.f32 %v6267_v30, %v6338_v19  ;;  %v1913_v29 = vmul.f32 %v6267_v30, %v6342_v37  ;;  %v6384_v48 = vmul.f32 %v6273_v51, %v6338_v19  ;;  %v6388_v28 = vmul.f32 %v6273_v51, %v6342_v37  ;;  %s7024_s23 = sld [smem:[#allocation2 + $0x19]] }
 0x1b2   :  { %v1922_v43 = vmul.f32 %v6270_v56, %v6338_v19  ;;  %v1923_v26 = vmul.f32 %v6270_v56, %v6342_v37  ;;  %v6396_v58 = vmul.f32 %v6276_v3, %v6338_v19  ;;  %v6400_v45 = vmul.f32 %v6276_v3, %v6342_v37  ;;  %s7042_s24 = sld [smem:[#allocation2 + $0x34]] }
 0x1b3   :  { %v6402_v60 = vadd.f32 %v1902_v21, %v1806_v22  ;;  %v6404_v18 = vadd.f32 %v1903_v5, %v1807_v47  ;;  %v6406_v31 = vadd.f32 %v1912_v20, %v1830_v4  ;;  %v6408_v23 = vadd.f32 %v1913_v29, %v1831_v35  ;;  %v1865_v20 = vpop.permute.xlu0 %1864 }
 0x1b4   :  { %v6410_v62 = vadd.f32 %v1922_v43, %v1854_v44  ;;  %v6412_v57 = vadd.f32 %v1923_v26, %v1855_v49  ;;  %v6416_v55 = vmul.f32 %v6279_v27, %v6338_v19  ;;  %v6420_v40 = vmul.f32 %v6279_v27, %v6342_v37 }
 0x1b5   :  { %9282 = vst [vmem:[#allocation73_spill] sm:$0xff] %v6406_v31  ;;  %v6426_v4 = vmul.f32 %v6282_v46, %v6338_v19  ;;  %v6430_v35 = vmul.f32 %v6282_v46, %v6342_v37  ;;  %v6436_v39 = vmul.f32 %v6285_v53, %v6338_v19  ;;  %v6440_v34 = vmul.f32 %v6285_v53, %v6342_v37 }
 0x1b6   :  { %9283 = vst [vmem:[#allocation74_spill] sm:$0xff] %v6408_v23  ;;  %v6446_v50 = vmul.f32 %v6288_v24, %v6338_v19  ;;  %v6450_v13 = vmul.f32 %v6288_v24, %v6342_v37  ;;  %v6454_v21 = vmul.f32 %v6293_v12, %v6338_v19  ;;  %v6458_v5 = vmul.f32 %v6293_v12, %v6342_v37 }
 0x1b7   :  { %9284 = vst [vmem:[#allocation67_spill] sm:$0xff] %v6410_v62  ;;  %v6466_v43 = vmul.f32 %v6296_v14, %v6338_v19  ;;  %v6470_v26 = vmul.f32 %v6296_v14, %v6342_v37  ;;  %v6478_v47 = vmul.f32 %v6305_v1, %v6338_v19  ;;  %v6482_v29 = vmul.f32 %v6305_v1, %v6342_v37  ;;  %v6528_v62 = vld [vmem:[#allocation7 + $0x58] sm:$0xff] }
 0x1b8   :  { %9285 = vst [vmem:[#allocation68_spill] sm:$0xff] %v6412_v57  ;;  %v6490_v57 = vmul.f32 %v6308_v36, %v6338_v19  ;;  %v6494_v44 = vmul.f32 %v6308_v36, %v6342_v37  ;;  %v6504_v31 = vmul.f32 %v6331_v38, %v6338_v19  ;;  %v6508_v36 = vmul.f32 %v6331_v38, %v6342_v37  ;;  %v6522_v38 = vld [vmem:[#allocation7 + $0x50] sm:$0xff] }
 0x1b9   :  { %9286 = vst [vmem:[#allocation75_spill] sm:$0xff] %v6470_v26  ;;  %v6514_v23 = vmul.f32 %v6334_v63, %v6338_v19  ;;  %v6518_v22 = vmul.f32 %v6334_v63, %v6342_v37  ;;  %v6526_v1 = vmul.f32 %v6522_v38, %v6349_v41  ;;  %v6532_v19 = vmul.f32 %v6528_v62, %v6349_v41  ;;  %v1861_v37 = vpop.permute.xlu1 %1860 }
 0x1ba   :  { %9287 = vst [vmem:[#allocation76_spill] sm:$0xff] %v6478_v47  ;;  %v6536_v49 = vmul.f32 %v6522_v38, %v6352_v11  ;;  %v6540_v26 = vmul.f32 %v6528_v62, %v6352_v11  ;;  %v6552_v41 = vsel %vm792_vm3, %v1861_v37, %v1865_v20  ;;  %v6564_v47 = vstv %s6484_s2  ;;  %s7084_s2 = sld [smem:[#allocation2 + $0xa0]] }
 0x1bb   :  { %9288 = vst [vmem:[#allocation77_spill] sm:$0xff] %v6482_v29  ;;  %v1874_v11 = vmul.f32 %v6035_v9, %v6552_v41  ;;  %v1884_v52 = vmul.f32 %v6038_v54, %v6552_v41 }
 0x1bc   :  { %9289 = vst [vmem:[#allocation78_spill] sm:$0xff] %v6490_v57  ;;  %v6546_v57 = vstv %s6460_s25  ;;  %s7068_s25 = sld [smem:[#allocation2 + $0x6a]] }
 0x1bd   :  { %9290 = vst [vmem:[#allocation16_spill] sm:$0xff] %v6494_v44  ;;  %v6543_v44 = vstv %s6442_s0  ;;  %s7062_s0 = sld [smem:[#allocation2 + $0x4f]] }
 0x1be   :  { %9291 = vst [vmem:[#allocation33_spill] sm:$0xff] %v6504_v31  ;;  %v6572_v29 = vmul.f32 %v6528_v62, %v6543_v44 }
 0x1bf   :  { %9292 = vst [vmem:[#allocation17_spill] sm:$0xff] %v6508_v36 }
 0x1c0   :  { %9293 = vst [vmem:[#allocation34_spill] sm:$0xff] %v6514_v23 }
 0x1c1   :  { %9294 = vst [vmem:[#allocation84_spill] sm:$0xff] %v6518_v22 }
 0x1c2   :  { %9295 = vst [vmem:[#allocation61_spill] sm:$0xff] %v6522_v38 }
 0x1c3   :  { %9296 = vst [vmem:[#allocation85_spill] sm:$0xff] %v6526_v1  ;;  %v6568_v1 = vmul.f32 %v6522_v38, %v6543_v44 }
 0x1c4   :  { %9297 = vst [vmem:[#allocation62_spill] sm:$0xff] %v6528_v62 }
 0x1c5   :  { %9298 = vst [vmem:[#allocation59_spill] sm:$0xff] %v6532_v19  ;;  %v6556_v19 = vsel %vm792_vm3, %v1865_v20, %v1861_v37  ;;  %v6576_v20 = vmul.f32 %v6522_v38, %v6546_v57  ;;  %v6580_v37 = vmul.f32 %v6528_v62, %v6546_v57 }
 0x1c6   :  { %9299 = vst [vmem:[#allocation63_spill] sm:$0xff] %v6536_v49  ;;  %v1875_v49 = vmul.f32 %v6035_v9, %v6556_v19  ;;  %v1935_v9 = vmul.f32 %v6273_v51, %v6556_v19 }
 0x1c7   :  { %9300 = vst [vmem:[#allocation60_spill] sm:$0xff] %v6540_v26  ;;  %v6561_v26 = vstv %s6472_s1  ;;  %s7078_s1 = sld [smem:[#allocation2 + $0x85]] }
 0x1c8   :  { %9301 = vst [vmem:[#allocation64_spill] sm:$0xff] %v6543_v44  ;;  %v1885_v44 = vmul.f32 %v6038_v54, %v6556_v19  ;;  %v6608_v54 = vmul.f32 %v6528_v62, %v6564_v47  ;;  %v1944_v23 = vrot.slane %v1935_v9, 1  ;;  %v9319_v9 = vrot.slane %v6400_v45, 1 }
 0x1c9   :  { %9302 = vst [vmem:[#allocation86_spill] sm:$0xff] %v6546_v57  ;;  %v6596_v57 = vmul.f32 %v6528_v62, %v6561_v26  ;;  %v1888_v62 = vadd.f32 %v1884_v52, %v6194_v6  ;;  %v2055_v45 = vmul.f32 %v6288_v24, %v6556_v19 }
 0x1ca   :  { %9303 = vst [vmem:[#allocation24_spill] sm:$0xff] %v6561_v26 }
 0x1cb   :  { %9304 = vst [vmem:[#allocation87_spill] sm:$0xff] %v6564_v47 }
 0x1cc   :  { %9305 = vst [vmem:[#allocation65_spill] sm:$0xff] %v6568_v1  ;;  %v1914_v1 = vmul.f32 %v6267_v30, %v6552_v41 }
 0x1cd   :  { %9306 = vst [vmem:[#allocation88_spill] sm:$0xff] %v6572_v29  ;;  %v6592_v29 = vmul.f32 %v6522_v38, %v6561_v26  ;;  %v1959_v26 = vmul.f32 %v6276_v3, %v6556_v19 }
 0x1ce   :  { %9307 = vst [vmem:[#allocation25_spill] sm:$0xff] %v6576_v20  ;;  %v6604_v20 = vmul.f32 %v6522_v38, %v6564_v47  ;;  %v1904_v38 = vmul.f32 %v6264_v25, %v6552_v41  ;;  %v1878_v47 = vadd.f32 %v1874_v11, %v6188_v15  ;;  %v1983_v15 = vmul.f32 %v6279_v27, %v6556_v19  ;;  %v9313_v11 = vld [vmem:[#allocation47_spill] sm:$0xff] }
 0x1cf   :  { %9308 = vst [vmem:[#allocation89_spill] sm:$0xff] %v6580_v37  ;;  %v1934_v37 = vmul.f32 %v6273_v51, %v6552_v41  ;;  %v1895_v51 = vmul.f32 %v6261_v33, %v6556_v19  ;;  %v1968_v31 = vrot.slane %v1959_v26, 1  ;;  %v9316_v26 = vrot.slane %v6384_v48, 1 }
 0x1d0   :  { %9309 = vst [vmem:[#allocation66_spill] sm:$0xff] %v6592_v29  ;;  %v1958_v29 = vmul.f32 %v6276_v3, %v6552_v41  ;;  %v1889_v3 = vadd.f32 %v1885_v44, %v6196_v17  ;;  %v2006_v17 = vmul.f32 %v6282_v46, %v6552_v41  ;;  %v1908_v52 = vadd.f32 %v1904_v38, %v6204_v10 }
 0x1d1   :  { %9310 = vst [vmem:[#allocation90_spill] sm:$0xff] %v6596_v57  ;;  %v1894_v57 = vmul.f32 %v6261_v33, %v6552_v41  ;;  %v1915_v33 = vmul.f32 %v6267_v30, %v6556_v19  ;;  %v1941_v22 = vrot.slane %v1934_v37, 1  ;;  %v1899_v6 = vadd.f32 %v1895_v51, %v6200_v16 }
 0x1d2   :  { %9311 = vst [vmem:[#allocation27_spill] sm:$0xff] %v6604_v20  ;;  %v1905_v20 = vmul.f32 %v6264_v25, %v6556_v19  ;;  %v1965_v36 = vrot.slane %v1958_v29, 1  ;;  %v1982_v25 = vmul.f32 %v6279_v27, %v6552_v41  ;;  %v2007_v30 = vmul.f32 %v6282_v46, %v6556_v19  ;;  %v9314_v29 = vld [vmem:[#allocation48_spill] sm:$0xff] }
 0x1d3   :  { %9312 = vst [vmem:[#allocation91_spill] sm:$0xff] %v6608_v54  ;;  %v1879_v54 = vadd.f32 %v1875_v49, %v6190_v2  ;;  %v1898_v2 = vadd.f32 %v1894_v57, %v6198_v32  ;;  %v1924_v49 = vmul.f32 %v6270_v56, %v6552_v41  ;;  %v1925_v27 = vmul.f32 %v6270_v56, %v6556_v19  ;;  %v9315_v57 = vld [vmem:[#allocation80_spill] sm:$0xff] }
 0x1d4   :  { %v1909_v44 = vadd.f32 %v1905_v20, %v9313_v11  ;;  %v1918_v32 = vadd.f32 %v1914_v1, %v9314_v29  ;;  %v1919_v16 = vadd.f32 %v1915_v33, %v9315_v57  ;;  %v1942_v37 = vsel %vm141_vm0, %v9316_v26, %v1941_v22  ;;  %v9320_v29 = vld [vmem:[#allocation81_spill] sm:$0xff] }
 0x1d5   :  { %v9317_v46 = vrot.slane %v6388_v28, 1  ;;  %v9318_v38 = vrot.slane %v6396_v58, 1  ;;  %v1969_v56 = vsel %vm141_vm0, %v9319_v9, %v1968_v31  ;;  %v1989_v51 = vrot.slane %v1982_v25, 1  ;;  %v9321_v26 = vld [vmem:[#allocation69_spill] sm:$0xff] }
 0x1d6   :  { %v1992_v1 = vrot.slane %v1983_v15, 1  ;;  %v2013_v11 = vrot.slane %v2006_v17, 1  ;;  %v2016_v33 = vrot.slane %v2007_v30, 1  ;;  %v2030_v48 = vmul.f32 %v6285_v53, %v6552_v41 }
 0x1d7   :  { %v1945_v10 = vsel %vm141_vm0, %v9317_v46, %v1944_v23  ;;  %v1966_v20 = vsel %vm141_vm0, %v9318_v38, %v1965_v36  ;;  %v2031_v28 = vmul.f32 %v6285_v53, %v6556_v19  ;;  %v1928_v57 = vadd.f32 %v1924_v49, %v9320_v29 }
 0x1d8   :  { %v1929_v58 = vadd.f32 %v1925_v27, %v9321_v26  ;;  %v2054_v46 = vmul.f32 %v6288_v24, %v6552_v41  ;;  %v1950_v25 = vadd.f32 %v1942_v37, %v6362_v61  ;;  %v1951_v15 = vadd.f32 %v1945_v10, %v6364_v59 }
 0x1d9   :  { %v1952_v17 = vadd.f32 %v1941_v22, %v1878_v47  ;;  %v1953_v30 = vadd.f32 %v1944_v23, %v1879_v54  ;;  %v1974_v38 = vadd.f32 %v1966_v20, %v6370_v7  ;;  %v6674_v53 = vadd.f32 %v1969_v56, %v6372_v42 }
 0x1da   :  { %v9322_v49 = vrot.slane %v6416_v55, 1  ;;  %v9323_v9 = vrot.slane %v6420_v40, 1  ;;  %v9324_v24 = vrot.slane %v6426_v4, 1  ;;  %v9325_v59 = vrot.slane %v6430_v35, 1 }
 0x1db   :  { %v2037_v7 = vrot.slane %v2030_v48, 1  ;;  %v2040_v22 = vrot.slane %v2031_v28, 1  ;;  %v1976_v42 = vadd.f32 %v1965_v36, %v1888_v62  ;;  %v1977_v47 = vadd.f32 %v1968_v31, %v1889_v3  ;;  %v9330_v48 = vld [vmem:[#allocation73_spill] sm:$0xff]  ;;  %v9332_v28 = vld [vmem:[#allocation70_spill] sm:$0xff] }
 0x1dc   :  { %v1990_v27 = vsel %vm141_vm0, %v9322_v49, %v1989_v51  ;;  %v1993_v29 = vsel %vm141_vm0, %v9323_v9, %v1992_v1  ;;  %v2014_v61 = vsel %vm141_vm0, %v9324_v24, %v2013_v11  ;;  %v2017_v23 = vsel %vm141_vm0, %v9325_v59, %v2016_v33  ;;  %v9335_v49 = vld [vmem:[#allocation82_spill] sm:$0xff] }
 0x1dd   :  { %v2061_v54 = vrot.slane %v2054_v46, 1  ;;  %v2064_v55 = vrot.slane %v2055_v45, 1  ;;  %v2000_v37 = vadd.f32 %v1989_v51, %v1898_v2  ;;  %v2001_v10 = vadd.f32 %v1992_v1, %v1899_v6  ;;  %v9333_v46 = vld [vmem:[#allocation67_spill] sm:$0xff] }
 0x1de   :  { %v2078_v40 = vmul.f32 %v6293_v12, %v6552_v41  ;;  %v2079_v4 = vmul.f32 %v6293_v12, %v6556_v19  ;;  %v1998_v20 = vadd.f32 %v1990_v27, %v6374_v0  ;;  %v6694_v35 = vadd.f32 %v1993_v29, %v6376_v8 }
 0x1df   :  { %v6697_v56 = vadd.f32 %v2014_v61, %v6402_v60  ;;  %v6700_v36 = vadd.f32 %v2017_v23, %v6404_v18  ;;  %v6702_v31 = vadd.f32 %v2013_v11, %v1908_v52  ;;  %v9326_v62 = vrot.slane %v6436_v39, 1 }
 0x1e0   :  { %v9327_v2 = vrot.slane %v6440_v34, 1  ;;  %v2102_v0 = vmul.f32 %v6296_v14, %v6552_v41  ;;  %v6712_v8 = vadd.f32 %v2016_v33, %v1909_v44  ;;  %v9328_v60 = vrot.slane %v6446_v50, 1  ;;  %v9331_v33 = vld [vmem:[#allocation74_spill] sm:$0xff] }
 0x1e1   :  { %v2038_v3 = vsel %vm141_vm0, %v9326_v62, %v2037_v7  ;;  %v9329_v6 = vrot.slane %v6450_v13, 1  ;;  %v2103_v39 = vmul.f32 %v6296_v14, %v6556_v19  ;;  %v6722_v51 = vadd.f32 %v2037_v7, %v1918_v32  ;;  %v9334_v32 = vld [vmem:[#allocation68_spill] sm:$0xff] }
 0x1e2   :  { %v2041_v12 = vsel %vm141_vm0, %v9327_v2, %v2040_v22  ;;  %v2062_v18 = vsel %vm141_vm0, %v9328_v60, %v2061_v54  ;;  %v6724_v34 = vadd.f32 %v2040_v22, %v1919_v16  ;;  %v2085_v1 = vrot.slane %v2078_v40, 2 }
 0x1e3   :  { %v2065_v52 = vsel %vm141_vm0, %v9329_v6, %v2064_v55  ;;  %v2088_v11 = vrot.slane %v2079_v4, 2  ;;  %v6727_v44 = vadd.f32 %v2038_v3, %v9330_v48  ;;  %v6730_v50 = vadd.f32 %v2041_v12, %v9331_v33 }
 0x1e4   :  { %v2126_v13 = vmul.f32 %v9332_v28, %v6552_v41  ;;  %v2127_v26 = vmul.f32 %v9332_v28, %v6556_v19  ;;  %v6737_v14 = vadd.f32 %v2062_v18, %v9333_v46  ;;  %v6740_v16 = vadd.f32 %v2065_v52, %v9334_v32  ;;  %v9354_v46 = vld [vmem:[#allocation16_spill] sm:$0xff] }
 0x1e5   :  { %v2109_v45 = vrot.slane %v2102_v0, 2  ;;  %v2150_v27 = vmul.f32 %v9335_v49, %v6552_v41  ;;  %v6744_v9 = vadd.f32 %v2061_v54, %v1928_v57  ;;  %v6746_v29 = vadd.f32 %v2064_v55, %v1929_v58 }
 0x1e6   :  { %v2112_v24 = vrot.slane %v2103_v39, 2  ;;  %v2151_v61 = vmul.f32 %v9335_v49, %v6556_v19  ;;  %v9336_v59 = vrot.slane %v6454_v21, 2  ;;  %v9337_v7 = vrot.slane %v6458_v5, 2  ;;  %v9341_v5 = vld [vmem:[#allocation83_spill] sm:$0xff]  ;;  %v9346_v39 = vld [vmem:[#allocation76_spill] sm:$0xff] }
 0x1e7   :  { %v2096_v40 = vadd.f32 %v2085_v1, %v1952_v17  ;;  %v2097_v4 = vadd.f32 %v2088_v11, %v1953_v30  ;;  %v2133_v54 = vrot.slane %v2126_v13, 2  ;;  %v2136_v55 = vrot.slane %v2127_v26, 2 }
 0x1e8   :  { %v2086_v23 = vsel %vm286_vm1, %v9336_v59, %v2085_v1  ;;  %v2089_v22 = vsel %vm286_vm1, %v9337_v7, %v2088_v11  ;;  %v9340_v21 = vrot.slane %v6466_v43, 2  ;;  %v2157_v3 = vrot.slane %v2150_v27, 2  ;;  %v9348_v11 = vld [vmem:[#allocation77_spill] sm:$0xff] }
 0x1e9   :  { %v6760_v57 = vadd.f32 %v2086_v23, %v1950_v25  ;;  %v6762_v58 = vadd.f32 %v2089_v22, %v1951_v15  ;;  %v2174_v2 = vmul.f32 %v9341_v5, %v6552_v41  ;;  %v2175_v17 = vmul.f32 %v9341_v5, %v6556_v19  ;;  %v9342_v25 = vld [vmem:[#allocation75_spill] sm:$0xff]  ;;  %v9367_v5 = vld [vmem:[#allocation34_spill] sm:$0xff] }
 0x1ea   :  { %v2110_v62 = vsel %vm286_vm1, %v9340_v21, %v2109_v45  ;;  %v9343_v15 = vrot.slane %v9342_v25, 2  ;;  %v2160_v0 = vrot.slane %v2151_v61, 2  ;;  %v2198_v43 = vmul.f32 %v6334_v63, %v6552_v41  ;;  %v9360_v23 = vld [vmem:[#allocation63_spill] sm:$0xff] }
 0x1eb   :  { %9338 = vst [vmem:[#allocation12_spill] sm:$0xff] %v6760_v57  ;;  %v6778_v12 = vadd.f32 %v2110_v62, %v1974_v38  ;;  %v2120_v18 = vadd.f32 %v2109_v45, %v1976_v42  ;;  %v2121_v6 = vadd.f32 %v2112_v24, %v1977_v47  ;;  %v2199_v52 = vmul.f32 %v6334_v63, %v6556_v19  ;;  %v9351_v42 = vld [vmem:[#allocation78_spill] sm:$0xff] }
 0x1ec   :  { %9339 = vst [vmem:[#allocation92_spill] sm:$0xff] %v6762_v58  ;;  %v2113_v30 = vsel %vm286_vm1, %v9343_v15, %v2112_v24  ;;  %v9347_v1 = vrot.slane %v9346_v39, 2  ;;  %v9349_v48 = vrot.slane %v9348_v11, 2  ;;  %v2144_v33 = vadd.f32 %v2133_v54, %v2000_v37  ;;  %v9358_v24 = vld [vmem:[#allocation85_spill] sm:$0xff]  ;;  %v9378_v11 = vld [vmem:[#allocation62_spill] sm:$0xff] }
 0x1ed   :  { %9344 = vst [vmem:[#allocation28_spill] sm:$0xff] %v6778_v12  ;;  %v6785_v60 = vadd.f32 %v2113_v30, %v6674_v53  ;;  %v2145_v28 = vadd.f32 %v2136_v55, %v2001_v10  ;;  %v9352_v47 = vrot.slane %v9351_v42, 2  ;;  %v2181_v19 = vrot.slane %v2174_v2, 2  ;;  %v9370_v30 = vld [vmem:[#allocation84_spill] sm:$0xff]  ;;  %v9375_v39 = vld [vmem:[#allocation65_spill] sm:$0xff] }
 0x1ee   :  { %v2134_v38 = vsel %vm286_vm1, %v9347_v1, %v2133_v54  ;;  %v2137_v41 = vsel %vm286_vm1, %v9349_v48, %v2136_v55  ;;  %v2184_v13 = vrot.slane %v2175_v17, 2  ;;  %v9355_v32 = vrot.slane %v9354_v46, 2  ;;  %v9364_v55 = vld [vmem:[#allocation17_spill] sm:$0xff] }
 0x1ef   :  { %9345 = vst [vmem:[#allocation93_spill] sm:$0xff] %v6785_v60  ;;  %v6799_v53 = vadd.f32 %v2134_v38, %v1998_v20  ;;  %v2158_v63 = vsel %vm286_vm1, %v9352_v47, %v2157_v3  ;;  %v6807_v26 = vadd.f32 %v2137_v41, %v6694_v35  ;;  %v2205_v20 = vrot.slane %v2198_v43, 2  ;;  %v9382_v47 = vld [vmem:[#allocation25_spill] sm:$0xff] }
 0x1f0   :  { %v2161_v37 = vsel %vm286_vm1, %v9355_v32, %v2160_v0  ;;  %v6813_v10 = vadd.f32 %v2158_v63, %v6697_v56  ;;  %v2168_v49 = vadd.f32 %v2157_v3, %v6702_v31  ;;  %v2169_v27 = vadd.f32 %v2160_v0, %v6712_v8  ;;  %v9359_v56 = vld [vmem:[#allocation59_spill] sm:$0xff]  ;;  %v9362_v31 = vld [vmem:[#allocation33_spill] sm:$0xff]  ;;  %v9385_v32 = vld [vmem:[#allocation66_spill] sm:$0xff] }
 0x1f1   :  { %9350 = vst [vmem:[#allocation13_spill] sm:$0xff] %v6799_v53  ;;  %v6818_v45 = vadd.f32 %v2161_v37, %v6700_v36  ;;  %v2208_v35 = vrot.slane %v2199_v52, 2  ;;  %v6825_v61 = vadd.f32 %v9358_v24, %v2096_v40  ;;  %v6828_v59 = vadd.f32 %v9359_v56, %v2097_v4  ;;  %v9361_v36 = vld [vmem:[#allocation60_spill] sm:$0xff]  ;;  %v9388_v24 = vld [vmem:[#allocation91_spill] sm:$0xff] }
 0x1f2   :  { %9353 = vst [vmem:[#allocation23_spill] sm:$0xff] %v6807_v26  ;;  %v6831_v7 = vadd.f32 %v9360_v23, %v2120_v18  ;;  %v6834_v22 = vadd.f32 %v9361_v36, %v2121_v6  ;;  %v9363_v8 = vrot.slane %v9362_v31, 2  ;;  %v9365_v21 = vrot.slane %v9364_v55, 2 }
 0x1f3   :  { %9356 = vst [vmem:[#allocation15_spill] sm:$0xff] %v6813_v10  ;;  %v2192_v4 = vadd.f32 %v2181_v19, %v6722_v51  ;;  %v2193_v62 = vadd.f32 %v2184_v13, %v6724_v34  ;;  %v9368_v2 = vrot.slane %v9367_v5, 2  ;;  %v6855_v25 = vstv %s6750_s26  ;;  %s7598_s26 = sld [smem:[#allocation2 + $0x14]] }
 0x1f4   :  { %9357 = vst [vmem:[#allocation32_spill] sm:$0xff] %v6818_v45  ;;  %v2182_v54 = vsel %vm286_vm1, %v9363_v8, %v2181_v19  ;;  %v2185_v40 = vsel %vm286_vm1, %v9365_v21, %v2184_v13  ;;  %v6858_v15 = vstv %s6758_s27  ;;  %v9371_v34 = vrot.slane %v9370_v30, 2  ;;  %v7044_v21 = vpop.permute.xlu1 %2571  ;;  %s7610_s27 = sld [smem:[#allocation2 + $0x2f]] }
 0x1f5   :  { %v6849_v3 = vadd.f32 %v2182_v54, %v6727_v44  ;;  %v2206_v17 = vsel %vm286_vm1, %v9368_v2, %v2205_v20  ;;  %v6863_v51 = vadd.f32 %v2185_v40, %v6730_v50  ;;  %v6872_v43 = vstv %s6764_s28  ;;  %9404 = vst [vmem:[#allocation18_spill] sm:$0xff] %v7044_v21  ;;  %s7664_s28 = sld [smem:[#allocation2 + $0x4a]] }
 0x1f6   :  { %v2209_v0 = vsel %vm286_vm1, %v9371_v34, %v2208_v35  ;;  %v6869_v44 = vadd.f32 %v2206_v17, %v6737_v14  ;;  %v2216_v6 = vadd.f32 %v2205_v20, %v6744_v9  ;;  %v2217_v52 = vadd.f32 %v2208_v35, %v6746_v29  ;;  %v9376_v14 = vld [vmem:[#allocation61_spill] sm:$0xff]  ;;  %v9380_v9 = vld [vmem:[#allocation88_spill] sm:$0xff]  ;;  %v9386_v20 = vld [vmem:[#allocation90_spill] sm:$0xff] }
 0x1f7   :  { %9366 = vst [vmem:[#allocation49_spill] sm:$0xff] %v6849_v3  ;;  %v6877_v18 = vadd.f32 %v2209_v0, %v6740_v16  ;;  %v6882_v50 = vstv %s6773_s29  ;;  %v6887_v1 = vadd.f32 %v9375_v39, %v2144_v33  ;;  %v6891_v38 = vmul.f32 %v9376_v14, %v6855_v25  ;;  %v9387_v35 = vld [vmem:[#allocation27_spill] sm:$0xff]  ;;  %s7674_s29 = sld [smem:[#allocation2 + $0x65]] }
 0x1f8   :  { %9369 = vst [vmem:[#allocation35_spill] sm:$0xff] %v6863_v51  ;;  %v6895_v48 = vmul.f32 %v9378_v11, %v6855_v25  ;;  %v6899_v16 = vmul.f32 %v9376_v14, %v6858_v15  ;;  %v6904_v29 = vadd.f32 %v9380_v9, %v2145_v28  ;;  %v6908_v41 = vmul.f32 %v9378_v11, %v6858_v15  ;;  %v9383_v28 = vld [vmem:[#allocation89_spill] sm:$0xff] }
 0x1f9   :  { %9372 = vst [vmem:[#allocation50_spill] sm:$0xff] %v6869_v44  ;;  %v6912_v33 = vmul.f32 %v9376_v14, %v6872_v43  ;;  %v6916_v42 = vmul.f32 %v9378_v11, %v6872_v43  ;;  %v6921_v63 = vadd.f32 %v9382_v47, %v2168_v49  ;;  %v6924_v19 = vadd.f32 %v9383_v28, %v2169_v27 }
 0x1fa   :  { %9373 = vst [vmem:[#allocation36_spill] sm:$0xff] %v6877_v18  ;;  %v6928_v13 = vmul.f32 %v9376_v14, %v6882_v50  ;;  %v6932_v46 = vmul.f32 %v9378_v11, %v6882_v50  ;;  %v6937_v37 = vadd.f32 %v9385_v32, %v2192_v4  ;;  %v6940_v49 = vadd.f32 %v9386_v20, %v2193_v62 }
 0x1fb   :  { %9374 = vst [vmem:[#allocation51_spill] sm:$0xff] %v6882_v50  ;;  %v6943_v27 = vadd.f32 %v9387_v35, %v2216_v6  ;;  %v6946_v56 = vadd.f32 %v9388_v24, %v2217_v52  ;;  %v6954_v8 = vstv %s6782_s30  ;;  %v6962_v40 = vstv %s6789_s4  ;;  %s7684_s30 = sld [smem:[#allocation2 + $0x80]] }
 0x1fc   :  { %9377 = vst [vmem:[#allocation29_spill] sm:$0xff] %v6891_v38  ;;  %v6969_v5 = vstv %s6797_s5  ;;  %v6972_v2 = vstv %s6804_s6  ;;  %v6978_v17 = vmul.f32 %v9376_v14, %v6954_v8  ;;  %v6982_v30 = vmul.f32 %v9378_v11, %v6954_v8  ;;  %s7686_s4 = sld [smem:[#allocation2 + $0x9b]] }
 0x1fd   :  { %9379 = vst [vmem:[#allocation11_spill] sm:$0xff] %v6895_v48  ;;  %v6985_v34 = vstv %s6815_s7  ;;  %v6988_v0 = vstv %s6822_s8  ;;  %v6994_v6 = vmul.f32 %v9376_v14, %v6962_v40  ;;  %v6998_v52 = vmul.f32 %v9378_v11, %v6962_v40  ;;  %s7688_s5 = sld [smem:[#allocation2 + $0x17]] }
 0x1fe   :  { %9381 = vst [vmem:[#allocation30_spill] sm:$0xff] %v6912_v33  ;;  %v7001_v39 = vstv %s6836_s9  ;;  %v7004_v9 = vstv %s6846_s10  ;;  %v7010_v47 = vmul.f32 %v9376_v14, %v6969_v5  ;;  %v7014_v28 = vmul.f32 %v9378_v11, %v6969_v5  ;;  %s7698_s6 = sld [smem:[#allocation2 + $0x32]] }
 0x1ff   :  { %9384 = vst [vmem:[#allocation14_spill] sm:$0xff] %v6928_v13  ;;  %v7018_v32 = vmul.f32 %v9376_v14, %v6972_v2  ;;  %v7022_v20 = vmul.f32 %v9378_v11, %v6972_v2  ;;  %v7028_v35 = vmul.f32 %v9376_v14, %v6985_v34  ;;  %v7032_v24 = vmul.f32 %v9378_v11, %v6985_v34  ;;  %s7700_s7 = sld [smem:[#allocation2 + $0x4d]] }
 0x200   :  { %9389 = vst [vmem:[#allocation22_spill] sm:$0xff] %v6954_v8  ;;  %v7036_v62 = vmul.f32 %v9376_v14, %v6988_v0  ;;  %v7040_v4 = vmul.f32 %v9378_v11, %v6988_v0  ;;  %v7048_v55 = vmul.f32 %v9376_v14, %v7001_v39  ;;  %v7052_v54 = vmul.f32 %v9378_v11, %v7001_v39  ;;  %s7714_s8 = sld [smem:[#allocation2 + $0x68]] }
 0x201   :  { %9390 = vst [vmem:[#allocation39_spill] sm:$0xff] %v6962_v40  ;;  %v7056_v31 = vmul.f32 %v9376_v14, %v7004_v9  ;;  %v7060_v36 = vmul.f32 %v9378_v11, %v7004_v9  ;;  %v7087_v21 = vstv %s6860_s11  ;;  %v7090_v14 = vstv %s6874_s12  ;;  %s7724_s9 = sld [smem:[#allocation2 + $0x83]] }
 0x202   :  { %9391 = vst [vmem:[#allocation40_spill] sm:$0xff] %v6969_v5  ;;  %v7093_v11 = vstv %s6884_s13  ;;  %v7096_v51 = vstv %s6901_s14  ;;  %v7099_v3 = vstv %s6918_s15  ;;  %v7102_v23 = vstv %s6934_s16  ;;  %s7726_s10 = sld [smem:[#allocation2 + $0x9e]] }
 0x203   :  { %9392 = vst [vmem:[#allocation45_spill] sm:$0xff] %v6972_v2  ;;  %v7105_v18 = vstv %s6948_s17  ;;  %v7108_v45 = vstv %s6956_s18  ;;  %v7111_v44 = vstv %s6964_s19  ;;  %v7114_v10 = vstv %s6974_s20  ;;  %s7740_s11 = sld [smem:[#allocation2 + $0x1a]] }
 0x204   :  { %9393 = vst [vmem:[#allocation43_spill] sm:$0xff] %v6982_v30  ;;  %v7117_v26 = vstv %s6990_s21  ;;  %v7120_v53 = vstv %s7006_s22  ;;  %v7123_v60 = vstv %s7024_s23  ;;  %v7126_v12 = vstv %s7042_s24  ;;  %s7750_s12 = sld [smem:[#allocation2 + $0x35]] }
 0x205   :  { %9394 = vst [vmem:[#allocation41_spill] sm:$0xff] %v6985_v34  ;;  %v9421_v58 = vrot.slane %v6891_v38, 1  ;;  %v7138_v34 = vstv %s7068_s25  ;;  %v9425_v2 = vrot.slane %v6899_v16, 1  ;;  %v9426_v40 = vrot.slane %v6908_v41, 1  ;;  %v2578_v38 = vpop.permute.xlu1 %2577  ;;  %s7760_s13 = sld [smem:[#allocation2 + $0x50]] }
 0x206   :  { %9395 = vst [vmem:[#allocation42_spill] sm:$0xff] %v6988_v0  ;;  %v7135_v0 = vstv %s7062_s0  ;;  %s7774_s14 = sld [smem:[#allocation2 + $0x6b]] }
 0x207   :  { %9396 = vst [vmem:[#allocation58_spill] sm:$0xff] %v6994_v6  ;;  %v2305_v57 = vadd.f32 %v9421_v58, %v6825_v61  ;;  %v2329_v5 = vadd.f32 %v9425_v2, %v6831_v7  ;;  %v2330_v8 = vadd.f32 %v9426_v40, %v6834_v22  ;;  %v9427_v58 = vrot.slane %v6912_v33, 1  ;;  %s7784_s15 = sld [smem:[#allocation2 + $0x86]] }
 0x208   :  { %9397 = vst [vmem:[#allocation57_spill] sm:$0xff] %v7001_v39  ;;  %v9430_v7 = vrot.slane %v6932_v46, 1  ;;  %v9431_v22 = vrot.slane %v6978_v17, 1  ;;  %v9432_v33 = vrot.slane %v6982_v30, 1  ;;  %s7798_s16 = sld [smem:[#allocation2 + $0xa1]] }
 0x209   :  { %9398 = vst [vmem:[#allocation46_spill] sm:$0xff] %v7004_v9  ;;  %v9422_v9 = vrot.slane %v6895_v48, 1  ;;  %v2353_v61 = vadd.f32 %v9427_v58, %v6887_v1  ;;  %v9429_v48 = vrot.slane %v6928_v13, 1  ;;  %v9433_v58 = vrot.slane %v6994_v6, 1 }
 0x20a   :  { %9399 = vst [vmem:[#allocation44_spill] sm:$0xff] %v7010_v47  ;;  %v2378_v2 = vadd.f32 %v9430_v7, %v6924_v19  ;;  %v2401_v40 = vadd.f32 %v9431_v22, %v6937_v37  ;;  %v2402_v1 = vadd.f32 %v9432_v33, %v6940_v49  ;;  %v7171_v13 = vstv %s7078_s1 }
 0x20b   :  { %9400 = vst [vmem:[#allocation79_spill] sm:$0xff] %v7018_v32  ;;  %v2306_v39 = vadd.f32 %v9422_v9, %v6828_v59  ;;  %v9428_v59 = vrot.slane %v6916_v42, 1  ;;  %v2377_v50 = vadd.f32 %v9429_v48, %v6921_v63  ;;  %v2574_v63 = vpop.permute.xlu2 %2573  ;;  %v7174_v19 = vstv %s7084_s2 }
 0x20c   :  { %9401 = vst [vmem:[#allocation37_spill] sm:$0xff] %v7022_v20  ;;  %v9437_v7 = vrot.slane %v7010_v47, 2  ;;  %v9438_v22 = vrot.slane %v7014_v28, 2  ;;  %v9439_v33 = vrot.slane %v7018_v32, 2  ;;  %v9442_v47 = vrot.slane %v7028_v35, 2 }
 0x20d   :  { %9402 = vst [vmem:[#allocation52_spill] sm:$0xff] %v7036_v62  ;;  %v2354_v9 = vadd.f32 %v9428_v59, %v6904_v29  ;;  %v2425_v29 = vadd.f32 %v9433_v58, %v6943_v27  ;;  %v9434_v59 = vrot.slane %v6998_v52, 1  ;;  %v9440_v27 = vrot.slane %v7022_v20, 2 }
 0x20e   :  { %9403 = vst [vmem:[#allocation53_spill] sm:$0xff] %v7040_v4  ;;  %v2449_v37 = vadd.f32 %v9437_v7, %v2305_v57  ;;  %v2450_v30 = vadd.f32 %v9438_v22, %v2306_v39  ;;  %v2473_v49 = vadd.f32 %v9439_v33, %v2329_v5  ;;  %v2497_v57 = vadd.f32 %v9442_v47, %v2353_v61 }
 0x20f   :  { %9405 = vst [vmem:[#allocation38_spill] sm:$0xff] %v7048_v55  ;;  %v2426_v48 = vadd.f32 %v9434_v59, %v6946_v56  ;;  %v2474_v58 = vadd.f32 %v9440_v27, %v2330_v8  ;;  %v7186_v56 = vsel %vm431_vm2, %v2574_v63, %v2578_v38  ;;  %v7190_v59 = vsel %vm431_vm2, %v2578_v38, %v2574_v63 }
 0x210   :  { %9406 = vst [vmem:[#allocation19_spill] sm:$0xff] %v7052_v54  ;;  %v9443_v7 = vrot.slane %v7032_v24, 2  ;;  %v9444_v22 = vrot.slane %v7036_v62, 2  ;;  %v9445_v33 = vrot.slane %v7040_v4, 2  ;;  %v9446_v27 = vrot.slane %v7048_v55, 2 }
 0x211   :  { %9407 = vst [vmem:[#allocation54_spill] sm:$0xff] %v7056_v31  ;;  %v9447_v32 = vrot.slane %v7052_v54, 2  ;;  %v9448_v38 = vrot.slane %v7056_v31, 2  ;;  %v9449_v47 = vrot.slane %v7060_v36, 2 }
 0x212   :  { %9408 = vst [vmem:[#allocation20_spill] sm:$0xff] %v7060_v36  ;;  %v2498_v39 = vadd.f32 %v9443_v7, %v2354_v9  ;;  %v2521_v5 = vadd.f32 %v9444_v22, %v2377_v50  ;;  %v2522_v8 = vadd.f32 %v9445_v33, %v2378_v2  ;;  %v2545_v20 = vadd.f32 %v9446_v27, %v2401_v40 }
 0x213   :  { %9409 = vst [vmem:[#allocation26_spill] sm:$0xff] %v7087_v21  ;;  %v2546_v6 = vadd.f32 %v9447_v32, %v2402_v1  ;;  %v2569_v63 = vadd.f32 %v9448_v38, %v2425_v29  ;;  %v2570_v61 = vadd.f32 %v9449_v47, %v2426_v48  ;;  %v2587_v9 = vmul.f32 %v7087_v21, %v7186_v56 }
 0x214   :  { %9410 = vst [vmem:[#allocation55_spill] sm:$0xff] %v7090_v14  ;;  %v2588_v50 = vmul.f32 %v7087_v21, %v7190_v59  ;;  %v2597_v2 = vmul.f32 %v7090_v14, %v7186_v56  ;;  %v2598_v40 = vmul.f32 %v7090_v14, %v7190_v59  ;;  %v2607_v32 = vmul.f32 %v7093_v11, %v7186_v56 }
 0x215   :  { %9411 = vst [vmem:[#allocation21_spill] sm:$0xff] %v7093_v11  ;;  %v2608_v1 = vmul.f32 %v7093_v11, %v7190_v59  ;;  %v2617_v29 = vmul.f32 %v7096_v51, %v7186_v56  ;;  %v2618_v48 = vmul.f32 %v7096_v51, %v7190_v59  ;;  %v2591_v7 = vadd.f32 %v2587_v9, %v2449_v37 }
 0x216   :  { %9412 = vst [vmem:[#allocation56_spill] sm:$0xff] %v7096_v51  ;;  %v2592_v22 = vadd.f32 %v2588_v50, %v2450_v30  ;;  %v2601_v33 = vadd.f32 %v2597_v2, %v2473_v49  ;;  %v2602_v27 = vadd.f32 %v2598_v40, %v2474_v58  ;;  %v2627_v38 = vmul.f32 %v7099_v3, %v7186_v56 }
 0x217   :  { %9413 = vst [vmem:[#allocation47_spill] sm:$0xff] %v7099_v3  ;;  %v2628_v47 = vmul.f32 %v7099_v3, %v7190_v59  ;;  %v2637_v14 = vmul.f32 %v7102_v23, %v7186_v56  ;;  %v2638_v11 = vmul.f32 %v7102_v23, %v7190_v59  ;;  %v7234_v21 = vmul.f32 %v7105_v18, %v7186_v56 }
 0x218   :  { %9414 = vst [vmem:[#allocation48_spill] sm:$0xff] %v7102_v23  ;;  %v7238_v30 = vmul.f32 %v7105_v18, %v7190_v59  ;;  %v7242_v37 = vmul.f32 %v7108_v45, %v7186_v56  ;;  %v7246_v49 = vmul.f32 %v7108_v45, %v7190_v59  ;;  %v7250_v58 = vmul.f32 %v7111_v44, %v7186_v56 }
 0x219   :  { %9415 = vst [vmem:[#allocation80_spill] sm:$0xff] %v7105_v18  ;;  %v7254_v9 = vmul.f32 %v7111_v44, %v7190_v59  ;;  %v7258_v50 = vmul.f32 %v7114_v10, %v7186_v56  ;;  %v7262_v2 = vmul.f32 %v7114_v10, %v7190_v59  ;;  %v2611_v40 = vadd.f32 %v2607_v32, %v2497_v57 }
 0x21a   :  { %9416 = vst [vmem:[#allocation81_spill] sm:$0xff] %v7108_v45  ;;  %v2612_v23 = vadd.f32 %v2608_v1, %v2498_v39  ;;  %v2621_v3 = vadd.f32 %v2617_v29, %v2521_v5  ;;  %v2622_v45 = vadd.f32 %v2618_v48, %v2522_v8  ;;  %v2631_v18 = vadd.f32 %v2627_v38, %v2545_v20 }
 0x21b   :  { %9417 = vst [vmem:[#allocation69_spill] sm:$0xff] %v7111_v44  ;;  %v2632_v51 = vadd.f32 %v2628_v47, %v2546_v6  ;;  %v2641_v36 = vadd.f32 %v2637_v14, %v2569_v63  ;;  %v2642_v31 = vadd.f32 %v2638_v11, %v2570_v61  ;;  %v8662_v54 = vrot.slane %v7234_v21, 1 }
 0x21c   :  { %9418 = vst [vmem:[#allocation73_spill] sm:$0xff] %v7114_v10  ;;  %v8661_v44 = vrot.slane %v7238_v30, 1  ;;  %v8660_v55 = vrot.slane %v7242_v37, 1  ;;  %v8659_v4 = vrot.slane %v7246_v49, 1  ;;  %v8658_v62 = vrot.slane %v7250_v58, 1 }
 0x21d   :  { %9419 = vst [vmem:[#allocation74_spill] sm:$0xff] %v7123_v60  ;;  %v8657_v10 = vrot.slane %v7254_v9, 1  ;;  %v8656_v57 = vrot.slane %v7258_v50, 1  ;;  %v8655_v39 = vrot.slane %v7262_v2, 1  ;;  %v7274_v6 = vmul.f32 %v7117_v26, %v7186_v56 }
 0x21e   :  { %9420 = vst [vmem:[#allocation70_spill] sm:$0xff] %v7126_v12  ;;  %v7278_v20 = vmul.f32 %v7117_v26, %v7190_v59  ;;  %v7282_v14 = vmul.f32 %v7120_v53, %v7186_v56  ;;  %v7286_v11 = vmul.f32 %v7120_v53, %v7190_v59  ;;  %v2665_v5 = vadd.f32 %v8662_v54, %v2591_v7 }
 0x21f   :  { %9423 = vst [vmem:[#allocation67_spill] sm:$0xff] %v7135_v0  ;;  %v2666_v8 = vadd.f32 %v8661_v44, %v2592_v22  ;;  %v2689_v63 = vadd.f32 %v8660_v55, %v2601_v33  ;;  %v2690_v61 = vadd.f32 %v8659_v4, %v2602_v27  ;;  %v2713_v32 = vadd.f32 %v8658_v62, %v2611_v40 }
 0x220   :  { %9424 = vst [vmem:[#allocation68_spill] sm:$0xff] %v7138_v34  ;;  %v2714_v1 = vadd.f32 %v8657_v10, %v2612_v23  ;;  %v2737_v29 = vadd.f32 %v8656_v57, %v2621_v3  ;;  %v2738_v48 = vadd.f32 %v8655_v39, %v2622_v45  ;;  %v7306_v7 = vmul.f32 %v7123_v60, %v7186_v56 }
 0x221   :  { %9435 = vst [vmem:[#allocation82_spill] sm:$0xff] %v7171_v13  ;;  %v7310_v22 = vmul.f32 %v7123_v60, %v7190_v59  ;;  %v7314_v33 = vmul.f32 %v7126_v12, %v7186_v56  ;;  %v7318_v23 = vmul.f32 %v7126_v12, %v7190_v59  ;;  %v8670_v3 = vrot.slane %v7274_v6, 1  ;;  %v9510_v12 = vld [vmem:[#allocation41_spill] sm:$0xff] }
 0x222   :  { %9436 = vst [vmem:[#allocation83_spill] sm:$0xff] %v7174_v19  ;;  %v8669_v45 = vrot.slane %v7278_v20, 1  ;;  %v8668_v27 = vrot.slane %v7282_v14, 1  ;;  %v8667_v38 = vrot.slane %v7286_v11, 1  ;;  %v7326_v47 = vmul.f32 %v7135_v0, %v7186_v56 }
 0x223   :  { %9450 = vst [vmem:[#allocation75_spill] sm:$0xff] %v7258_v50  ;;  %v7330_v40 = vmul.f32 %v7135_v0, %v7190_v59  ;;  %v7334_v39 = vmul.f32 %v7138_v34, %v7186_v56  ;;  %v7338_v57 = vmul.f32 %v7138_v34, %v7190_v59  ;;  %v2761_v10 = vadd.f32 %v8670_v3, %v2631_v18 }
 0x224   :  { %9451 = vst [vmem:[#allocation76_spill] sm:$0xff] %v7262_v2  ;;  %v2762_v62 = vadd.f32 %v8669_v45, %v2632_v51  ;;  %v2785_v4 = vadd.f32 %v8668_v27, %v2641_v36  ;;  %v2786_v55 = vadd.f32 %v8667_v38, %v2642_v31  ;;  %v8673_v44 = vrot.slane %v7306_v7, 2 }
 0x225   :  { %9452 = vst [vmem:[#allocation77_spill] sm:$0xff] %v7274_v6  ;;  %v8674_v54 = vrot.slane %v7310_v22, 2  ;;  %v8675_v0 = vrot.slane %v7314_v33, 2  ;;  %v7354_v18 = vmul.f32 %v7171_v13, %v7186_v56  ;;  %v7358_v51 = vmul.f32 %v7171_v13, %v7190_v59  ;;  %v9503_v13 = vld [vmem:[#allocation45_spill] sm:$0xff] }
 0x226   :  { %9453 = vst [vmem:[#allocation78_spill] sm:$0xff] %v7278_v20  ;;  %v7362_v36 = vmul.f32 %v7174_v19, %v7186_v56  ;;  %v7366_v31 = vmul.f32 %v7174_v19, %v7190_v59  ;;  %v7374_v34 = vadd.f32 %v8673_v44, %v2665_v5  ;;  %v9471_v38 = vrot.slane %v7318_v23, 2 }
 0x227   :  { %9454 = vst [vmem:[#allocation16_spill] sm:$0xff] %v7282_v14  ;;  %v7378_v56 = vadd.f32 %v8674_v54, %v2666_v8  ;;  %v7382_v59 = vadd.f32 %v8675_v0, %v2689_v63  ;;  %v9473_v45 = vrot.slane %v7326_v47, 2  ;;  %v9475_v3 = vrot.slane %v7330_v40, 2 }
 0x228   :  { %9455 = vst [vmem:[#allocation85_spill] sm:$0xff] %v7286_v11  ;;  %v7386_v19 = vadd.f32 %v9471_v38, %v2690_v61  ;;  %v9477_v44 = vrot.slane %v7334_v39, 2  ;;  %v9479_v54 = vrot.slane %v7338_v57, 2  ;;  %v8677_v0 = vrot.slane %v7354_v18, 2  ;;  %v9507_v11 = vld [vmem:[#allocation14_spill] sm:$0xff] }
 0x229   :  { %9456 = vst [vmem:[#allocation59_spill] sm:$0xff] %v7306_v7  ;;  %v7390_v27 = vadd.f32 %v9473_v45, %v2713_v32  ;;  %v7394_v5 = vadd.f32 %v9475_v3, %v2714_v1  ;;  %v8676_v61 = vrot.slane %v7358_v51, 2  ;;  %v7408_v45 = vld [vmem:[#allocation7 + $0x40] sm:$0xff] }
 0x22a   :  { %9457 = vst [vmem:[#allocation63_spill] sm:$0xff] %v7310_v22  ;;  %v7398_v8 = vadd.f32 %v9477_v44, %v2737_v29  ;;  %v7402_v63 = vadd.f32 %v9479_v54, %v2738_v48  ;;  %v9481_v1 = vld [vmem:[#allocation71_spill] sm:$0xff]  ;;  %v7414_v44 = vld [vmem:[#allocation7 + $0x48] sm:$0xff]  ;;  %v7430_v32 = vadd.f32 %v8677_v0, %v2761_v10  ;;  %v2309_v10 = vmul.f32 %v7408_v45, %v6858_v15 }
 0x22b   :  { %9458 = vst [vmem:[#allocation60_spill] sm:$0xff] %v7314_v33  ;;  %v7412_v3 = vmul.f32 %v7408_v45, %v9481_v1  ;;  %v7418_v54 = vmul.f32 %v7414_v44, %v9481_v1  ;;  %v9482_v29 = vld [vmem:[#allocation72_spill] sm:$0xff]  ;;  %v2285_v1 = vmul.f32 %v7408_v45, %v6855_v25  ;;  %v9489_v0 = vld [vmem:[#allocation51_spill] sm:$0xff]  ;;  %v9501_v22 = vrot.slane %v6899_v16, 1 }
 0x22c   :  { %9459 = vst [vmem:[#allocation33_spill] sm:$0xff] %v7318_v23  ;;  %v7422_v48 = vmul.f32 %v7408_v45, %v9482_v29  ;;  %v7426_v38 = vmul.f32 %v7414_v44, %v9482_v29  ;;  %v9487_v29 = vrot.slane %v7366_v31, 2 }
 0x22d   :  { %9460 = vst [vmem:[#allocation17_spill] sm:$0xff] %v7326_v47 }
 0x22e   :  { %9461 = vst [vmem:[#allocation34_spill] sm:$0xff] %v7330_v40  ;;  %v9494_v40 = vld [vmem:[#allocation22_spill] sm:$0xff] }
 0x22f   :  { %9462 = vst [vmem:[#allocation84_spill] sm:$0xff] %v7334_v39 }
 0x230   :  { %9463 = vst [vmem:[#allocation65_spill] sm:$0xff] %v7338_v57 }
 0x231   :  { %9464 = vst [vmem:[#allocation61_spill] sm:$0xff] %v7354_v18 }
 0x232   :  { %9465 = vst [vmem:[#allocation62_spill] sm:$0xff] %v7358_v51 }
 0x233   :  { %9466 = vst [vmem:[#allocation88_spill] sm:$0xff] %v7362_v36 }
 0x234   :  { %9467 = vst [vmem:[#allocation25_spill] sm:$0xff] %v7366_v31 }
 0x235   :  { %9468 = vst [vmem:[#allocation89_spill] sm:$0xff] %v7374_v34 }
 0x236   :  { %9469 = vst [vmem:[#allocation66_spill] sm:$0xff] %v7378_v56 }
 0x237   :  { %9470 = vst [vmem:[#allocation90_spill] sm:$0xff] %v7382_v59  ;;  %v2293_v59 = vrot.slane %v2285_v1, 1  ;;  %v9495_v1 = vld [vmem:[#allocation39_spill] sm:$0xff] }
 0x238   :  { %9472 = vst [vmem:[#allocation27_spill] sm:$0xff] %v7386_v19  ;;  %v7446_v19 = vadd.f32 %v9487_v29, %v2786_v55  ;;  %v9490_v55 = vld [vmem:[#allocation64_spill] sm:$0xff]  ;;  %v2405_v47 = vmul.f32 %v7408_v45, %v9495_v1  ;;  %v2406_v23 = vmul.f32 %v7414_v44, %v9495_v1  ;;  %v9502_v1 = vrot.slane %v6908_v41, 1 }
 0x239   :  { %9474 = vst [vmem:[#allocation91_spill] sm:$0xff] %v7390_v27  ;;  %v7462_v29 = vmul.f32 %v7408_v45, %v9490_v55 }
 0x23a   :  { %9476 = vst [vmem:[#allocation94_spill] sm:$0xff] %v7394_v5  ;;  %v9485_v5 = vrot.slane %v7362_v36, 2  ;;  %v2413_v20 = vrot.slane %v2405_v47, 1 }
 0x23b   :  { %9478 = vst [vmem:[#allocation95_spill] sm:$0xff] %v7398_v8  ;;  %v2286_v8 = vmul.f32 %v7414_v44, %v6855_v25  ;;  %v2334_v25 = vmul.f32 %v7414_v44, %v6872_v43 }
 0x23c   :  { %9480 = vst [vmem:[#allocation96_spill] sm:$0xff] %v7402_v63  ;;  %v7434_v63 = vadd.f32 %v8676_v61, %v2762_v62  ;;  %v7442_v27 = vadd.f32 %v9485_v5, %v2785_v4  ;;  %v2310_v62 = vmul.f32 %v7414_v44, %v6858_v15  ;;  %v2333_v61 = vmul.f32 %v7408_v45, %v6872_v43  ;;  %v9491_v15 = vld [vmem:[#allocation86_spill] sm:$0xff] }
 0x23d   :  { %9483 = vst [vmem:[#allocation71_spill] sm:$0xff] %v7430_v32  ;;  %v2357_v4 = vmul.f32 %v7408_v45, %v9489_v0  ;;  %v2358_v5 = vmul.f32 %v7414_v44, %v9489_v0  ;;  %v7474_v43 = vmul.f32 %v7414_v44, %v9491_v15  ;;  %v2296_v56 = vrot.slane %v2286_v8, 1 }
 0x23e   :  { %9484 = vst [vmem:[#allocation72_spill] sm:$0xff] %v7434_v63  ;;  %v9492_v63 = vld [vmem:[#allocation24_spill] sm:$0xff]  ;;  %v2320_v36 = vrot.slane %v2310_v62, 1  ;;  %v2341_v51 = vrot.slane %v2333_v61, 1  ;;  %v2344_v18 = vrot.slane %v2334_v25, 1  ;;  %v2382_v8 = vmul.f32 %v7414_v44, %v9494_v40  ;;  %v9498_v61 = vld [vmem:[#allocation11_spill] sm:$0xff] }
 0x23f   :  { %9486 = vst [vmem:[#allocation97_spill] sm:$0xff] %v7442_v27  ;;  %v7470_v27 = vmul.f32 %v7408_v45, %v9491_v15  ;;  %v7478_v32 = vmul.f32 %v7408_v45, %v9492_v63  ;;  %v7482_v0 = vmul.f32 %v7414_v44, %v9492_v63  ;;  %v2317_v15 = vrot.slane %v2309_v10, 1 }
 0x240   :  { %9488 = vst [vmem:[#allocation98_spill] sm:$0xff] %v7446_v19  ;;  %v7466_v19 = vmul.f32 %v7414_v44, %v9490_v55  ;;  %v9493_v55 = vld [vmem:[#allocation87_spill] sm:$0xff]  ;;  %v2365_v57 = vrot.slane %v2357_v4, 1  ;;  %v2368_v39 = vrot.slane %v2358_v5, 1  ;;  %v2381_v63 = vmul.f32 %v7408_v45, %v9494_v40  ;;  %v9500_v4 = vld [vmem:[#allocation40_spill] sm:$0xff] }
 0x241   :  { %v7486_v34 = vmul.f32 %v7408_v45, %v9493_v55  ;;  %v7490_v31 = vmul.f32 %v7414_v44, %v9493_v55  ;;  %v9496_v55 = vld [vmem:[#allocation29_spill] sm:$0xff]  ;;  %v9499_v62 = vrot.slane %v9498_v61, 1  ;;  %v2429_v5 = vmul.f32 %v7408_v45, %v9500_v4 }
 0x242   :  { %v9497_v33 = vrot.slane %v9496_v55, 1  ;;  %v2430_v40 = vmul.f32 %v7414_v44, %v9500_v4  ;;  %v2319_v7 = vsel %vm141_vm0, %v2317_v15, %v9501_v22  ;;  %v2322_v55 = vsel %vm141_vm0, %v2320_v36, %v9502_v1 }
 0x243   :  { %v2298_v25 = vsel %vm141_vm0, %v2296_v56, %v9499_v62  ;;  %v2454_v56 = vmul.f32 %v7414_v44, %v9503_v13  ;;  %v9506_v4 = vrot.slane %v6916_v42, 1  ;;  %v9508_v22 = vrot.slane %v9507_v11, 1 }
 0x244   :  { %v2295_v10 = vsel %vm141_vm0, %v2293_v59, %v9497_v33  ;;  %v2453_v33 = vmul.f32 %v7408_v45, %v9503_v13  ;;  %v9504_v59 = vld [vmem:[#allocation30_spill] sm:$0xff]  ;;  %v9509_v36 = vrot.slane %v6932_v46, 1  ;;  %v2389_v1 = vrot.slane %v2381_v63, 1 }
 0x245   :  { %v9505_v61 = vrot.slane %v9504_v59, 1  ;;  %v2346_v16 = vsel %vm141_vm0, %v2344_v18, %v9506_v4  ;;  %v2367_v41 = vsel %vm141_vm0, %v2365_v57, %v9508_v22  ;;  %v2392_v14 = vrot.slane %v2382_v8, 1  ;;  %v9513_v63 = vld [vmem:[#allocation46_spill] sm:$0xff] }
 0x246   :  { %v2370_v15 = vsel %vm141_vm0, %v2368_v39, %v9509_v36  ;;  %v2416_v13 = vrot.slane %v2406_v23, 1  ;;  %v2437_v6 = vrot.slane %v2429_v5, 2  ;;  %v2440_v59 = vrot.slane %v2430_v40, 2  ;;  %v9512_v39 = vld [vmem:[#allocation57_spill] sm:$0xff]  ;;  %v9517_v22 = vld [vmem:[#allocation58_spill] sm:$0xff] }
 0x247   :  { %v2343_v62 = vsel %vm141_vm0, %v2341_v51, %v9505_v61  ;;  %v2477_v51 = vmul.f32 %v7408_v45, %v9510_v12  ;;  %v2478_v42 = vmul.f32 %v7414_v44, %v9510_v12  ;;  %v2461_v18 = vrot.slane %v2453_v33, 2  ;;  %v9511_v61 = vld [vmem:[#allocation42_spill] sm:$0xff]  ;;  %v9515_v33 = vld [vmem:[#allocation43_spill] sm:$0xff] }
 0x248   :  { %v2464_v11 = vrot.slane %v2454_v56, 2  ;;  %v2501_v57 = vmul.f32 %v7408_v45, %v9511_v61  ;;  %v2502_v46 = vmul.f32 %v7414_v44, %v9511_v61  ;;  %v2525_v47 = vmul.f32 %v7408_v45, %v9512_v39 }
 0x249   :  { %v2526_v23 = vmul.f32 %v7414_v44, %v9512_v39  ;;  %v2549_v8 = vmul.f32 %v7408_v45, %v9513_v63  ;;  %v2550_v12 = vmul.f32 %v7414_v44, %v9513_v63  ;;  %v9514_v5 = vrot.slane %v6978_v17, 1  ;;  %v9520_v45 = vld [vmem:[#allocation44_spill] sm:$0xff] }
 0x24a   :  { %v9516_v56 = vrot.slane %v9515_v33, 1  ;;  %v9518_v36 = vrot.slane %v9517_v22, 1  ;;  %v9519_v39 = vrot.slane %v6998_v52, 1  ;;  %v9521_v2 = vrot.slane %v9520_v45, 2  ;;  %v9523_v33 = vld [vmem:[#allocation79_spill] sm:$0xff]  ;;  %v9525_v22 = vld [vmem:[#allocation37_spill] sm:$0xff] }
 0x24b   :  { %v2391_v40 = vsel %vm141_vm0, %v2389_v1, %v9514_v5  ;;  %v9522_v17 = vrot.slane %v7014_v28, 2  ;;  %v2485_v63 = vrot.slane %v2477_v51, 2  ;;  %v2488_v5 = vrot.slane %v2478_v42, 2  ;;  %v9529_v42 = vld [vmem:[#allocation28_spill] sm:$0xff] }
 0x24c   :  { %v2394_v4 = vsel %vm141_vm0, %v2392_v14, %v9516_v56  ;;  %v2415_v61 = vsel %vm141_vm0, %v2413_v20, %v9518_v36  ;;  %v2418_v60 = vsel %vm141_vm0, %v2416_v13, %v9519_v39  ;;  %v2439_v44 = vsel %vm286_vm1, %v2437_v6, %v9521_v2  ;;  %v9527_v6 = vld [vmem:[#allocation12_spill] sm:$0xff] }
 0x24d   :  { %v2442_v1 = vsel %vm286_vm1, %v2440_v59, %v9522_v17  ;;  %v9524_v14 = vrot.slane %v9523_v33, 2  ;;  %v9526_v20 = vrot.slane %v9525_v22, 2  ;;  %v2509_v36 = vrot.slane %v2501_v57, 2  ;;  %v9528_v59 = vld [vmem:[#allocation92_spill] sm:$0xff]  ;;  %v9537_v22 = vld [vmem:[#allocation49_spill] sm:$0xff] }
 0x24e   :  { %v2512_v13 = vrot.slane %v2502_v46, 2  ;;  %v2533_v39 = vrot.slane %v2525_v47, 2  ;;  %v2536_v45 = vrot.slane %v2526_v23, 2  ;;  %v2557_v50 = vrot.slane %v2549_v8, 2  ;;  %v9533_v23 = vld [vmem:[#allocation13_spill] sm:$0xff]  ;;  %v9534_v8 = vld [vmem:[#allocation23_spill] sm:$0xff] }
 0x24f   :  { %v2463_v56 = vsel %vm286_vm1, %v2461_v18, %v9524_v14  ;;  %v2466_v52 = vsel %vm286_vm1, %v2464_v11, %v9526_v20  ;;  %v2560_v2 = vrot.slane %v2550_v12, 2  ;;  %v2229_v28 = vadd.f32 %v7412_v3, %v9527_v6  ;;  %v9530_v18 = vld [vmem:[#allocation93_spill] sm:$0xff]  ;;  %v9535_v12 = vld [vmem:[#allocation15_spill] sm:$0xff]  ;;  %v9536_v14 = vld [vmem:[#allocation32_spill] sm:$0xff] }
 0x250   :  { %v2230_v51 = vadd.f32 %v7418_v54, %v9528_v59  ;;  %v2239_v17 = vadd.f32 %v7422_v48, %v9529_v42  ;;  %v2240_v33 = vadd.f32 %v7426_v38, %v9530_v18  ;;  %v9531_v11 = vrot.slane %v7028_v35, 2  ;;  %v9541_v6 = vld [vmem:[#allocation53_spill] sm:$0xff] }
 0x251   :  { %v9532_v46 = vrot.slane %v7032_v24, 2  ;;  %v2249_v3 = vadd.f32 %v7462_v29, %v9533_v23  ;;  %v2250_v54 = vadd.f32 %v7466_v19, %v9534_v8  ;;  %v2259_v48 = vadd.f32 %v7470_v27, %v9535_v12  ;;  %v9543_v27 = vld [vmem:[#allocation50_spill] sm:$0xff]  ;;  %v9547_v12 = vld [vmem:[#allocation19_spill] sm:$0xff] }
 0x252   :  { %v2487_v57 = vsel %vm286_vm1, %v2485_v63, %v9531_v11  ;;  %v2260_v38 = vadd.f32 %v7474_v43, %v9536_v14  ;;  %v2269_v35 = vadd.f32 %v7478_v32, %v9537_v22  ;;  %v9538_v63 = vld [vmem:[#allocation35_spill] sm:$0xff]  ;;  %v9542_v19 = vrot.slane %v9541_v6, 2  ;;  %v9544_v43 = vld [vmem:[#allocation36_spill] sm:$0xff]  ;;  %v9545_v23 = vld [vmem:[#allocation38_spill] sm:$0xff] }
 0x253   :  { %v2490_v47 = vsel %vm286_vm1, %v2488_v5, %v9532_v46  ;;  %v2270_v24 = vadd.f32 %v7482_v0, %v9538_v63  ;;  %v9539_v5 = vld [vmem:[#allocation52_spill] sm:$0xff]  ;;  %v2279_v42 = vadd.f32 %v7486_v34, %v9543_v27  ;;  %v2280_v18 = vadd.f32 %v7490_v31, %v9544_v43  ;;  %v2576_v34 = vpop.permute.xlu0 %2575 }
 0x254   :  { %v9540_v20 = vrot.slane %v9539_v5, 2  ;;  %v2514_v59 = vsel %vm286_vm1, %v2512_v13, %v9542_v19  ;;  %v2303_v32 = vadd.f32 %v2295_v10, %v2229_v28  ;;  %v2304_v0 = vadd.f32 %v2298_v25, %v2230_v51  ;;  %v9549_v19 = vld [vmem:[#allocation54_spill] sm:$0xff]  ;;  %v9551_v25 = vld [vmem:[#allocation20_spill] sm:$0xff] }
 0x255   :  { %v2327_v11 = vadd.f32 %v2319_v7, %v2239_v17  ;;  %v2328_v46 = vadd.f32 %v2322_v55, %v2240_v33  ;;  %v9546_v8 = vrot.slane %v9545_v23, 2  ;;  %v9548_v14 = vrot.slane %v9547_v12, 2  ;;  %v9558_v27 = vld [vmem:[#allocation56_spill] sm:$0xff] }
 0x256   :  { %v2511_v29 = vsel %vm286_vm1, %v2509_v36, %v9540_v20  ;;  %v2351_v22 = vadd.f32 %v2343_v62, %v2249_v3  ;;  %v2352_v63 = vadd.f32 %v2346_v16, %v2250_v54  ;;  %v2375_v5 = vadd.f32 %v2367_v41, %v2259_v48  ;;  %v9556_v48 = vld [vmem:[#allocation55_spill] sm:$0xff] }
 0x257   :  { %v2535_v36 = vsel %vm286_vm1, %v2533_v39, %v9546_v8  ;;  %v2538_v13 = vsel %vm286_vm1, %v2536_v45, %v9548_v14  ;;  %v2376_v20 = vadd.f32 %v2370_v15, %v2260_v38  ;;  %v2399_v31 = vadd.f32 %v2391_v40, %v2269_v35  ;;  %v9553_v40 = vld [vmem:[#allocation18_spill] sm:$0xff] }
 0x258   :  { %v2400_v6 = vadd.f32 %v2394_v4, %v2270_v24  ;;  %v9550_v10 = vrot.slane %v9549_v19, 2  ;;  %v9552_v55 = vrot.slane %v9551_v25, 2  ;;  %v2423_v39 = vadd.f32 %v2415_v61, %v2279_v42  ;;  %v9557_v24 = vld [vmem:[#allocation21_spill] sm:$0xff] }
 0x259   :  { %v2424_v51 = vadd.f32 %v2418_v60, %v2280_v18  ;;  %v2447_v45 = vadd.f32 %v2439_v44, %v2303_v32  ;;  %v2448_v62 = vadd.f32 %v2442_v1, %v2304_v0  ;;  %v2471_v16 = vadd.f32 %v2463_v56, %v2327_v11 }
 0x25a   :  { %v2559_v7 = vsel %vm286_vm1, %v2557_v50, %v9550_v10  ;;  %v2562_v28 = vsel %vm286_vm1, %v2560_v2, %v9552_v55  ;;  %v2472_v17 = vadd.f32 %v2466_v52, %v2328_v46  ;;  %v2495_v41 = vadd.f32 %v2487_v57, %v2351_v22  ;;  %v9555_v57 = vld [vmem:[#allocation26_spill] sm:$0xff]  ;;  %v9559_v46 = vld [vmem:[#allocation80_spill] sm:$0xff] }
 0x25b   :  { %v2496_v15 = vadd.f32 %v2490_v47, %v2352_v63  ;;  %v7627_v33 = vsel %vm431_vm2, %v9553_v40, %v2576_v34  ;;  %v7632_v50 = vsel %vm431_vm2, %v2576_v34, %v9553_v40  ;;  %v2519_v61 = vadd.f32 %v2511_v29, %v2375_v5  ;;  %v9561_v5 = vld [vmem:[#allocation47_spill] sm:$0xff] }
 0x25c   :  { %v2520_v2 = vadd.f32 %v2514_v59, %v2376_v20  ;;  %v2543_v60 = vadd.f32 %v2535_v36, %v2399_v31  ;;  %v2544_v3 = vadd.f32 %v2538_v13, %v2400_v6  ;;  %v2567_v44 = vadd.f32 %v2559_v7, %v2423_v39  ;;  %v9560_v36 = vld [vmem:[#allocation81_spill] sm:$0xff]  ;;  %v9562_v6 = vld [vmem:[#allocation48_spill] sm:$0xff] }
 0x25d   :  { %v2568_v1 = vadd.f32 %v2562_v28, %v2424_v51  ;;  %v7635_v56 = vstv %s7598_s26  ;;  %v7638_v52 = vstv %s7610_s27  ;;  %v2585_v47 = vmul.f32 %v9555_v57, %v7627_v33  ;;  %v9563_v7 = vld [vmem:[#allocation69_spill] sm:$0xff] }
 0x25e   :  { %v2586_v54 = vmul.f32 %v9555_v57, %v7632_v50  ;;  %v2595_v38 = vmul.f32 %v9556_v48, %v7627_v33  ;;  %v2596_v35 = vmul.f32 %v9556_v48, %v7632_v50  ;;  %v2605_v29 = vmul.f32 %v9557_v24, %v7627_v33  ;;  %v9564_v28 = vld [vmem:[#allocation73_spill] sm:$0xff] }
 0x25f   :  { %v2606_v59 = vmul.f32 %v9557_v24, %v7632_v50  ;;  %v2615_v42 = vmul.f32 %v9558_v27, %v7627_v33  ;;  %v2616_v43 = vmul.f32 %v9558_v27, %v7632_v50  ;;  %v2589_v18 = vadd.f32 %v2585_v47, %v2447_v45 }
 0x260   :  { %v2590_v32 = vadd.f32 %v2586_v54, %v2448_v62  ;;  %v2599_v0 = vadd.f32 %v2595_v38, %v2471_v16  ;;  %v2600_v11 = vadd.f32 %v2596_v35, %v2472_v17  ;;  %v2645_v23 = vmul.f32 %v9559_v46, %v7627_v33 }
 0x261   :  { %v2646_v8 = vmul.f32 %v9559_v46, %v7632_v50  ;;  %v2669_v12 = vmul.f32 %v9560_v36, %v7627_v33  ;;  %v2670_v14 = vmul.f32 %v9560_v36, %v7632_v50  ;;  %v2609_v13 = vadd.f32 %v2605_v29, %v2495_v41 }
 0x262   :  { %v2610_v22 = vadd.f32 %v2606_v59, %v2496_v15  ;;  %v2619_v63 = vadd.f32 %v2615_v42, %v2519_v61  ;;  %v2620_v34 = vadd.f32 %v2616_v43, %v2520_v2  ;;  %v2625_v20 = vmul.f32 %v9561_v5, %v7627_v33 }
 0x263   :  { %v2626_v31 = vmul.f32 %v9561_v5, %v7632_v50  ;;  %v2635_v19 = vmul.f32 %v9562_v6, %v7627_v33  ;;  %v2636_v10 = vmul.f32 %v9562_v6, %v7632_v50  ;;  %v2693_v25 = vmul.f32 %v9563_v7, %v7627_v33 }
 0x264   :  { %v2694_v55 = vmul.f32 %v9563_v7, %v7632_v50  ;;  %v2717_v39 = vmul.f32 %v9564_v28, %v7627_v33  ;;  %v2718_v51 = vmul.f32 %v9564_v28, %v7632_v50  ;;  %v2653_v45 = vrot.slane %v2645_v23, 1  ;;  %v9576_v7 = vld [vmem:[#allocation70_spill] sm:$0xff] }
 0x265   :  { %v2656_v62 = vrot.slane %v2646_v8, 1  ;;  %v2677_v16 = vrot.slane %v2669_v12, 1  ;;  %v2680_v17 = vrot.slane %v2670_v14, 1  ;;  %v2629_v41 = vadd.f32 %v2625_v20, %v2543_v60  ;;  %v9573_v12 = vld [vmem:[#allocation76_spill] sm:$0xff] }
 0x266   :  { %v2630_v15 = vadd.f32 %v2626_v31, %v2544_v3  ;;  %v2639_v40 = vadd.f32 %v2635_v19, %v2567_v44  ;;  %v2640_v61 = vadd.f32 %v2636_v10, %v2568_v1  ;;  %v2741_v2 = vmul.f32 %v7117_v26, %v7627_v33 }
 0x267   :  { %v2742_v57 = vmul.f32 %v7117_v26, %v7632_v50  ;;  %v2765_v47 = vmul.f32 %v7120_v53, %v7627_v33  ;;  %v2766_v54 = vmul.f32 %v7120_v53, %v7632_v50  ;;  %v2701_v60 = vrot.slane %v2693_v25, 1 }
 0x268   :  { %v2704_v3 = vrot.slane %v2694_v55, 1  ;;  %v2725_v44 = vrot.slane %v2717_v39, 1  ;;  %v2728_v1 = vrot.slane %v2718_v51, 1  ;;  %v9565_v48 = vrot.slane %v7234_v21, 1  ;;  %v9579_v55 = vld [vmem:[#allocation78_spill] sm:$0xff]  ;;  %v9581_v51 = vld [vmem:[#allocation16_spill] sm:$0xff] }
 0x269   :  { %v9566_v26 = vrot.slane %v7238_v30, 1  ;;  %v9567_v24 = vrot.slane %v7242_v37, 1  ;;  %v9568_v29 = vrot.slane %v7246_v49, 1  ;;  %v2749_v30 = vrot.slane %v2741_v2, 1 }
 0x26a   :  { %v2655_v38 = vsel %vm141_vm0, %v2653_v45, %v9565_v48  ;;  %v2752_v37 = vrot.slane %v2742_v57, 1  ;;  %v2773_v46 = vrot.slane %v2765_v47, 1  ;;  %v2776_v23 = vrot.slane %v2766_v54, 1  ;;  %v9585_v57 = vld [vmem:[#allocation67_spill] sm:$0xff] }
 0x26b   :  { %v2658_v35 = vsel %vm141_vm0, %v2656_v62, %v9566_v26  ;;  %v2679_v53 = vsel %vm141_vm0, %v2677_v16, %v9567_v24  ;;  %v2682_v59 = vsel %vm141_vm0, %v2680_v17, %v9568_v29  ;;  %v7716_v27 = vadd.f32 %v2655_v38, %v2589_v18  ;;  %v9583_v16 = vld [vmem:[#allocation85_spill] sm:$0xff]  ;;  %v9588_v26 = vld [vmem:[#allocation83_spill] sm:$0xff] }
 0x26c   :  { %v7718_v42 = vadd.f32 %v2658_v35, %v2590_v32  ;;  %v7720_v21 = vadd.f32 %v2679_v53, %v2599_v0  ;;  %v7722_v43 = vadd.f32 %v2682_v59, %v2600_v11  ;;  %v9569_v49 = vrot.slane %v7250_v58, 1  ;;  %v9571_v0 = vld [vmem:[#allocation75_spill] sm:$0xff] }
 0x26d   :  { %v9570_v18 = vrot.slane %v7254_v9, 1  ;;  %v9572_v36 = vrot.slane %v9571_v0, 1  ;;  %v9574_v14 = vrot.slane %v9573_v12, 1  ;;  %v9575_v9 = vld [vmem:[#allocation74_spill] sm:$0xff]  ;;  %v2813_v25 = vmul.f32 %v9576_v7, %v7627_v33 }
 0x26e   :  { %v2703_v8 = vsel %vm141_vm0, %v2701_v60, %v9569_v49  ;;  %v2789_v19 = vmul.f32 %v9575_v9, %v7627_v33  ;;  %v2790_v10 = vmul.f32 %v9575_v9, %v7632_v50  ;;  %v9580_v28 = vrot.slane %v9579_v55, 1  ;;  %v9586_v60 = vld [vmem:[#allocation68_spill] sm:$0xff] }
 0x26f   :  { %v2706_v32 = vsel %vm141_vm0, %v2704_v3, %v9570_v18  ;;  %v2727_v11 = vsel %vm141_vm0, %v2725_v44, %v9572_v36  ;;  %v2730_v5 = vsel %vm141_vm0, %v2728_v1, %v9574_v14  ;;  %v7742_v20 = vadd.f32 %v2703_v8, %v2609_v13  ;;  %v9587_v1 = vld [vmem:[#allocation82_spill] sm:$0xff] }
 0x270   :  { %v7744_v31 = vadd.f32 %v2706_v32, %v2610_v22  ;;  %v7746_v58 = vadd.f32 %v2727_v11, %v2619_v63  ;;  %v7748_v6 = vadd.f32 %v2730_v5, %v2620_v34  ;;  %v2814_v13 = vmul.f32 %v9576_v7, %v7632_v50  ;;  %v9577_v22 = vld [vmem:[#allocation77_spill] sm:$0xff] }
 0x271   :  { %v9578_v63 = vrot.slane %v9577_v22, 1  ;;  %v2754_v39 = vsel %vm141_vm0, %v2752_v37, %v9580_v28  ;;  %v9582_v45 = vrot.slane %v9581_v51, 1  ;;  %v9584_v17 = vrot.slane %v9583_v16, 1  ;;  %v2932_v37 = vpop.permute.xlu2 %2931  ;;  %v9591_v28 = vld [vmem:[#allocation59_spill] sm:$0xff] }
 0x272   :  { %v2837_v47 = vmul.f32 %v9585_v57, %v7627_v33  ;;  %v2838_v54 = vmul.f32 %v9585_v57, %v7632_v50  ;;  %v2861_v3 = vmul.f32 %v9586_v60, %v7627_v33  ;;  %v2862_v44 = vmul.f32 %v9586_v60, %v7632_v50 }
 0x273   :  { %v2751_v34 = vsel %vm141_vm0, %v2749_v30, %v9578_v63  ;;  %v2775_v62 = vsel %vm141_vm0, %v2773_v46, %v9582_v45  ;;  %v2778_v2 = vsel %vm141_vm0, %v2776_v23, %v9584_v17  ;;  %v2885_v48 = vmul.f32 %v9587_v1, %v7627_v33  ;;  %v9593_v45 = vld [vmem:[#allocation63_spill] sm:$0xff]  ;;  %v9595_v17 = vld [vmem:[#allocation60_spill] sm:$0xff] }
 0x274   :  { %v2886_v38 = vmul.f32 %v9587_v1, %v7632_v50  ;;  %v7792_v35 = vmul.f32 %v9588_v26, %v7627_v33  ;;  %v7796_v24 = vmul.f32 %v9588_v26, %v7632_v50  ;;  %v2759_v53 = vadd.f32 %v2751_v34, %v2629_v41  ;;  %v9599_v26 = vld [vmem:[#allocation17_spill] sm:$0xff] }
 0x275   :  { %v2760_v29 = vadd.f32 %v2754_v39, %v2630_v15  ;;  %v2783_v59 = vadd.f32 %v2775_v62, %v2639_v40  ;;  %v2784_v30 = vadd.f32 %v2778_v2, %v2640_v61  ;;  %v2797_v46 = vrot.slane %v2789_v19, 2 }
 0x276   :  { %v2800_v23 = vrot.slane %v2790_v10, 2  ;;  %v2821_v33 = vrot.slane %v2813_v25, 2  ;;  %v2824_v49 = vrot.slane %v2814_v13, 2  ;;  %v2845_v50 = vrot.slane %v2837_v47, 2  ;;  %v9597_v47 = vld [vmem:[#allocation33_spill] sm:$0xff] }
 0x277   :  { %v2848_v8 = vrot.slane %v2838_v54, 2  ;;  %v2869_v41 = vrot.slane %v2861_v3, 2  ;;  %v2872_v15 = vrot.slane %v2862_v44, 2  ;;  %v2893_v40 = vrot.slane %v2885_v48, 2  ;;  %v2936_v3 = vpop.permute.xlu1 %2935 }
 0x278   :  { %v2896_v61 = vrot.slane %v2886_v38, 2  ;;  %v2917_v18 = vrot.slane %v7792_v35, 2  ;;  %v2920_v32 = vrot.slane %v7796_v24, 2  ;;  %v7803_v0 = vstv %s7664_s28 }
 0x279   :  { %v7806_v36 = vstv %s7674_s29  ;;  %v7809_v11 = vstv %s7684_s30  ;;  %v7812_v12 = vstv %s7686_s4  ;;  %v7815_v14 = vstv %s7688_s5 }
 0x27a   :  { %v7818_v5 = vstv %s7698_s6  ;;  %v7821_v9 = vstv %s7700_s7  ;;  %v7824_v19 = vstv %s7714_s8  ;;  %v7827_v10 = vstv %s7724_s9 }
 0x27b   :  { %v7830_v7 = vstv %s7726_s10  ;;  %v7833_v25 = vstv %s7740_s11  ;;  %v7836_v13 = vstv %s7750_s12  ;;  %v7839_v22 = vstv %s7760_s13 }
 0x27c   :  { %v7842_v63 = vstv %s7774_s14  ;;  %v7845_v34 = vstv %s7784_s15  ;;  %v7848_v55 = vstv %s7798_s16  ;;  %v9592_v39 = vrot.slane %v9591_v28, 2  ;;  %v9603_v28 = vld [vmem:[#allocation84_spill] sm:$0xff] }
 0x27d   :  { %9589 = vst [vmem:[#allocation51_spill] sm:$0xff] %v7845_v34  ;;  %v9594_v62 = vrot.slane %v9593_v45, 2  ;;  %v9596_v2 = vrot.slane %v9595_v17, 2  ;;  %v9598_v54 = vrot.slane %v9597_v47, 2  ;;  %v9600_v35 = vrot.slane %v9599_v26, 2  ;;  %v9605_v45 = vld [vmem:[#allocation65_spill] sm:$0xff] }
 0x27e   :  { %9590 = vst [vmem:[#allocation64_spill] sm:$0xff] %v7848_v55  ;;  %v2799_v51 = vsel %vm286_vm1, %v2797_v46, %v9592_v39  ;;  %v9601_v46 = vld [vmem:[#allocation34_spill] sm:$0xff]  ;;  %v9604_v39 = vrot.slane %v9603_v28, 2  ;;  %v9607_v17 = vld [vmem:[#allocation61_spill] sm:$0xff] }
 0x27f   :  { %v2802_v16 = vsel %vm286_vm1, %v2800_v23, %v9594_v62  ;;  %v2823_v57 = vsel %vm286_vm1, %v2821_v33, %v9596_v2  ;;  %v2826_v60 = vsel %vm286_vm1, %v2824_v49, %v9598_v54  ;;  %v2807_v44 = vadd.f32 %v2799_v51, %v7716_v27  ;;  %v2938_v62 = vpop.permute.xlu2 %2937  ;;  %v9613_v26 = vld [vmem:[#allocation25_spill] sm:$0xff] }
 0x280   :  { %v2808_v1 = vadd.f32 %v2802_v16, %v7718_v42  ;;  %v2831_v48 = vadd.f32 %v2823_v57, %v7720_v21  ;;  %v2832_v38 = vadd.f32 %v2826_v60, %v7722_v43  ;;  %v2847_v24 = vsel %vm286_vm1, %v2845_v50, %v9600_v35  ;;  %v2934_v16 = vpop.permute.xlu0 %2933  ;;  %v9609_v57 = vld [vmem:[#allocation62_spill] sm:$0xff] }
 0x281   :  { %v9602_v23 = vrot.slane %v9601_v46, 2  ;;  %v2871_v49 = vsel %vm286_vm1, %v2869_v41, %v9604_v39  ;;  %v9606_v27 = vrot.slane %v9605_v45, 2  ;;  %v2855_v21 = vadd.f32 %v2847_v24, %v7742_v20 }
 0x282   :  { %v2879_v51 = vadd.f32 %v2871_v49, %v7746_v58  ;;  %v9610_v41 = vrot.slane %v9609_v57, 2  ;;  %v7894_v20 = vsel %vm792_vm3, %v2936_v3, %v2932_v37  ;;  %v7904_v46 = vsel %vm792_vm3, %v2934_v16, %v2938_v62 }
 0x283   :  { %v2850_v33 = vsel %vm286_vm1, %v2848_v8, %v9602_v23  ;;  %v2874_v42 = vsel %vm286_vm1, %v2872_v15, %v9606_v27  ;;  %v9608_v8 = vrot.slane %v9607_v17, 2  ;;  %v7890_v15 = vsel %vm792_vm3, %v2932_v37, %v2936_v3 }
 0x284   :  { %v2856_v43 = vadd.f32 %v2850_v33, %v7744_v31  ;;  %v2880_v50 = vadd.f32 %v2874_v42, %v7748_v6  ;;  %v2898_v47 = vsel %vm286_vm1, %v2896_v61, %v9610_v41  ;;  %v9611_v6 = vld [vmem:[#allocation88_spill] sm:$0xff]  ;;  %v7908_v37 = vsel %vm792_vm3, %v2938_v62, %v2934_v16 }
 0x285   :  { %v2895_v2 = vsel %vm286_vm1, %v2893_v40, %v9608_v8  ;;  %v2904_v58 = vadd.f32 %v2898_v47, %v2760_v29  ;;  %v9612_v54 = vrot.slane %v9611_v6, 2  ;;  %v9614_v40 = vrot.slane %v9613_v26, 2 }
 0x286   :  { %v2903_v31 = vadd.f32 %v2895_v2, %v2759_v53  ;;  %v2945_v53 = vmul.f32 %v7635_v56, %v7890_v15  ;;  %v2946_v29 = vmul.f32 %v7635_v56, %v7894_v20  ;;  %v2966_v4 = vmul.f32 %v7803_v0, %v7894_v20 }
 0x287   :  { %v2919_v60 = vsel %vm286_vm1, %v2917_v18, %v9612_v54  ;;  %v2922_v35 = vsel %vm286_vm1, %v2920_v32, %v9614_v40  ;;  %v2955_v18 = vmul.f32 %v7638_v52, %v7890_v15  ;;  %v2975_v32 = vmul.f32 %v7806_v36, %v7890_v15 }
 0x288   :  { %v2927_v24 = vadd.f32 %v2919_v60, %v2783_v59  ;;  %v2928_v61 = vadd.f32 %v2922_v35, %v2784_v30  ;;  %v2956_v59 = vmul.f32 %v7638_v52, %v7894_v20  ;;  %v2965_v30 = vmul.f32 %v7803_v0, %v7890_v15 }
 0x289   :  { %v2976_v3 = vmul.f32 %v7806_v36, %v7894_v20  ;;  %v7926_v23 = vadd.f32 %v2945_v53, %v2807_v44  ;;  %v7928_v33 = vadd.f32 %v2946_v29, %v2808_v1  ;;  %v7930_v28 = vadd.f32 %v2955_v18, %v2831_v48 }
 0x28a   :  { %v7932_v39 = vadd.f32 %v2956_v59, %v2832_v38  ;;  %v7934_v49 = vadd.f32 %v2965_v30, %v2855_v21  ;;  %v7936_v45 = vadd.f32 %v2966_v4, %v2856_v43  ;;  %v7938_v27 = vadd.f32 %v2975_v32, %v2879_v51 }
 0x28b   :  { %v7940_v42 = vadd.f32 %v2976_v3, %v2880_v50  ;;  %v2985_v62 = vmul.f32 %v7809_v11, %v7890_v15  ;;  %v2986_v44 = vmul.f32 %v7809_v11, %v7894_v20  ;;  %v2995_v1 = vmul.f32 %v7812_v12, %v7890_v15 }
 0x28c   :  { %v2996_v48 = vmul.f32 %v7812_v12, %v7894_v20  ;;  %v7952_v38 = vmul.f32 %v7815_v14, %v7890_v15  ;;  %v7956_v21 = vmul.f32 %v7815_v14, %v7894_v20  ;;  %v7960_v43 = vmul.f32 %v7818_v5, %v7890_v15 }
 0x28d   :  { %v7964_v51 = vmul.f32 %v7818_v5, %v7894_v20  ;;  %v7968_v50 = vmul.f32 %v7821_v9, %v7890_v15  ;;  %v7972_v16 = vmul.f32 %v7821_v9, %v7894_v20  ;;  %v7976_v17 = vmul.f32 %v7824_v19, %v7890_v15 }
 0x28e   :  { %v7980_v8 = vmul.f32 %v7824_v19, %v7894_v20  ;;  %v7982_v2 = vadd.f32 %v2985_v62, %v2903_v31  ;;  %v7984_v57 = vadd.f32 %v2986_v44, %v2904_v58  ;;  %v7988_v41 = vmul.f32 %v7827_v10, %v7890_v15 }
 0x28f   :  { %v7992_v47 = vmul.f32 %v7827_v10, %v7894_v20  ;;  %v7994_v6 = vadd.f32 %v2995_v1, %v2927_v24  ;;  %v7996_v54 = vadd.f32 %v2996_v48, %v2928_v61  ;;  %v8000_v60 = vmul.f32 %v7830_v7, %v7890_v15  ;;  %v9633_v24 = vld [vmem:[#allocation90_spill] sm:$0xff] }
 0x290   :  { %9615 = vst [vmem:[#allocation86_spill] sm:$0xff] %v7982_v2  ;;  %v8004_v31 = vmul.f32 %v7830_v7, %v7894_v20  ;;  %v8018_v30 = vmul.f32 %v7833_v25, %v7890_v15  ;;  %v8022_v4 = vmul.f32 %v7833_v25, %v7894_v20  ;;  %v8028_v62 = vmul.f32 %v7836_v13, %v7890_v15  ;;  %v9639_v2 = vld [vmem:[#allocation96_spill] sm:$0xff] }
 0x291   :  { %9616 = vst [vmem:[#allocation24_spill] sm:$0xff] %v7984_v57  ;;  %v8032_v44 = vmul.f32 %v7836_v13, %v7894_v20  ;;  %v8036_v1 = vmul.f32 %v7839_v22, %v7890_v15  ;;  %v8040_v48 = vmul.f32 %v7839_v22, %v7894_v20  ;;  %v8044_v32 = vmul.f32 %v7842_v63, %v7890_v15 }
 0x292   :  { %9617 = vst [vmem:[#allocation87_spill] sm:$0xff] %v7988_v41  ;;  %v8048_v3 = vmul.f32 %v7842_v63, %v7894_v20  ;;  %v8052_v59 = vmul.f32 %v7845_v34, %v7890_v15  ;;  %v8056_v18 = vmul.f32 %v7845_v34, %v7894_v20  ;;  %v8060_v29 = vmul.f32 %v7848_v55, %v7890_v15 }
 0x293   :  { %9618 = vst [vmem:[#allocation22_spill] sm:$0xff] %v7992_v47  ;;  %v8064_v53 = vmul.f32 %v7848_v55, %v7894_v20  ;;  %v2947_v35 = vmul.f32 %v7635_v56, %v7904_v46  ;;  %v2948_v40 = vmul.f32 %v7635_v56, %v7908_v37  ;;  %v2957_v15 = vmul.f32 %v7638_v52, %v7904_v46  ;;  %v9632_v55 = vld [vmem:[#allocation66_spill] sm:$0xff]  ;;  %v9641_v47 = vld [vmem:[#allocation72_spill] sm:$0xff] }
 0x294   :  { %9619 = vst [vmem:[#allocation39_spill] sm:$0xff] %v7994_v6  ;;  %v2958_v20 = vmul.f32 %v7638_v52, %v7908_v37  ;;  %v3007_v61 = vmul.f32 %v7815_v14, %v7904_v46  ;;  %v3031_v26 = vmul.f32 %v7818_v5, %v7904_v46  ;;  %v8124_v58 = vmul.f32 %v7812_v12, %v7904_v46 }
 0x295   :  { %9620 = vst [vmem:[#allocation29_spill] sm:$0xff] %v7996_v54  ;;  %v2952_v52 = vadd.f32 %v2948_v40, %v9632_v55  ;;  %v3008_v54 = vmul.f32 %v7815_v14, %v7908_v37  ;;  %v2961_v6 = vadd.f32 %v2957_v15, %v9633_v24  ;;  %v2968_v55 = vmul.f32 %v7803_v0, %v7908_v37 }
 0x296   :  { %9621 = vst [vmem:[#allocation11_spill] sm:$0xff] %v8000_v60  ;;  %v9631_v60 = vld [vmem:[#allocation89_spill] sm:$0xff]  ;;  %v2977_v40 = vmul.f32 %v7806_v36, %v7904_v46  ;;  %v2978_v14 = vmul.f32 %v7806_v36, %v7908_v37  ;;  %v2988_v24 = vmul.f32 %v7809_v11, %v7908_v37  ;;  %v3014_v15 = vrot.slane %v3007_v61, 1  ;;  %v9636_v61 = vld [vmem:[#allocation91_spill] sm:$0xff] }
 0x297   :  { %9622 = vst [vmem:[#allocation40_spill] sm:$0xff] %v8004_v31  ;;  %v2951_v57 = vadd.f32 %v2947_v35, %v9631_v60  ;;  %v3032_v31 = vmul.f32 %v7818_v5, %v7908_v37  ;;  %v2967_v60 = vmul.f32 %v7803_v0, %v7904_v46  ;;  %v2987_v35 = vmul.f32 %v7809_v11, %v7904_v46 }
 0x298   :  { %9623 = vst [vmem:[#allocation45_spill] sm:$0xff] %v8036_v1  ;;  %v3055_v5 = vmul.f32 %v7821_v9, %v7904_v46  ;;  %v3017_v0 = vrot.slane %v3008_v54, 1  ;;  %v8120_v36 = vmul.f32 %v7824_v19, %v7908_v37  ;;  %v8128_v11 = vmul.f32 %v7812_v12, %v7908_v37 }
 0x299   :  { %9624 = vst [vmem:[#allocation30_spill] sm:$0xff] %v8040_v48  ;;  %v2971_v54 = vadd.f32 %v2967_v60, %v9636_v61  ;;  %v2982_v48 = vadd.f32 %v2978_v14, %v9639_v2  ;;  %v8138_v41 = vadd.f32 %v2988_v24, %v9641_v47  ;;  %v9642_v12 = vrot.slane %v7952_v38, 1 }
 0x29a   :  { %9625 = vst [vmem:[#allocation14_spill] sm:$0xff] %v8044_v32  ;;  %v3089_v2 = vrot.slane %v8120_v36, 1  ;;  %v3025_v60 = vadd.f32 %v3014_v15, %v2951_v57  ;;  %v9645_v14 = vrot.slane %v7964_v51, 1  ;;  %v3151_v57 = vmul.f32 %v7833_v25, %v7904_v46 }
 0x29b   :  { %9626 = vst [vmem:[#allocation41_spill] sm:$0xff] %v8048_v3  ;;  %v9634_v3 = vld [vmem:[#allocation27_spill] sm:$0xff]  ;;  %v3176_v51 = vmul.f32 %v7836_v13, %v7908_v37 }
 0x29c   :  { %9627 = vst [vmem:[#allocation42_spill] sm:$0xff] %v8052_v59  ;;  %v2962_v56 = vadd.f32 %v2958_v20, %v9634_v3  ;;  %v3056_v3 = vmul.f32 %v7821_v9, %v7908_v37  ;;  %v8116_v20 = vmul.f32 %v7824_v19, %v7904_v46  ;;  %v3041_v9 = vrot.slane %v3032_v31, 1  ;;  %v9638_v59 = vld [vmem:[#allocation95_spill] sm:$0xff] }
 0x29d   :  { %9628 = vst [vmem:[#allocation57_spill] sm:$0xff] %v8056_v18  ;;  %v2981_v32 = vadd.f32 %v2977_v40, %v9638_v59  ;;  %v9640_v19 = vld [vmem:[#allocation71_spill] sm:$0xff]  ;;  %v3015_v31 = vsel %vm141_vm0, %v9642_v12, %v3014_v15  ;;  %v9644_v40 = vrot.slane %v7960_v43, 1  ;;  %v3152_v43 = vmul.f32 %v7833_v25, %v7908_v37 }
 0x29e   :  { %9629 = vst [vmem:[#allocation46_spill] sm:$0xff] %v8060_v29  ;;  %v9637_v29 = vld [vmem:[#allocation94_spill] sm:$0xff]  ;;  %v8135_v1 = vadd.f32 %v2987_v35, %v9640_v19  ;;  %v3065_v34 = vrot.slane %v3056_v3, 1  ;;  %v3086_v59 = vrot.slane %v8116_v20, 1  ;;  %v3042_v38 = vsel %vm141_vm0, %v9645_v14, %v3041_v9 }
 0x29f   :  { %9630 = vst [vmem:[#allocation43_spill] sm:$0xff] %v8064_v53  ;;  %v3038_v53 = vrot.slane %v3031_v26, 1  ;;  %v2972_v18 = vadd.f32 %v2968_v55, %v9637_v29  ;;  %v9643_v26 = vrot.slane %v7956_v21, 1  ;;  %v3026_v55 = vadd.f32 %v3017_v0, %v2952_v52 }
 0x2a0   :  { %9635 = vst [vmem:[#allocation58_spill] sm:$0xff] %v8124_v58  ;;  %v3062_v58 = vrot.slane %v3055_v5, 1  ;;  %v3023_v35 = vadd.f32 %v3015_v31, %v7926_v23  ;;  %v3048_v5 = vadd.f32 %v3042_v38, %v7932_v39  ;;  %v3175_v52 = vmul.f32 %v7836_v13, %v7904_v46 }
 0x2a1   :  { %v3018_v29 = vsel %vm141_vm0, %v9643_v26, %v3017_v0  ;;  %v3039_v47 = vsel %vm141_vm0, %v9644_v40, %v3038_v53  ;;  %v3049_v3 = vadd.f32 %v3038_v53, %v2961_v6  ;;  %v3050_v23 = vadd.f32 %v3041_v9, %v2962_v56 }
 0x2a2   :  { %v3024_v21 = vadd.f32 %v3018_v29, %v7928_v33  ;;  %v3047_v24 = vadd.f32 %v3039_v47, %v7930_v28  ;;  %v9646_v33 = vrot.slane %v7968_v50, 1  ;;  %v9647_v39 = vrot.slane %v7972_v16, 1 }
 0x2a3   :  { %v3073_v0 = vadd.f32 %v3062_v58, %v2971_v54  ;;  %v3074_v20 = vadd.f32 %v3065_v34, %v2972_v18  ;;  %v3158_v36 = vrot.slane %v3151_v57, 2  ;;  %v3161_v25 = vrot.slane %v3152_v43, 2  ;;  %v9654_v43 = vld [vmem:[#allocation51_spill] sm:$0xff] }
 0x2a4   :  { %v3063_v28 = vsel %vm141_vm0, %v9646_v33, %v3062_v58  ;;  %v3066_v15 = vsel %vm141_vm0, %v9647_v39, %v3065_v34  ;;  %v3182_v12 = vrot.slane %v3175_v52, 2  ;;  %v3185_v13 = vrot.slane %v3176_v51, 2  ;;  %v9659_v39 = vld [vmem:[#allocation45_spill] sm:$0xff] }
 0x2a5   :  { %v3071_v61 = vadd.f32 %v3063_v28, %v7934_v49  ;;  %v3072_v19 = vadd.f32 %v3066_v15, %v7936_v45  ;;  %v9648_v6 = vrot.slane %v7976_v17, 1  ;;  %v9649_v53 = vrot.slane %v7980_v8, 1 }
 0x2a6   :  { %v8182_v58 = vmul.f32 %v7827_v10, %v7904_v46  ;;  %v8186_v34 = vmul.f32 %v7827_v10, %v7908_v37  ;;  %v8192_v17 = vmul.f32 %v7830_v7, %v7904_v46  ;;  %v8196_v8 = vmul.f32 %v7830_v7, %v7908_v37 }
 0x2a7   :  { %v3087_v50 = vsel %vm141_vm0, %v9648_v6, %v3086_v59  ;;  %v3090_v16 = vsel %vm141_vm0, %v9649_v53, %v3089_v2  ;;  %v9650_v18 = vrot.slane %v8018_v30, 2  ;;  %v9651_v9 = vrot.slane %v8022_v4, 2  ;;  %v9663_v6 = vld [vmem:[#allocation86_spill] sm:$0xff] }
 0x2a8   :  { %v3095_v49 = vadd.f32 %v3087_v50, %v7938_v27  ;;  %v3096_v45 = vadd.f32 %v3090_v16, %v7940_v42  ;;  %v3169_v54 = vadd.f32 %v3158_v36, %v3025_v60  ;;  %v3170_v27 = vadd.f32 %v3161_v25, %v3026_v55 }
 0x2a9   :  { %v3159_v56 = vsel %vm286_vm1, %v9650_v18, %v3158_v36  ;;  %v3162_v10 = vsel %vm286_vm1, %v9651_v9, %v3161_v25  ;;  %v9652_v26 = vrot.slane %v8028_v62, 2  ;;  %v9653_v40 = vrot.slane %v8032_v44, 2  ;;  %v9661_v25 = vld [vmem:[#allocation30_spill] sm:$0xff]  ;;  %v9666_v9 = vld [vmem:[#allocation64_spill] sm:$0xff] }
 0x2aa   :  { %v3167_v31 = vadd.f32 %v3159_v56, %v3023_v35  ;;  %v3168_v42 = vadd.f32 %v3162_v10, %v3024_v21  ;;  %v3110_v30 = vrot.slane %v8182_v58, 1  ;;  %v3113_v47 = vrot.slane %v8186_v34, 1  ;;  %3293 = vst [vmem:[%s8351_s3 + $0x10] sm:$0x3f] %v3169_v54 }
 0x2ab   :  { %v3183_v29 = vsel %vm286_vm1, %v9652_v26, %v3182_v12  ;;  %v3186_v7 = vsel %vm286_vm1, %v9653_v40, %v3185_v13  ;;  %v3199_v60 = vmul.f32 %v7839_v22, %v7904_v46  ;;  %v3200_v62 = vmul.f32 %v7839_v22, %v7908_v37  ;;  %3294 = vst [vmem:[%s8351_s3 + $0x18] sm:$0x3f] %v3170_v27  ;;  %v9671_v26 = vld [vmem:[#allocation98_spill] sm:$0xff]  ;;  %v9672_v40 = vld [vmem:[#allocation24_spill] sm:$0xff] }
 0x2ac   :  { %v3191_v14 = vadd.f32 %v3183_v29, %v3047_v24  ;;  %v3192_v4 = vadd.f32 %v3186_v7, %v3048_v5  ;;  %v3223_v44 = vmul.f32 %v7842_v63, %v7904_v46  ;;  %v3224_v55 = vmul.f32 %v7842_v63, %v7908_v37  ;;  %3291 = vst [vmem:[%s8351_s3] sm:$0xff] %v3167_v31  ;;  %v9669_v31 = vld [vmem:[#allocation97_spill] sm:$0xff] }
 0x2ad   :  { %v3097_v38 = vadd.f32 %v3086_v59, %v2981_v32  ;;  %v3098_v35 = vadd.f32 %v3089_v2, %v2982_v48  ;;  %v3193_v21 = vadd.f32 %v3182_v12, %v3049_v3  ;;  %v3194_v24 = vadd.f32 %v3185_v13, %v3050_v23  ;;  %3292 = vst [vmem:[%s8351_s3 + $0x8] sm:$0xff] %v3168_v42  ;;  %v9655_v2 = vld [vmem:[#allocation87_spill] sm:$0xff]  ;;  %v9657_v23 = vld [vmem:[#allocation22_spill] sm:$0xff] }
 0x2ae   :  { %v3206_v5 = vrot.slane %v3199_v60, 2  ;;  %v3209_v22 = vrot.slane %v3200_v62, 2  ;;  %v3230_v57 = vrot.slane %v3223_v44, 2  ;;  %v3247_v52 = vmul.f32 %v9654_v43, %v7904_v46  ;;  %3493 = vst [vmem:[%s8351_s3 + $0x20] sm:$0xff] %v3191_v14  ;;  %v9670_v42 = vld [vmem:[#allocation58_spill] sm:$0xff] }
 0x2af   :  { %v3134_v63 = vrot.slane %v8192_v17, 1  ;;  %v3137_v32 = vrot.slane %v8196_v8, 1  ;;  %v3233_v48 = vrot.slane %v3224_v55, 2  ;;  %v3248_v59 = vmul.f32 %v9654_v43, %v7908_v37  ;;  %3494 = vst [vmem:[%s8351_s3 + $0x28] sm:$0xff] %v3192_v4  ;;  %v9664_v17 = vld [vmem:[#allocation14_spill] sm:$0xff]  ;;  %v9673_v4 = vld [vmem:[#allocation11_spill] sm:$0xff] }
 0x2b0   :  { %v9656_v51 = vrot.slane %v9655_v2, 1  ;;  %v9658_v33 = vrot.slane %v9657_v23, 1  ;;  %v9660_v15 = vrot.slane %v9659_v39, 2  ;;  %v9662_v12 = vrot.slane %v9661_v25, 2  ;;  %3495 = vst [vmem:[%s8351_s3 + $0x30] sm:$0x3f] %v3193_v21 }
 0x2b1   :  { %v3217_v58 = vadd.f32 %v3206_v5, %v3073_v0  ;;  %v3218_v34 = vadd.f32 %v3209_v22, %v3074_v20  ;;  %v9665_v8 = vrot.slane %v9664_v17, 2  ;;  %v3254_v56 = vrot.slane %v3247_v52, 2  ;;  %3496 = vst [vmem:[%s8351_s3 + $0x38] sm:$0x3f] %v3194_v24  ;;  %v9677_v24 = vld [vmem:[#allocation42_spill] sm:$0xff] }
 0x2b2   :  { %v3111_v3 = vsel %vm141_vm0, %v9656_v51, %v3110_v30  ;;  %v3114_v28 = vsel %vm141_vm0, %v9658_v33, %v3113_v47  ;;  %v3207_v36 = vsel %vm286_vm1, %v9660_v15, %v3206_v5  ;;  %v3210_v13 = vsel %vm286_vm1, %v9662_v12, %v3209_v22  ;;  %v9683_v33 = vld [vmem:[#allocation46_spill] sm:$0xff]  ;;  %v9685_v15 = vld [vmem:[#allocation43_spill] sm:$0xff] }
 0x2b3   :  { %v3119_v50 = vadd.f32 %v3111_v3, %v9663_v6  ;;  %v3215_v53 = vadd.f32 %v3207_v36, %v3071_v61  ;;  %v3216_v16 = vadd.f32 %v3210_v13, %v3072_v19  ;;  %v3231_v18 = vsel %vm286_vm1, %v9665_v8, %v3230_v57  ;;  %v9667_v61 = vld [vmem:[#allocation41_spill] sm:$0xff]  ;;  %3499 = vst [vmem:[%s8351_s3 + $0x50] sm:$0x3f] %v3217_v58 }
 0x2b4   :  { %v3271_v10 = vmul.f32 %v9666_v9, %v7904_v46  ;;  %v9668_v19 = vrot.slane %v9667_v61, 2  ;;  %v3239_v54 = vadd.f32 %v3231_v18, %v3095_v49  ;;  %v3257_v27 = vrot.slane %v3248_v59, 2  ;;  %3500 = vst [vmem:[%s8351_s3 + $0x58] sm:$0x3f] %v3218_v34 }
 0x2b5   :  { %v3272_v20 = vmul.f32 %v9666_v9, %v7908_v37  ;;  %3497 = vst [vmem:[%s8351_s3 + $0x40] sm:$0xff] %v3215_v53  ;;  %v3001_v46 = vadd.f32 %v9670_v42, %v9669_v31  ;;  %v3002_v29 = vadd.f32 %v8128_v11, %v9671_v26  ;;  %v3120_v7 = vadd.f32 %v3114_v28, %v9672_v40  ;;  %v9675_v11 = vld [vmem:[#allocation40_spill] sm:$0xff] }
 0x2b6   :  { %v3234_v0 = vsel %vm286_vm1, %v9668_v19, %v3233_v48  ;;  %3498 = vst [vmem:[%s8351_s3 + $0x48] sm:$0xff] %v3216_v16  ;;  %v3121_v49 = vadd.f32 %v3110_v30, %v8135_v1  ;;  %v3122_v37 = vadd.f32 %v3113_v47, %v8138_v41  ;;  %v9674_v60 = vrot.slane %v9673_v4, 1  ;;  %v9679_v41 = vld [vmem:[#allocation39_spill] sm:$0xff] }
 0x2b7   :  { %v3240_v14 = vadd.f32 %v3234_v0, %v3096_v45  ;;  %v3241_v44 = vadd.f32 %v3230_v57, %v3097_v38  ;;  %v9676_v55 = vrot.slane %v9675_v11, 1  ;;  %v3242_v21 = vadd.f32 %v3233_v48, %v3098_v35  ;;  %v9680_v38 = vld [vmem:[#allocation57_spill] sm:$0xff]  ;;  %3501 = vst [vmem:[%s8351_s3 + $0x60] sm:$0xff] %v3239_v54 }
 0x2b8   :  { %v3135_v62 = vsel %vm141_vm0, %v9674_v60, %v3134_v63  ;;  %v9678_v5 = vrot.slane %v9677_v24, 2  ;;  %v3278_v30 = vrot.slane %v3271_v10, 2  ;;  %v9681_v22 = vrot.slane %v9680_v38, 2  ;;  %v9682_v35 = vld [vmem:[#allocation29_spill] sm:$0xff] }
 0x2b9   :  { %v3138_v45 = vsel %vm141_vm0, %v9676_v55, %v3137_v32  ;;  %v3143_v47 = vadd.f32 %v3135_v62, %v9679_v41  ;;  %v3281_v52 = vrot.slane %v3272_v20, 2  ;;  %3502 = vst [vmem:[%s8351_s3 + $0x68] sm:$0xff] %v3240_v14  ;;  %v3145_v2 = vadd.f32 %v3134_v63, %v3001_v46 }
 0x2ba   :  { %v3255_v1 = vsel %vm286_vm1, %v9678_v5, %v3254_v56  ;;  %v3258_v57 = vsel %vm286_vm1, %v9681_v22, %v3257_v27  ;;  %v3144_v48 = vadd.f32 %v3138_v45, %v9682_v35  ;;  %v3265_v51 = vadd.f32 %v3254_v56, %v3121_v49  ;;  %3503 = vst [vmem:[%s8351_s3 + $0x70] sm:$0x3f] %v3241_v44 }
 0x2bb   :  { %v3263_v43 = vadd.f32 %v3255_v1, %v3119_v50  ;;  %v3264_v59 = vadd.f32 %v3258_v57, %v3120_v7  ;;  %v3146_v3 = vadd.f32 %v3137_v32, %v3002_v29  ;;  %v3266_v23 = vadd.f32 %v3257_v27, %v3122_v37  ;;  %3504 = vst [vmem:[%s8351_s3 + $0x78] sm:$0x3f] %v3242_v21 }
 0x2bc   :  { %v9684_v28 = vrot.slane %v9683_v33, 2  ;;  %v9686_v36 = vrot.slane %v9685_v15, 2  ;;  %v3289_v32 = vadd.f32 %v3278_v30, %v3145_v2  ;;  %3507 = vst [vmem:[%s8351_s3 + $0x90] sm:$0x3f] %v3265_v51 }
 0x2bd   :  { %3505 = vst [vmem:[%s8351_s3 + $0x80] sm:$0xff] %v3263_v43  ;;  %v3290_v13 = vadd.f32 %v3281_v52, %v3146_v3 }
 0x2be   :  { %v3279_v39 = vsel %vm286_vm1, %v9684_v28, %v3278_v30  ;;  %v3282_v25 = vsel %vm286_vm1, %v9686_v36, %v3281_v52  ;;  %3506 = vst [vmem:[%s8351_s3 + $0x88] sm:$0xff] %v3264_v59 }
 0x2bf   :  { %v3287_v63 = vadd.f32 %v3279_v39, %v3143_v47  ;;  %v3288_v12 = vadd.f32 %v3282_v25, %v3144_v48  ;;  %3508 = vst [vmem:[%s8351_s3 + $0x98] sm:$0x3f] %v3266_v23 }
 0x2c0   :  { %3511 = vst [vmem:[%s8351_s3 + $0xb0] sm:$0x3f] %v3289_v32 }
 0x2c1   :  { %3509 = vst [vmem:[%s8351_s3 + $0xa0] sm:$0xff] %v3287_v63 }
 0x2c2   :  { %3510 = vst [vmem:[%s8351_s3 + $0xa8] sm:$0xff] %v3288_v12 }
 0x2c3   :  { %3512 = vst [vmem:[%s8351_s3 + $0xb8] sm:$0x3f] %v3290_v13 }
 0x2c4   :  { %3324 = vsyncpa [#allocation3], 1 }
 0x2c5   :  { %3325 = vsyncpa [#allocation4], 1 }
 0x2c6   :  { %3326 = vsyncpa [#allocation6], 1 }

</bundles_post_ra>
